<compile_context>
chip_gen: v6e
topology: v6e:2x2x1
jax: 0.10.0
libtpu: 0.0.40
codegen_flags: <defaults>
</compile_context>

<pallas_src>
import functools

import numpy as np
import jax
import jax.numpy as jnp
from jax.experimental import pallas as pl
from jax.experimental.pallas import tpu as pltpu

_HI = jax.lax.Precision.HIGHEST

# scipy.signal.gaussian(5, std=1.0)  (NOT normalized, exactly as in the module)
_GAUSS = np.exp(-0.5 * ((np.arange(5, dtype=np.float64) - 2.0) ** 2))
_G = [float(v) for v in _GAUSS]

_SOBEL = np.array([[1, 0, -1],
                   [2, 0, -2],
                   [1, 0, -1]], dtype=np.float32)

_DIR_FILTERS = np.stack([
    np.array([[0, 0, 0], [0, 1, -1], [0, 0, 0]]),   # 0   (-1 at right)
    np.array([[0, 0, 0], [0, 1, 0], [0, 0, -1]]),   # 45  (-1 at down-right)
    np.array([[0, 0, 0], [0, 1, 0], [0, -1, 0]]),   # 90  (-1 at down)
    np.array([[0, 0, 0], [0, 1, 0], [-1, 0, 0]]),   # 135 (-1 at down-left)
    np.array([[0, 0, 0], [-1, 1, 0], [0, 0, 0]]),   # 180 (-1 at left)
    np.array([[-1, 0, 0], [0, 1, 0], [0, 0, 0]]),   # 225 (-1 at up-left)
    np.array([[0, -1, 0], [0, 1, 0], [0, 0, 0]]),   # 270 (-1 at up)
    np.array([[0, 0, -1], [0, 1, 0], [0, 0, 0]]),   # 315 (-1 at up-right)
]).astype(np.float32)

_TAN_22_5 = 0.41421356237309503   # tan(22.5 deg)
_TAN_67_5 = 2.414213562373095     # tan(67.5 deg)


# ------------------------------------------------------- constant band matrices
def _band_matrices(W, Wp):
    """Banded-Toeplitz constants so every W-direction stencil is a right-matmul
    on the MXU.  Columns >= W are zeroed: this reproduces the reference's zero
    'same' padding AND keeps every column beyond the true image width
    identically zero through the whole (lane-dense, width-Wp) pipeline."""
    tg = np.zeros((W, Wp), np.float32)                    # 5-tap Gaussian along W
    for off in range(-2, 3):                              # tg[m, j] = g[(m - j) + 2]
        tg += _G[off + 2] * np.eye(W, Wp, k=-off, dtype=np.float32)
    eye_u = np.eye(Wp, k=1, dtype=np.float32)             # ones at m == j - 1
    eye_l = np.eye(Wp, k=-1, dtype=np.float32)            # ones at m == j + 1
    tdx = eye_u - eye_l                                    # out[j] = in[j-1] - in[j+1]
    tsm = eye_u + 2.0 * np.eye(Wp, dtype=np.float32) + eye_l   # [1, 2, 1] along W
    spr = eye_l.copy()                                     # out[j] = in[j+1]  (right)
    sml = eye_u.copy()                                     # out[j] = in[j-1]  (left)
    for m in (tg, tdx, tsm, spr, sml):
        m[:, W:] = 0.0
    to_j = lambda a: jnp.asarray(a, jnp.float32)
    return to_j(tg), to_j(tdx), to_j(tsm), to_j(spr), to_j(sml)


# ------------------------------------------------------------- in-kernel math
def _pad_rows(x, p):
    """Zero-pad a 2-D value by p rows on each side (sublane direction: cheap)."""
    z = jnp.zeros((p, x.shape[1]), x.dtype)
    return jnp.concatenate([z, x, z], axis=0)


def _grad_channel(x_c, tg, tdx, tsm):
    """Gaussian blur + Sobel of one (H, W) channel.  W-direction stages run on
    the MXU as banded matmuls (lane-dense width Wp); H-direction stages are
    sublane taps on a single padded buffer."""
    H = x_c.shape[0]
    # horizontal 5-tap Gaussian (also zero-extends W -> Wp): (H, W) @ (W, Wp)
    blur_h = jnp.dot(x_c, tg, precision=_HI, preferred_element_type=jnp.float32)
    # vertical 5-tap Gaussian: 5 sublane taps on ONE padded buffer
    bp = _pad_rows(blur_h, 2)
    blur = _G[0] * bp[0:H, :]
    for k in range(1, 5):
        blur = blur + _G[k] * bp[k:k + H, :]
    # Sobel is separable ([1,2,1] x [1,0,-1]): H part as sublane taps, W part as matmul
    sp1 = _pad_rows(blur, 1)
    up, dn = sp1[0:H, :], sp1[2:H + 2, :]
    smooth = up + 2.0 * blur + dn                                   # [1,2,1] along H
    diff = up - dn                                                  # [1,0,-1] along H
    gx = jnp.dot(smooth, tdx, precision=_HI, preferred_element_type=jnp.float32)
    gy = jnp.dot(diff, tsm, precision=_HI, preferred_element_type=jnp.float32)
    return gx, gy


# -------------------------------------------------------------- stage 1 kernel
def canny_dir_kernel(x0_ref, tg_ref, tdx_ref, tsm_ref, spr_ref, sml_ref, mp_ref):
    """Batch-0 directional min-pair maps, computed ONCE per call (the module's
    flat-index gather always reads batch 0's directional responses)."""
    H = x0_ref.shape[2]
    tg, tdx, tsm = tg_ref[...], tdx_ref[...], tsm_ref[...]
    Wp = tg.shape[1]

    gm0 = jnp.zeros((H, Wp), jnp.float32)
    for c in range(3):
        gx, gy = _grad_channel(x0_ref[0, c, :, :], tg, tdx, tsm)
        gm0 = gm0 + jnp.sqrt(gx * gx + gy * gy)

    # W-direction neighbors via +/-1 shift matmuls (zero beyond the image border),
    # H-direction neighbors via sublane taps on single padded buffers.
    gm_r = jnp.dot(gm0, spr_ref[...], precision=_HI, preferred_element_type=jnp.float32)
    gm_l = jnp.dot(gm0, sml_ref[...], precision=_HI, preferred_element_type=jnp.float32)

    def up_down(a):
        ap = _pad_rows(a, 1)
        return ap[0:H, :], ap[2:H + 2, :]          # a[i-1, :], a[i+1, :]

    up0, dn0 = up_down(gm0)
    upr, dnr = up_down(gm_r)
    upl, dnl = up_down(gm_l)

    # directional filter d response = gm0 - neighbor_d; filters d and d+4 use
    # opposite one-pixel shifts, so min(positive, negative) depends on d mod 4:
    mp_ref[0, :, :] = jnp.minimum(gm0 - gm_r, gm0 - gm_l)   # 0   / 180 deg
    mp_ref[1, :, :] = jnp.minimum(gm0 - dnr, gm0 - upl)     # 45  / 225 deg
    mp_ref[2, :, :] = jnp.minimum(gm0 - dn0, gm0 - up0)     # 90  / 270 deg
    mp_ref[3, :, :] = jnp.minimum(gm0 - dnl, gm0 - upr)     # 135 / 315 deg


# -------------------------------------------------------------- stage 2 kernel
def canny_nms_kernel(xb_ref, mp_ref, tg_ref, tdx_ref, tsm_ref, out_ref, *, threshold):
    """Per-batch gradients + orientation + non-max suppression + threshold."""
    H = xb_ref.shape[2]
    tg, tdx, tsm = tg_ref[...], tdx_ref[...], tsm_ref[...]
    Wp = tg.shape[1]

    gm = jnp.zeros((H, Wp), jnp.float32)
    gxs = jnp.zeros((H, Wp), jnp.float32)
    gys = jnp.zeros((H, Wp), jnp.float32)
    for c in range(3):
        gx, gy = _grad_channel(xb_ref[0, c, :, :], tg, tdx, tsm)
        gm = gm + jnp.sqrt(gx * gx + gy * gy)
        gxs = gxs + gx
        gys = gys + gy

    # octant selection WITHOUT atan2 (equivalent to round(angle/45) mod 4 away
    # from the measure-zero 22.5/67.5-degree class boundaries)
    ax = jnp.abs(gxs)
    ay = jnp.abs(gys)
    same_sign = (gxs > 0.0) == (gys > 0.0)
    diag = jnp.where(same_sign, mp_ref[1, :, :], mp_ref[3, :, :])
    mp = jnp.where(ay <= _TAN_22_5 * ax, mp_ref[0, :, :],
                   jnp.where(ay > _TAN_67_5 * ax, mp_ref[2, :, :], diag))

    thin = jnp.where(mp > 0.0, gm, 0.0)
    out_ref[0, 0, :, :] = jnp.where(thin < threshold, 0.0, thin)


# -------------------------------------------------------------------- wrapper
def _vmem_limit_bytes(H, W, Wp):
    # rough bound on live f32 planes per step (pipelined blocks + temporaries)
    need = (28 * H * Wp + 8 * H * W + 6 * Wp * Wp + 2 * W * Wp) * 4 + (4 << 20)
    # TODO(synk): on v7x (64 MiB/TC) large frames should switch to H-tiling with a
    #             4-row halo instead of raising this limit further.
    return int(min(max(need, 32 << 20), 96 << 20))


def canny_filter(x, threshold=10.0):
    """x: (B, C>=3, H, W) NCHW.  Returns 'thresholded': (B, 1, H, W) float32."""
    B, C, H, W = x.shape
    assert C >= 3, "CannyFilter expects at least 3 (RGB) channels"
    x = x.astype(jnp.float32)            # NO [:, :3] slice: the BlockSpec below
                                         # already restricts the DMA to RGB
    Wp = ((W + 127) // 128) * 128        # lane-dense working width
    tg, tdx, tsm, spr, sml = _band_matrices(W, Wp)
    vmem = _vmem_limit_bytes(H, W, Wp)
    mm_flops = 2 * H * W * Wp + 4 * H * Wp * Wp            # per-channel matmul flops

    # ---- stage 1 (runs once): batch-0 directional min-pair maps -------------
    stage1_cost = pl.CostEstimate(
        flops=int(3 * mm_flops + 4 * H * Wp * Wp + 48 * H * Wp),
        transcendentals=int(3 * H * Wp),
        bytes_accessed=int(4 * (3 * H * W + W * Wp + 4 * Wp * Wp + 4 * H * Wp)))
    mp = pl.pallas_call(
        canny_dir_kernel,
        out_shape=jax.ShapeDtypeStruct((4, H, Wp), jnp.float32),
        grid=(1,),
        in_specs=[
            pl.BlockSpec((1, 3, H, W), lambda i: (0, 0, 0, 0)),   # batch-0 RGB only
            pl.BlockSpec((W, Wp), lambda i: (0, 0)),
            pl.BlockSpec((Wp, Wp), lambda i: (0, 0)),
            pl.BlockSpec((Wp, Wp), lambda i: (0, 0)),
            pl.BlockSpec((Wp, Wp), lambda i: (0, 0)),
            pl.BlockSpec((Wp, Wp), lambda i: (0, 0)),
        ],
        out_specs=pl.BlockSpec((4, H, Wp), lambda i: (0, 0, 0)),
        compiler_params=pltpu.CompilerParams(
            dimension_semantics=("arbitrary",), vmem_limit_bytes=vmem),
        cost_estimate=stage1_cost,
    )(x, tg, tdx, tsm, spr, sml)

    # ---- stage 2 (grid over batch, megacore-parallel): gradients + NMS ------
    stage2_cost = pl.CostEstimate(
        flops=int(B * (3 * mm_flops + 64 * H * Wp)),
        transcendentals=int(B * 3 * H * Wp),
        bytes_accessed=int(4 * (B * 3 * H * W + B * H * Wp + 4 * H * Wp
                                + W * Wp + 2 * Wp * Wp)))
    kernel = functools.partial(canny_nms_kernel, threshold=float(threshold))
    out = pl.pallas_call(
        kernel,
        out_shape=jax.ShapeDtypeStruct((B, 1, H, Wp), jnp.float32),
        grid=(B,),
        in_specs=[
            pl.BlockSpec((1, 3, H, W), lambda b: (b, 0, 0, 0)),   # this batch's RGB
            pl.BlockSpec((4, H, Wp), lambda b: (0, 0, 0)),        # precomputed mp maps
            pl.BlockSpec((W, Wp), lambda b: (0, 0)),
            pl.BlockSpec((Wp, Wp), lambda b: (0, 0)),
            pl.BlockSpec((Wp, Wp), lambda b: (0, 0)),
        ],
        out_specs=pl.BlockSpec((1, 1, H, Wp), lambda b: (b, 0, 0, 0)),
        compiler_params=pltpu.CompilerParams(
            dimension_semantics=("parallel",), vmem_limit_bytes=vmem),
        cost_estimate=stage2_cost,
    )(x, mp, tg, tdx, tsm)

    # drop the lane-padding columns (no-op when W is already a multiple of 128)
    return out[..., :W] if Wp != W else out


# -------------------------------------------------- pure-XLA reference check
def canny_reference(x, threshold=10.0):
    """Plain-JAX replica of the PyTorch forward (incl. the flat-index gather
    quirk).  Used only as a numerical cross-check in __main__."""
    x = x.astype(jnp.float32)
    B, _, H, W = x.shape
    hi = jax.lax.Precision.HIGHEST

    def conv(img, w):
        kh, kw = int(w.shape[2]), int(w.shape[3])
        return jax.lax.conv_general_dilated(
            img, w, window_strides=(1, 1),
            padding=((kh // 2, kh // 2), (kw // 2, kw // 2)),
            dimension_numbers=("NCHW", "OIHW", "NCHW"),
            precision=hi)

    g = jnp.asarray(_GAUSS, jnp.float32)
    gauss_h = g.reshape(1, 1, 1, 5)
    gauss_v = g.reshape(1, 1, 5, 1)
    sob = jnp.asarray(_SOBEL, jnp.float32)
    sobel_h = sob.reshape(1, 1, 3, 3)
    sobel_v = sob.T.reshape(1, 1, 3, 3)
    dir_w = jnp.asarray(_DIR_FILTERS, jnp.float32).reshape(8, 1, 3, 3)

    grad_mag = jnp.zeros((B, 1, H, W), jnp.float32)
    gx_sum = jnp.zeros((B, 1, H, W), jnp.float32)
    gy_sum = jnp.zeros((B, 1, H, W), jnp.float32)
    for c in range(3):
        blur = conv(conv(x[:, c:c + 1], gauss_h), gauss_v)
        gx = conv(blur, sobel_h)
        gy = conv(blur, sobel_v)
        grad_mag = grad_mag + jnp.sqrt(gx * gx + gy * gy)
        gx_sum = gx_sum + gx
        gy_sum = gy_sum + gy

    ori = jnp.arctan2(gy_sum, gx_sum) * (180.0 / 3.14159) + 180.0
    ori = jnp.round(ori / 45.0) * 45.0
    all_f = conv(grad_mag, dir_w)                       # (B, 8, H, W)

    k_pos = (ori / 45.0) % 8.0
    k_neg = (ori / 45.0 + 4.0) % 8.0
    P = H * W
    pix = jnp.tile(jnp.arange(P, dtype=jnp.float32), (B,))
    flat = all_f.reshape(-1)
    pos = flat[(k_pos.reshape(-1) * P + pix).astype(jnp.int32)].reshape(B, 1, H, W)
    neg = flat[(k_neg.reshape(-1) * P + pix).astype(jnp.int32)].reshape(B, 1, H, W)
    is_max = jnp.minimum(pos, neg) > 0.0
    thin = jnp.where(is_max, grad_mag, 0.0)
    return jnp.where(thin < threshold, 0.0, thin)


if __name__ == "__main__":
    key = jax.random.PRNGKey(0)
    # Small image-like input: batch=2, 4 channels (only RGB used), 16x16, [0, 255].
    x = jax.random.uniform(key, (2, 4, 16, 16), dtype=jnp.float32) * 255.0

    out = canny_filter(x, threshold=10.0)
    out = jax.block_until_ready(out)
    assert out.shape == (2, 1, 16, 16) and out.dtype == jnp.float32
    assert bool(jnp.all(jnp.isfinite(out)))

    # Numerical cross-check against a plain-XLA replica of the PyTorch forward.
    # Allow a tiny fraction of pixels to differ (float-reassociation near the
    # NMS / threshold decision boundaries).
    ref = canny_reference(x, threshold=10.0)
    tol = 1e-3 * jnp.maximum(jnp.abs(ref), 1.0) + 1e-2
    frac_bad = float(jnp.mean((jnp.abs(out - ref) > tol).astype(jnp.float32)))
    assert frac_bad <= 0.02, f"kernel/reference mismatch fraction: {frac_bad}"

    print("KERNEL_OK")
</pallas_src>

<mosaic_0001>
module attributes {stable_mosaic.version = 11 : i64} {
  func.func @canny_dir_kernel(%arg0: i32, %arg1: memref<1x3x16x16xf32, #tpu.memory_space<vmem>>, %arg2: memref<16x128xf32, #tpu.memory_space<vmem>>, %arg3: memref<128x128xf32, #tpu.memory_space<vmem>>, %arg4: memref<128x128xf32, #tpu.memory_space<vmem>>, %arg5: memref<128x128xf32, #tpu.memory_space<vmem>>, %arg6: memref<128x128xf32, #tpu.memory_space<vmem>>, %arg7: memref<4x16x128xf32, #tpu.memory_space<vmem>>) attributes {dimension_semantics = [#tpu.dimension_semantics<arbitrary>], iteration_bounds = array<i64: 1>, scalar_prefetch = 0 : i64, scratch_operands = 0 : i64, tpu.core_type = #tpu.core_type<tc>, window_params = [{transform_indices = @transform_0, window_bounds = array<i64: 1, 3, 16, 16>}, {pipeline_mode = #tpu.pipeline_mode<synchronous>, transform_indices = @transform_1, window_bounds = array<i64: 16, 128>}, {pipeline_mode = #tpu.pipeline_mode<synchronous>, transform_indices = @transform_2, window_bounds = array<i64: 128, 128>}, {pipeline_mode = #tpu.pipeline_mode<synchronous>, transform_indices = @transform_3, window_bounds = array<i64: 128, 128>}, {pipeline_mode = #tpu.pipeline_mode<synchronous>, transform_indices = @transform_4, window_bounds = array<i64: 128, 128>}, {pipeline_mode = #tpu.pipeline_mode<synchronous>, transform_indices = @transform_5, window_bounds = array<i64: 128, 128>}, {pipeline_mode = #tpu.pipeline_mode<synchronous>, transform_indices = @transform_6, window_bounds = array<i64: 4, 16, 128>}]} {
    %c0 = arith.constant 0 : index
    %c0_0 = arith.constant 0 : index
    %0 = vector.load %arg2[%c0, %c0_0] : memref<16x128xf32, #tpu.memory_space<vmem>>, vector<16x128xf32>
    %c0_1 = arith.constant 0 : index
    %c0_2 = arith.constant 0 : index
    %1 = vector.load %arg3[%c0_1, %c0_2] : memref<128x128xf32, #tpu.memory_space<vmem>>, vector<128x128xf32>
    %c0_3 = arith.constant 0 : index
    %c0_4 = arith.constant 0 : index
    %2 = vector.load %arg4[%c0_3, %c0_4] : memref<128x128xf32, #tpu.memory_space<vmem>>, vector<128x128xf32>
    %cst = arith.constant 0.000000e+00 : f32
    %3 = vector.broadcast %cst : f32 to vector<16x128xf32>
    %c0_5 = arith.constant 0 : index
    %c0_6 = arith.constant 0 : index
    %c0_7 = arith.constant 0 : index
    %c0_8 = arith.constant 0 : index
    %4 = vector.load %arg1[%c0_5, %c0_6, %c0_7, %c0_8] : memref<1x3x16x16xf32, #tpu.memory_space<vmem>>, vector<1x1x16x16xf32>
    %5 = vector.shape_cast %4 : vector<1x1x16x16xf32> to vector<16x16xf32>
    %cst_9 = arith.constant dense<0.000000e+00> : vector<16x128xf32>
    %6 = tpu.matmul %5, %0, %cst_9 {dimension_numbers = #tpu.dot_dimension_numbers<[1], [0], [0], [1], [0, 0, 1, 1], [], []>, precision = #tpu.contract_precision<fp32>} : vector<16x16xf32>, vector<16x128xf32>, vector<16x128xf32> -> vector<16x128xf32>
    %cst_10 = arith.constant 0.000000e+00 : f32
    %7 = vector.broadcast %cst_10 : f32 to vector<2x128xf32>
    %8 = tpu.concatenate %7, %6, %7 in 0 : vector<2x128xf32>, vector<16x128xf32>, vector<2x128xf32> -> vector<20x128xf32>
    %9 = vector.extract_strided_slice %8 {offsets = [0, 0], sizes = [16, 128], strides = [1, 1]} : vector<20x128xf32> to vector<16x128xf32>
    %cst_11 = arith.constant 0.135335281 : f32
    %10 = vector.broadcast %cst_11 : f32 to vector<16x128xf32>
    %11 = arith.mulf %10, %9 : vector<16x128xf32>
    %12 = vector.extract_strided_slice %8 {offsets = [1, 0], sizes = [16, 128], strides = [1, 1]} : vector<20x128xf32> to vector<16x128xf32>
    %cst_12 = arith.constant 0.606530666 : f32
    %13 = vector.broadcast %cst_12 : f32 to vector<16x128xf32>
    %14 = arith.mulf %13, %12 : vector<16x128xf32>
    %15 = arith.addf %11, %14 : vector<16x128xf32>
    %16 = vector.extract_strided_slice %8 {offsets = [2, 0], sizes = [16, 128], strides = [1, 1]} : vector<20x128xf32> to vector<16x128xf32>
    %cst_13 = arith.constant 1.000000e+00 : f32
    %17 = vector.broadcast %cst_13 : f32 to vector<16x128xf32>
    %18 = arith.mulf %17, %16 : vector<16x128xf32>
    %19 = arith.addf %15, %18 : vector<16x128xf32>
    %20 = vector.extract_strided_slice %8 {offsets = [3, 0], sizes = [16, 128], strides = [1, 1]} : vector<20x128xf32> to vector<16x128xf32>
    %cst_14 = arith.constant 0.606530666 : f32
    %21 = vector.broadcast %cst_14 : f32 to vector<16x128xf32>
    %22 = arith.mulf %21, %20 : vector<16x128xf32>
    %23 = arith.addf %19, %22 : vector<16x128xf32>
    %24 = vector.extract_strided_slice %8 {offsets = [4, 0], sizes = [16, 128], strides = [1, 1]} : vector<20x128xf32> to vector<16x128xf32>
    %cst_15 = arith.constant 0.135335281 : f32
    %25 = vector.broadcast %cst_15 : f32 to vector<16x128xf32>
    %26 = arith.mulf %25, %24 : vector<16x128xf32>
    %27 = arith.addf %23, %26 : vector<16x128xf32>
    %cst_16 = arith.constant 0.000000e+00 : f32
    %28 = vector.broadcast %cst_16 : f32 to vector<1x128xf32>
    %29 = tpu.concatenate %28, %27, %28 in 0 : vector<1x128xf32>, vector<16x128xf32>, vector<1x128xf32> -> vector<18x128xf32>
    %30 = vector.extract_strided_slice %29 {offsets = [0, 0], sizes = [16, 128], strides = [1, 1]} : vector<18x128xf32> to vector<16x128xf32>
    %31 = vector.extract_strided_slice %29 {offsets = [2, 0], sizes = [16, 128], strides = [1, 1]} : vector<18x128xf32> to vector<16x128xf32>
    %cst_17 = arith.constant 2.000000e+00 : f32
    %32 = vector.broadcast %cst_17 : f32 to vector<16x128xf32>
    %33 = arith.mulf %32, %27 : vector<16x128xf32>
    %34 = arith.addf %30, %33 : vector<16x128xf32>
    %35 = arith.addf %34, %31 : vector<16x128xf32>
    %36 = arith.subf %30, %31 : vector<16x128xf32>
    %cst_18 = arith.constant dense<0.000000e+00> : vector<16x128xf32>
    %37 = tpu.matmul %35, %1, %cst_18 {dimension_numbers = #tpu.dot_dimension_numbers<[1], [0], [0], [1], [0, 0, 1, 1], [], []>, precision = #tpu.contract_precision<fp32>} : vector<16x128xf32>, vector<128x128xf32>, vector<16x128xf32> -> vector<16x128xf32>
    %cst_19 = arith.constant dense<0.000000e+00> : vector<16x128xf32>
    %38 = tpu.matmul %36, %2, %cst_19 {dimension_numbers = #tpu.dot_dimension_numbers<[1], [0], [0], [1], [0, 0, 1, 1], [], []>, precision = #tpu.contract_precision<fp32>} : vector<16x128xf32>, vector<128x128xf32>, vector<16x128xf32> -> vector<16x128xf32>
    %39 = arith.mulf %37, %37 : vector<16x128xf32>
    %40 = arith.mulf %38, %38 : vector<16x128xf32>
    %41 = arith.addf %39, %40 : vector<16x128xf32>
    %42 = math.sqrt %41 : vector<16x128xf32>
    %43 = arith.addf %3, %42 : vector<16x128xf32>
    %c0_20 = arith.constant 0 : index
    %c1 = arith.constant 1 : index
    %c0_21 = arith.constant 0 : index
    %c0_22 = arith.constant 0 : index
    %44 = vector.load %arg1[%c0_20, %c1, %c0_21, %c0_22] : memref<1x3x16x16xf32, #tpu.memory_space<vmem>>, vector<1x1x16x16xf32>
    %45 = vector.shape_cast %44 : vector<1x1x16x16xf32> to vector<16x16xf32>
    %cst_23 = arith.constant dense<0.000000e+00> : vector<16x128xf32>
    %46 = tpu.matmul %45, %0, %cst_23 {dimension_numbers = #tpu.dot_dimension_numbers<[1], [0], [0], [1], [0, 0, 1, 1], [], []>, precision = #tpu.contract_precision<fp32>} : vector<16x16xf32>, vector<16x128xf32>, vector<16x128xf32> -> vector<16x128xf32>
    %cst_24 = arith.constant 0.000000e+00 : f32
    %47 = vector.broadcast %cst_24 : f32 to vector<2x128xf32>
    %48 = tpu.concatenate %47, %46, %47 in 0 : vector<2x128xf32>, vector<16x128xf32>, vector<2x128xf32> -> vector<20x128xf32>
    %49 = vector.extract_strided_slice %48 {offsets = [0, 0], sizes = [16, 128], strides = [1, 1]} : vector<20x128xf32> to vector<16x128xf32>
    %cst_25 = arith.constant 0.135335281 : f32
    %50 = vector.broadcast %cst_25 : f32 to vector<16x128xf32>
    %51 = arith.mulf %50, %49 : vector<16x128xf32>
    %52 = vector.extract_strided_slice %48 {offsets = [1, 0], sizes = [16, 128], strides = [1, 1]} : vector<20x128xf32> to vector<16x128xf32>
    %cst_26 = arith.constant 0.606530666 : f32
    %53 = vector.broadcast %cst_26 : f32 to vector<16x128xf32>
    %54 = arith.mulf %53, %52 : vector<16x128xf32>
    %55 = arith.addf %51, %54 : vector<16x128xf32>
    %56 = vector.extract_strided_slice %48 {offsets = [2, 0], sizes = [16, 128], strides = [1, 1]} : vector<20x128xf32> to vector<16x128xf32>
    %cst_27 = arith.constant 1.000000e+00 : f32
    %57 = vector.broadcast %cst_27 : f32 to vector<16x128xf32>
    %58 = arith.mulf %57, %56 : vector<16x128xf32>
    %59 = arith.addf %55, %58 : vector<16x128xf32>
    %60 = vector.extract_strided_slice %48 {offsets = [3, 0], sizes = [16, 128], strides = [1, 1]} : vector<20x128xf32> to vector<16x128xf32>
    %cst_28 = arith.constant 0.606530666 : f32
    %61 = vector.broadcast %cst_28 : f32 to vector<16x128xf32>
    %62 = arith.mulf %61, %60 : vector<16x128xf32>
    %63 = arith.addf %59, %62 : vector<16x128xf32>
    %64 = vector.extract_strided_slice %48 {offsets = [4, 0], sizes = [16, 128], strides = [1, 1]} : vector<20x128xf32> to vector<16x128xf32>
    %cst_29 = arith.constant 0.135335281 : f32
    %65 = vector.broadcast %cst_29 : f32 to vector<16x128xf32>
    %66 = arith.mulf %65, %64 : vector<16x128xf32>
    %67 = arith.addf %63, %66 : vector<16x128xf32>
    %cst_30 = arith.constant 0.000000e+00 : f32
    %68 = vector.broadcast %cst_30 : f32 to vector<1x128xf32>
    %69 = tpu.concatenate %68, %67, %68 in 0 : vector<1x128xf32>, vector<16x128xf32>, vector<1x128xf32> -> vector<18x128xf32>
    %70 = vector.extract_strided_slice %69 {offsets = [0, 0], sizes = [16, 128], strides = [1, 1]} : vector<18x128xf32> to vector<16x128xf32>
    %71 = vector.extract_strided_slice %69 {offsets = [2, 0], sizes = [16, 128], strides = [1, 1]} : vector<18x128xf32> to vector<16x128xf32>
    %cst_31 = arith.constant 2.000000e+00 : f32
    %72 = vector.broadcast %cst_31 : f32 to vector<16x128xf32>
    %73 = arith.mulf %72, %67 : vector<16x128xf32>
    %74 = arith.addf %70, %73 : vector<16x128xf32>
    %75 = arith.addf %74, %71 : vector<16x128xf32>
    %76 = arith.subf %70, %71 : vector<16x128xf32>
    %cst_32 = arith.constant dense<0.000000e+00> : vector<16x128xf32>
    %77 = tpu.matmul %75, %1, %cst_32 {dimension_numbers = #tpu.dot_dimension_numbers<[1], [0], [0], [1], [0, 0, 1, 1], [], []>, precision = #tpu.contract_precision<fp32>} : vector<16x128xf32>, vector<128x128xf32>, vector<16x128xf32> -> vector<16x128xf32>
    %cst_33 = arith.constant dense<0.000000e+00> : vector<16x128xf32>
    %78 = tpu.matmul %76, %2, %cst_33 {dimension_numbers = #tpu.dot_dimension_numbers<[1], [0], [0], [1], [0, 0, 1, 1], [], []>, precision = #tpu.contract_precision<fp32>} : vector<16x128xf32>, vector<128x128xf32>, vector<16x128xf32> -> vector<16x128xf32>
    %79 = arith.mulf %77, %77 : vector<16x128xf32>
    %80 = arith.mulf %78, %78 : vector<16x128xf32>
    %81 = arith.addf %79, %80 : vector<16x128xf32>
    %82 = math.sqrt %81 : vector<16x128xf32>
    %83 = arith.addf %43, %82 : vector<16x128xf32>
    %c0_34 = arith.constant 0 : index
    %c2 = arith.constant 2 : index
    %c0_35 = arith.constant 0 : index
    %c0_36 = arith.constant 0 : index
    %84 = vector.load %arg1[%c0_34, %c2, %c0_35, %c0_36] : memref<1x3x16x16xf32, #tpu.memory_space<vmem>>, vector<1x1x16x16xf32>
    %85 = vector.shape_cast %84 : vector<1x1x16x16xf32> to vector<16x16xf32>
    %cst_37 = arith.constant dense<0.000000e+00> : vector<16x128xf32>
    %86 = tpu.matmul %85, %0, %cst_37 {dimension_numbers = #tpu.dot_dimension_numbers<[1], [0], [0], [1], [0, 0, 1, 1], [], []>, precision = #tpu.contract_precision<fp32>} : vector<16x16xf32>, vector<16x128xf32>, vector<16x128xf32> -> vector<16x128xf32>
    %cst_38 = arith.constant 0.000000e+00 : f32
    %87 = vector.broadcast %cst_38 : f32 to vector<2x128xf32>
    %88 = tpu.concatenate %87, %86, %87 in 0 : vector<2x128xf32>, vector<16x128xf32>, vector<2x128xf32> -> vector<20x128xf32>
    %89 = vector.extract_strided_slice %88 {offsets = [0, 0], sizes = [16, 128], strides = [1, 1]} : vector<20x128xf32> to vector<16x128xf32>
    %cst_39 = arith.constant 0.135335281 : f32
    %90 = vector.broadcast %cst_39 : f32 to vector<16x128xf32>
    %91 = arith.mulf %90, %89 : vector<16x128xf32>
    %92 = vector.extract_strided_slice %88 {offsets = [1, 0], sizes = [16, 128], strides = [1, 1]} : vector<20x128xf32> to vector<16x128xf32>
    %cst_40 = arith.constant 0.606530666 : f32
    %93 = vector.broadcast %cst_40 : f32 to vector<16x128xf32>
    %94 = arith.mulf %93, %92 : vector<16x128xf32>
    %95 = arith.addf %91, %94 : vector<16x128xf32>
    %96 = vector.extract_strided_slice %88 {offsets = [2, 0], sizes = [16, 128], strides = [1, 1]} : vector<20x128xf32> to vector<16x128xf32>
    %cst_41 = arith.constant 1.000000e+00 : f32
    %97 = vector.broadcast %cst_41 : f32 to vector<16x128xf32>
    %98 = arith.mulf %97, %96 : vector<16x128xf32>
    %99 = arith.addf %95, %98 : vector<16x128xf32>
    %100 = vector.extract_strided_slice %88 {offsets = [3, 0], sizes = [16, 128], strides = [1, 1]} : vector<20x128xf32> to vector<16x128xf32>
    %cst_42 = arith.constant 0.606530666 : f32
    %101 = vector.broadcast %cst_42 : f32 to vector<16x128xf32>
    %102 = arith.mulf %101, %100 : vector<16x128xf32>
    %103 = arith.addf %99, %102 : vector<16x128xf32>
    %104 = vector.extract_strided_slice %88 {offsets = [4, 0], sizes = [16, 128], strides = [1, 1]} : vector<20x128xf32> to vector<16x128xf32>
    %cst_43 = arith.constant 0.135335281 : f32
    %105 = vector.broadcast %cst_43 : f32 to vector<16x128xf32>
    %106 = arith.mulf %105, %104 : vector<16x128xf32>
    %107 = arith.addf %103, %106 : vector<16x128xf32>
    %cst_44 = arith.constant 0.000000e+00 : f32
    %108 = vector.broadcast %cst_44 : f32 to vector<1x128xf32>
    %109 = tpu.concatenate %108, %107, %108 in 0 : vector<1x128xf32>, vector<16x128xf32>, vector<1x128xf32> -> vector<18x128xf32>
    %110 = vector.extract_strided_slice %109 {offsets = [0, 0], sizes = [16, 128], strides = [1, 1]} : vector<18x128xf32> to vector<16x128xf32>
    %111 = vector.extract_strided_slice %109 {offsets = [2, 0], sizes = [16, 128], strides = [1, 1]} : vector<18x128xf32> to vector<16x128xf32>
    %cst_45 = arith.constant 2.000000e+00 : f32
    %112 = vector.broadcast %cst_45 : f32 to vector<16x128xf32>
    %113 = arith.mulf %112, %107 : vector<16x128xf32>
    %114 = arith.addf %110, %113 : vector<16x128xf32>
    %115 = arith.addf %114, %111 : vector<16x128xf32>
    %116 = arith.subf %110, %111 : vector<16x128xf32>
    %cst_46 = arith.constant dense<0.000000e+00> : vector<16x128xf32>
    %117 = tpu.matmul %115, %1, %cst_46 {dimension_numbers = #tpu.dot_dimension_numbers<[1], [0], [0], [1], [0, 0, 1, 1], [], []>, precision = #tpu.contract_precision<fp32>} : vector<16x128xf32>, vector<128x128xf32>, vector<16x128xf32> -> vector<16x128xf32>
    %cst_47 = arith.constant dense<0.000000e+00> : vector<16x128xf32>
    %118 = tpu.matmul %116, %2, %cst_47 {dimension_numbers = #tpu.dot_dimension_numbers<[1], [0], [0], [1], [0, 0, 1, 1], [], []>, precision = #tpu.contract_precision<fp32>} : vector<16x128xf32>, vector<128x128xf32>, vector<16x128xf32> -> vector<16x128xf32>
    %119 = arith.mulf %117, %117 : vector<16x128xf32>
    %120 = arith.mulf %118, %118 : vector<16x128xf32>
    %121 = arith.addf %119, %120 : vector<16x128xf32>
    %122 = math.sqrt %121 : vector<16x128xf32>
    %123 = arith.addf %83, %122 : vector<16x128xf32>
    %c0_48 = arith.constant 0 : index
    %c0_49 = arith.constant 0 : index
    %124 = vector.load %arg5[%c0_48, %c0_49] : memref<128x128xf32, #tpu.memory_space<vmem>>, vector<128x128xf32>
    %cst_50 = arith.constant dense<0.000000e+00> : vector<16x128xf32>
    %125 = tpu.matmul %123, %124, %cst_50 {dimension_numbers = #tpu.dot_dimension_numbers<[1], [0], [0], [1], [0, 0, 1, 1], [], []>, precision = #tpu.contract_precision<fp32>} : vector<16x128xf32>, vector<128x128xf32>, vector<16x128xf32> -> vector<16x128xf32>
    %c0_51 = arith.constant 0 : index
    %c0_52 = arith.constant 0 : index
    %126 = vector.load %arg6[%c0_51, %c0_52] : memref<128x128xf32, #tpu.memory_space<vmem>>, vector<128x128xf32>
    %cst_53 = arith.constant dense<0.000000e+00> : vector<16x128xf32>
    %127 = tpu.matmul %123, %126, %cst_53 {dimension_numbers = #tpu.dot_dimension_numbers<[1], [0], [0], [1], [0, 0, 1, 1], [], []>, precision = #tpu.contract_precision<fp32>} : vector<16x128xf32>, vector<128x128xf32>, vector<16x128xf32> -> vector<16x128xf32>
    %cst_54 = arith.constant 0.000000e+00 : f32
    %128 = vector.broadcast %cst_54 : f32 to vector<1x128xf32>
    %129 = tpu.concatenate %128, %123, %128 in 0 : vector<1x128xf32>, vector<16x128xf32>, vector<1x128xf32> -> vector<18x128xf32>
    %130 = vector.extract_strided_slice %129 {offsets = [0, 0], sizes = [16, 128], strides = [1, 1]} : vector<18x128xf32> to vector<16x128xf32>
    %131 = vector.extract_strided_slice %129 {offsets = [2, 0], sizes = [16, 128], strides = [1, 1]} : vector<18x128xf32> to vector<16x128xf32>
    %cst_55 = arith.constant 0.000000e+00 : f32
    %132 = vector.broadcast %cst_55 : f32 to vector<1x128xf32>
    %133 = tpu.concatenate %132, %125, %132 in 0 : vector<1x128xf32>, vector<16x128xf32>, vector<1x128xf32> -> vector<18x128xf32>
    %134 = vector.extract_strided_slice %133 {offsets = [0, 0], sizes = [16, 128], strides = [1, 1]} : vector<18x128xf32> to vector<16x128xf32>
    %135 = vector.extract_strided_slice %133 {offsets = [2, 0], sizes = [16, 128], strides = [1, 1]} : vector<18x128xf32> to vector<16x128xf32>
    %cst_56 = arith.constant 0.000000e+00 : f32
    %136 = vector.broadcast %cst_56 : f32 to vector<1x128xf32>
    %137 = tpu.concatenate %136, %127, %136 in 0 : vector<1x128xf32>, vector<16x128xf32>, vector<1x128xf32> -> vector<18x128xf32>
    %138 = vector.extract_strided_slice %137 {offsets = [0, 0], sizes = [16, 128], strides = [1, 1]} : vector<18x128xf32> to vector<16x128xf32>
    %139 = vector.extract_strided_slice %137 {offsets = [2, 0], sizes = [16, 128], strides = [1, 1]} : vector<18x128xf32> to vector<16x128xf32>
    %140 = arith.subf %123, %125 : vector<16x128xf32>
    %141 = arith.subf %123, %127 : vector<16x128xf32>
    %142 = arith.minimumf %140, %141 : vector<16x128xf32>
    %c0_57 = arith.constant 0 : index
    %c0_58 = arith.constant 0 : index
    %c0_59 = arith.constant 0 : index
    %143 = vector.load %arg7[%c0_57, %c0_58, %c0_59] : memref<4x16x128xf32, #tpu.memory_space<vmem>>, vector<1x16x128xf32>
    %144 = vector.shape_cast %143 : vector<1x16x128xf32> to vector<16x128xf32>
    %145 = vector.shape_cast %142 : vector<16x128xf32> to vector<1x16x128xf32>
    tpu.vector_store %arg7[%c0_57, %c0_58, %c0_59], %145 {strides = array<i32>} : memref<4x16x128xf32, #tpu.memory_space<vmem>>, vector<1x16x128xf32>,
    %146 = arith.subf %123, %135 : vector<16x128xf32>
    %147 = arith.subf %123, %138 : vector<16x128xf32>
    %148 = arith.minimumf %146, %147 : vector<16x128xf32>
    %c1_60 = arith.constant 1 : index
    %c0_61 = arith.constant 0 : index
    %c0_62 = arith.constant 0 : index
    %149 = vector.load %arg7[%c1_60, %c0_61, %c0_62] : memref<4x16x128xf32, #tpu.memory_space<vmem>>, vector<1x16x128xf32>
    %150 = vector.shape_cast %149 : vector<1x16x128xf32> to vector<16x128xf32>
    %151 = vector.shape_cast %148 : vector<16x128xf32> to vector<1x16x128xf32>
    tpu.vector_store %arg7[%c1_60, %c0_61, %c0_62], %151 {strides = array<i32>} : memref<4x16x128xf32, #tpu.memory_space<vmem>>, vector<1x16x128xf32>,
    %152 = arith.subf %123, %131 : vector<16x128xf32>
    %153 = arith.subf %123, %130 : vector<16x128xf32>
    %154 = arith.minimumf %152, %153 : vector<16x128xf32>
    %c2_63 = arith.constant 2 : index
    %c0_64 = arith.constant 0 : index
    %c0_65 = arith.constant 0 : index
    %155 = vector.load %arg7[%c2_63, %c0_64, %c0_65] : memref<4x16x128xf32, #tpu.memory_space<vmem>>, vector<1x16x128xf32>
    %156 = vector.shape_cast %155 : vector<1x16x128xf32> to vector<16x128xf32>
    %157 = vector.shape_cast %154 : vector<16x128xf32> to vector<1x16x128xf32>
    tpu.vector_store %arg7[%c2_63, %c0_64, %c0_65], %157 {strides = array<i32>} : memref<4x16x128xf32, #tpu.memory_space<vmem>>, vector<1x16x128xf32>,
    %158 = arith.subf %123, %139 : vector<16x128xf32>
    %159 = arith.subf %123, %134 : vector<16x128xf32>
    %160 = arith.minimumf %158, %159 : vector<16x128xf32>
    %c3 = arith.constant 3 : index
    %c0_66 = arith.constant 0 : index
    %c0_67 = arith.constant 0 : index
    %161 = vector.load %arg7[%c3, %c0_66, %c0_67] : memref<4x16x128xf32, #tpu.memory_space<vmem>>, vector<1x16x128xf32>
    %162 = vector.shape_cast %161 : vector<1x16x128xf32> to vector<16x128xf32>
    %163 = vector.shape_cast %160 : vector<16x128xf32> to vector<1x16x128xf32>
    tpu.vector_store %arg7[%c3, %c0_66, %c0_67], %163 {strides = array<i32>} : memref<4x16x128xf32, #tpu.memory_space<vmem>>, vector<1x16x128xf32>,
    return
  }
  func.func @transform_0(%arg0: i32) -> (i32, i32, i32, i32) {
    %c0_i32 = arith.constant 0 : i32
    %c0_i32_0 = arith.constant 0 : i32
    %c0_i32_1 = arith.constant 0 : i32
    %c0_i32_2 = arith.constant 0 : i32
    %c0_i32_3 = arith.constant 0 : i32
    return %c0_i32, %c0_i32_0, %c0_i32_1, %c0_i32_2 : i32, i32, i32, i32
  }
  func.func @transform_1(%arg0: i32) -> (i32, i32) {
    %c0_i32 = arith.constant 0 : i32
    %c0_i32_0 = arith.constant 0 : i32
    %c0_i32_1 = arith.constant 0 : i32
    return %c0_i32, %c0_i32_0 : i32, i32
  }
  func.func @transform_2(%arg0: i32) -> (i32, i32) {
    %c0_i32 = arith.constant 0 : i32
    %c0_i32_0 = arith.constant 0 : i32
    %c0_i32_1 = arith.constant 0 : i32
    return %c0_i32, %c0_i32_0 : i32, i32
  }
  func.func @transform_3(%arg0: i32) -> (i32, i32) {
    %c0_i32 = arith.constant 0 : i32
    %c0_i32_0 = arith.constant 0 : i32
    %c0_i32_1 = arith.constant 0 : i32
    return %c0_i32, %c0_i32_0 : i32, i32
  }
  func.func @transform_4(%arg0: i32) -> (i32, i32) {
    %c0_i32 = arith.constant 0 : i32
    %c0_i32_0 = arith.constant 0 : i32
    %c0_i32_1 = arith.constant 0 : i32
    return %c0_i32, %c0_i32_0 : i32, i32
  }
  func.func @transform_5(%arg0: i32) -> (i32, i32) {
    %c0_i32 = arith.constant 0 : i32
    %c0_i32_0 = arith.constant 0 : i32
    %c0_i32_1 = arith.constant 0 : i32
    return %c0_i32, %c0_i32_0 : i32, i32
  }
  func.func @transform_6(%arg0: i32) -> (i32, i32, i32) {
    %c0_i32 = arith.constant 0 : i32
    %c0_i32_0 = arith.constant 0 : i32
    %c0_i32_1 = arith.constant 0 : i32
    %c0_i32_2 = arith.constant 0 : i32
    return %c0_i32, %c0_i32_0, %c0_i32_1 : i32, i32, i32
  }
}

</mosaic_0001>

<bundles_post_ra>
// kernel: tpu_custom_call.1
= control target key start
LH: loop header
LB: loop body
LE: loop exit
PB: predicated region body
PF: predicated region fallthrough
CT: control target
= control target key end

     0   :  { %11 = vsyncpa [#allocation3], 0  ;;  %s13269_s0 = inlined_call_operand.hbm [shape: f32[2,4,16,16], index: 0, kind: input, shape index: {}]   ;;  %s13270_s1 = inlined_call_operand.hbm [shape: f32[16,128], index: 1, kind: input, shape index: {}]   ;;  %s13271_s2 = inlined_call_operand.hbm [shape: f32[128,128], index: 2, kind: input, shape index: {}]   ;;  %s13272_s3 = inlined_call_operand.hbm [shape: f32[128,128], index: 3, kind: input, shape index: {}]   ;;  %s13273_s4 = inlined_call_operand.hbm [shape: f32[128,128], index: 4, kind: input, shape index: {}]   ;;  %s13274_s5 = inlined_call_operand.hbm [shape: f32[128,128], index: 5, kind: input, shape index: {}]   ;;  %s13275_s6 = inlined_call_operand.hbm [shape: f32[4,16,128], index: 6, kind: output, shape index: {}]  }
   0x1   :  { %12 = vsyncpa [#allocation6], 0 }
   0x2   :  { %13 = vsyncpa [#allocation9], 0 }
   0x3   :  { %14 = vsyncpa [#allocation12], 0 }
   0x4   :  { %15 = vsyncpa [#allocation4], 0  ;;  %s10535_s21 = smov [#allocation5]   ;;  %s10536_s23 = smov [#allocation8]  }
   0x5   :  { %s33_s22 = sshll.u32 %s10535_s21, 4  ;;  %s57_s24 = sshll.u32 %s10536_s23, 4  ;;  %s34_s22 = int_to_ptr.vmem [resolvable:$true] %s33_s22  ;;  %s58_s24 = int_to_ptr.vmem [resolvable:$true] %s57_s24 }
   0x6   :  { %s10393_s25 = scalar_lea.vmem %s34_s22, 256  ;;  %p10398_p1 = scmp.lt.s32.totalorder %s34_s22, %s34_s22 }
   0x7   :  { %p10394_p0 = scmp.ne.s32.totalorder %s34_s22, %s10393_s25  ;;  %p10399_p2 = scmp.lt.s32.totalorder %s10393_s25, %s10393_s25 }
   0x9   :  { %p10400_p3 = por %p10399_p2, %p10398_p1 }
   0xb   :  { %p10401_p4 = pnand %p10400_p3, %p10394_p0 }
   0xd   :  { %10404 = shalt.err (!%p10401_p4)
}
   0xe   :  { %s10537_s26 = smov 128   ;;  %s10538_s27 = smov 8  }
   0xf   :  { %39 = dma.hbm_to_vmem [thread:$0]  %s13270_s1, 256, %s34_s22, [#allocation6], %s10537_s26, %s10537_s26, %s10538_s27  }
  0x10   :  { %s10413_s30 = scalar_lea.vmem %s58_s24, 2048  ;;  %p10418_p6 = scmp.lt.s32.totalorder %s58_s24, %s58_s24 }
  0x11   :  { %p10414_p5 = scmp.ne.s32.totalorder %s58_s24, %s10413_s30  ;;  %p10419_p7 = scmp.lt.s32.totalorder %s10413_s30, %s10413_s30 }
  0x13   :  { %p10420_p8 = por %p10419_p7, %p10418_p6 }
  0x15   :  { %p10421_p9 = pnand %p10420_p8, %p10414_p5 }
  0x17   :  { %10424 = shalt.err (!%p10421_p9)
}
  0x18   :  { %63 = dma.hbm_to_vmem [thread:$0]  %s13272_s3, 2048, %s58_s24, [#allocation9], %s10537_s26, %s10537_s26, %s10538_s27  }
  0x19   :  { %s10539_s9 = smov [#allocation2]   ;;  %s10540_s11 = smov [#allocation7]  }
  0x1a   :  { %s21_s10 = sshll.u32 %s10539_s9, 4  ;;  %s45_s12 = sshll.u32 %s10540_s11, 4  ;;  %s22_s10 = int_to_ptr.vmem [resolvable:$true] %s21_s10  ;;  %s46_s12 = int_to_ptr.vmem [resolvable:$true] %s45_s12 }
  0x1b   :  { %s10433_s1 = scalar_lea.vmem %s22_s10, 768  ;;  %p10438_p11 = scmp.lt.s32.totalorder %s22_s10, %s22_s10 }
  0x1c   :  { %p10434_p10 = scmp.ne.s32.totalorder %s22_s10, %s10433_s1  ;;  %p10439_p12 = scmp.lt.s32.totalorder %s10433_s1, %s10433_s1 }
  0x1e   :  { %p10440_p13 = por %p10439_p12, %p10438_p11 }
  0x20   :  { %p10441_p0 = pnand %p10440_p13, %p10434_p10 }
  0x22   :  { %10444 = shalt.err (!%p10441_p0)
}
  0x23   :  { %27 = dma.hbm_to_vmem [thread:$0]  %s13269_s0, 768, %s22_s10, [#allocation3], %s10537_s26, %s10537_s26, %s10538_s27  }
  0x24   :  { %s10453_s3 = scalar_lea.vmem %s46_s12, 2048  ;;  %p10458_p2 = scmp.lt.s32.totalorder %s46_s12, %s46_s12 }
  0x25   :  { %p10454_p1 = scmp.ne.s32.totalorder %s46_s12, %s10453_s3  ;;  %p10459_p3 = scmp.lt.s32.totalorder %s10453_s3, %s10453_s3 }
  0x27   :  { %p10460_p4 = por %p10459_p3, %p10458_p2 }
  0x29   :  { %p10461_p5 = pnand %p10460_p4, %p10454_p1 }
  0x2b   :  { %10464 = shalt.err (!%p10461_p5)
}
  0x2c   :  { %51 = dma.hbm_to_vmem [thread:$0]  %s13271_s2, 2048, %s46_s12, [#allocation6], %s10537_s26, %s10537_s26, %s10538_s27  }
  0x2d   :  { %s10541_s17 = smov [#allocation10]   ;;  %s10542_s19 = smov [#allocation11]  }
  0x2e   :  { %s69_s18 = sshll.u32 %s10541_s17, 4  ;;  %s81_s20 = sshll.u32 %s10542_s19, 4  ;;  %s70_s18 = int_to_ptr.vmem [resolvable:$true] %s69_s18  ;;  %s82_s20 = int_to_ptr.vmem [resolvable:$true] %s81_s20 }
  0x2f   :  { %s10473_s0 = scalar_lea.vmem %s70_s18, 2048  ;;  %p10478_p7 = scmp.lt.s32.totalorder %s70_s18, %s70_s18 }
  0x30   :  { %p10474_p6 = scmp.ne.s32.totalorder %s70_s18, %s10473_s0  ;;  %p10479_p8 = scmp.lt.s32.totalorder %s10473_s0, %s10473_s0 }
  0x32   :  { %p10480_p9 = por %p10479_p8, %p10478_p7 }
  0x34   :  { %p10481_p10 = pnand %p10480_p9, %p10474_p6 }
  0x36   :  { %10484 = shalt.err (!%p10481_p10)
}
  0x37   :  { %75 = dma.hbm_to_vmem [thread:$0]  %s13273_s4, 2048, %s70_s18, [#allocation9], %s10537_s26, %s10537_s26, %s10538_s27  }
  0x38   :  { %s10493_s2 = scalar_lea.vmem %s82_s20, 2048  ;;  %p10498_p12 = scmp.lt.s32.totalorder %s82_s20, %s82_s20 }
  0x39   :  { %p10494_p11 = scmp.ne.s32.totalorder %s82_s20, %s10493_s2  ;;  %p10499_p13 = scmp.lt.s32.totalorder %s10493_s2, %s10493_s2 }
  0x3b   :  { %p10500_p0 = por %p10499_p13, %p10498_p12 }
  0x3d   :  { %p10501_p1 = pnand %p10500_p0, %p10494_p11 }
  0x3f   :  { %10504 = shalt.err (!%p10501_p1)
}
  0x40   :  { %87 = dma.hbm_to_vmem [thread:$0]  %s13274_s5, 2048, %s82_s20, [#allocation12], %s10537_s26, %s10537_s26, %s10538_s27  }
  0x41   :  { %10525 = dma.done.wait [#allocation3], 768  }
  0x42   :  { %10526 = vsyncadd [#allocation3], 4294966528 }
  0x43   :  { %10527 = dma.done.wait [#allocation6], 2304  }
  0x44   :  { %10528 = vsyncadd [#allocation6], 4294964992 }
  0x45   :  { %10529 = dma.done.wait [#allocation9], 4096  }
  0x46   :  { %10530 = vsyncadd [#allocation9], 4294963200 }
  0x47   :  { %10531 = dma.done.wait [#allocation12], 2048  }
  0x48   :  { %10532 = vsyncadd [#allocation12], 4294965248  ;;  %vm142_vm0 = vcmask 130048   ;;  %v107_v0 = vld [vmem:[#allocation5 + $0x8] sm:$0xff]  ;;  %v106_v1 = vld [vmem:[#allocation5] sm:$0xff]  ;;  %vm653_vm1 = vcmask 1041408  }
  0x49   :  { %v140_v2 = vld [vmem:[#allocation2] sm:$0xff]  ;;  %v10615_v3 = vand.u32 4294901760, %v107_v0  ;;  %v10617_v4 = vand.u32 4294901760, %v106_v1  ;;  %v141_v6 = vld [vmem:[#allocation2 + $0x8] sm:$0xff]  ;;  %v123_v26 = vld [vmem:[#allocation7 + $0x78] sm:$0xff]  ;;  %vm670_vm2 = vcmask 1046528  }
  0x4a   :  { %v144_v5 = vsel %vm142_vm0, %v140_v2, 0  ;;  %v147_v8 = vsel %vm142_vm0, %v141_v6, 0  ;;  %v10665_v27 = vand.u32 4294901760, %v123_v26  ;;  %v122_v28 = vld [vmem:[#allocation7 + $0x70] sm:$0xff]  ;;  %v121_v33 = vld [vmem:[#allocation7 + $0x68] sm:$0xff]  ;;  %v120_v37 = vld [vmem:[#allocation7 + $0x60] sm:$0xff] }
  0x4b   :  { %13681 = vst [vmem:[#allocation19_spill] sm:$0xff] %v10615_v3  ;;  %13682 = vst [vmem:[#allocation20_spill] sm:$0xff] %v10617_v4  ;;  %v216_v7 = vand.u32 4294901760, %v144_v5  ;;  %8558 = vmatprep.subr.mxu0 %v10615_v3  ;;  %v10623_v9 = vsub.f32 %v107_v0, %v10615_v3  ;;  %v226_v10 = vand.u32 4294901760, %v147_v8  ;;  %v10626_v11 = vsub.f32 %v106_v1, %v10617_v4  ;;  %v119_v42 = vld [vmem:[#allocation7 + $0x58] sm:$0xff]  ;;  %v118_v47 = vld [vmem:[#allocation7 + $0x50] sm:$0xff] }
  0x4c   :  { %8559 = vmatpush3.msra.mxu0 %v10615_v3  ;;  %v10668_v29 = vsub.f32 %v123_v26, %v10665_v27  ;;  %v10670_v30 = vand.u32 4294901760, %v122_v28  ;;  %v10687_v36 = vand.u32 4294901760, %v121_v33  ;;  %v10696_v41 = vand.u32 4294901760, %v120_v37  ;;  %v117_v52 = vld [vmem:[#allocation7 + $0x48] sm:$0xff]  ;;  %v116_v58 = vld [vmem:[#allocation7 + $0x40] sm:$0xff]  ;;  %v115_v0 = vld [vmem:[#allocation7 + $0x38] sm:$0xff] }
  0x4d   :  { %13683 = vst [vmem:[#allocation21_spill] sm:$0xff] %v10623_v9  ;;  %13684 = vst [vmem:[#allocation22_spill] sm:$0xff] %v10626_v11  ;;  %v217_v12 = vsub.f32 %v144_v5, %v216_v7  ;;  %8569 = vmatprep.mubr.f32.mxu1 %v216_v7  ;;  %8560 = vmatprep.subr.mxu0 %v10617_v4  ;;  %v10631_v13 = vand.u32 4294901760, %v10623_v9  ;;  %v227_v14 = vsub.f32 %v147_v8, %v226_v10  ;;  %v114_v8 = vld [vmem:[#allocation7 + $0x30] sm:$0xff]  ;;  %v112_v26 = vld [vmem:[#allocation7 + $0x20] sm:$0xff]  ;;  %vm682_vm3 = vcmask 1045504  }
  0x4e   :  { %v10634_v15 = vand.u32 4294901760, %v10626_v11  ;;  %8561 = vmatpush3.msra.mxu0 %v10617_v4  ;;  %13689 = vst [vmem:[#allocation27_spill] sm:$0xff] %v10668_v29  ;;  %v10675_v31 = vand.u32 4294901760, %v10668_v29  ;;  %v10678_v32 = vsub.f32 %v122_v28, %v10670_v30  ;;  %v10694_v40 = vsub.f32 %v121_v33, %v10687_v36  ;;  %s10543_s4 = smov [#allocation13]  }
  0x4f   :  { %13685 = vst [vmem:[#allocation23_spill] sm:$0xff] %v10631_v13  ;;  %v218_v16 = vand.u32 4294901760, %v217_v12  ;;  %v268_v17 = vsub.f32 %v10623_v9, %v10631_v13  ;;  %v228_v18 = vand.u32 4294901760, %v227_v14  ;;  %8572 = vmatprep.subr.mxu0 %v10623_v9  ;;  %v10707_v45 = vsub.f32 %v120_v37, %v10696_v41  ;;  %s7607_s5 = sshll.u32 %s10543_s4, 4  ;;  %s7608_s5 = int_to_ptr.vmem [resolvable:$true] %s7607_s5 }
  0x50   :  { %13686 = vst [vmem:[#allocation24_spill] sm:$0xff] %v10634_v15  ;;  %v275_v19 = vsub.f32 %v10626_v11, %v10634_v15  ;;  %13690 = vst [vmem:[#allocation28_spill] sm:$0xff] %v10675_v31  ;;  %v849_v34 = vsub.f32 %v10668_v29, %v10675_v31  ;;  %v10685_v35 = vand.u32 4294901760, %v10678_v32  ;;  %v10704_v44 = vand.u32 4294901760, %v10694_v40  ;;  %s10505_s25 = scalar_lea.vmem %s7608_s5, 1024  ;;  %p10510_p3 = scmp.lt.s32.totalorder %s7608_s5, %s7608_s5 }
  0x51   :  { %v219_v20 = vsub.f32 %v217_v12, %v218_v16  ;;  %v10642_v21 = vand.u32 4294901760, %v268_v17  ;;  %v229_v22 = vsub.f32 %v227_v14, %v228_v18  ;;  %13691 = vst [vmem:[#allocation29_spill] sm:$0xff] %v10678_v32  ;;  %13694 = vst [vmem:[#allocation32_spill] sm:$0xff] %v10694_v40  ;;  %v10709_v46 = vand.u32 4294901760, %v119_v42  ;;  %p10506_p2 = scmp.ne.s32.totalorder %s7608_s5, %s10505_s25  ;;  %p10511_p4 = scmp.lt.s32.totalorder %s10505_s25, %s10505_s25 }
  0x52   :  { %v10644_v23 = vand.u32 4294901760, %v275_v19  ;;  %13692 = vst [vmem:[#allocation30_spill] sm:$0xff] %v10685_v35  ;;  %v10689_v38 = vand.u32 4294901760, %v849_v34  ;;  %v856_v39 = vsub.f32 %v10678_v32, %v10685_v35  ;;  %13696 = vst [vmem:[#allocation34_spill] sm:$0xff] %v10704_v44  ;;  %v863_v48 = vsub.f32 %v10694_v40, %v10704_v44 }
  0x53   :  { %13687 = vst [vmem:[#allocation25_spill] sm:$0xff] %v10642_v21  ;;  %v220_v24 = vand.u32 4294901760, %v219_v20  ;;  %8565 = vmatprep.subr.mxu1 %v10642_v21  ;;  %v230_v25 = vand.u32 4294901760, %v229_v22  ;;  %13697 = vst [vmem:[#allocation35_spill] sm:$0xff] %v10707_v45  ;;  %v10718_v49 = vand.u32 4294901760, %v10707_v45  ;;  %v10721_v50 = vsub.f32 %v119_v42, %v10709_v46  ;;  %v111_v42 = vld [vmem:[#allocation7 + $0x18] sm:$0xff]  ;;  %p10512_p5 = por %p10511_p4, %p10510_p3 }
  0x54   :  { %13688 = vst [vmem:[#allocation26_spill] sm:$0xff] %v10644_v23  ;;  %8566 = vmatpush3.msra.mxu1 %v10642_v21  ;;  %13693 = vst [vmem:[#allocation31_spill] sm:$0xff] %v10689_v38  ;;  %v10701_v43 = vand.u32 4294901760, %v856_v39  ;;  %v10725_v51 = vand.u32 4294901760, %v118_v47  ;;  %v10728_v53 = vand.u32 4294901760, %v863_v48  ;;  %v10735_v56 = vand.u32 4294901760, %v117_v52 }
  0x55   :  { %8562 = vmatprep.mubr.f32.mxu0 %v220_v24  ;;  %8567 = vmatprep.subr.mxu1 %v10644_v23  ;;  %13698 = vst [vmem:[#allocation36_spill] sm:$0xff] %v10709_v46  ;;  %13699 = vst [vmem:[#allocation37_spill] sm:$0xff] %v10718_v49  ;;  %v870_v54 = vsub.f32 %v10707_v45, %v10718_v49  ;;  %v10733_v55 = vand.u32 4294901760, %v10721_v50  ;;  %v10749_v62 = vand.u32 4294901760, %v116_v58  ;;  %v10766_v6 = vand.u32 4294901760, %v115_v0  ;;  %p10513_p6 = pnand %p10512_p5, %p10506_p2 }
  0x56   :  { %8563 = vmatmul.mubr.f32.vlgmr.msra.gmra.mxu0 %v230_v25  ;;  %8568 = vmatpush3.msra.mxu1 %v10644_v23  ;;  %13695 = vst [vmem:[#allocation33_spill] sm:$0xff] %v10701_v43  ;;  %13700 = vst [vmem:[#allocation38_spill] sm:$0xff] %v10721_v50  ;;  %v10738_v57 = vsub.f32 %v118_v47, %v10725_v51  ;;  %v10747_v61 = vsub.f32 %v117_v52, %v10735_v56  ;;  %v10786_v17 = vand.u32 4294901760, %v114_v8  ;;  %vm692_vm4 = vcmask 1044480  }
  0x57   :  { %8573 = vmatpush3.msra.mxu0 %v10623_v9  ;;  %8570 = vmatmul.mubr.f32.vlgmr.msra.gmra.mxu1 %v226_v10  ;;  %13701 = vst [vmem:[#allocation39_spill] sm:$0xff] %v10725_v51  ;;  %13702 = vst [vmem:[#allocation40_spill] sm:$0xff] %v10728_v53  ;;  %v10742_v59 = vand.u32 4294901760, %v870_v54  ;;  %v877_v60 = vsub.f32 %v10721_v50, %v10733_v55  ;;  %v10764_v5 = vsub.f32 %v116_v58, %v10749_v62  ;;  %vm706_vm5 = vcmask 1043456  }
  0x58   :  { %8574 = vmatprep.subr.mxu0 %v10626_v11  ;;  %8579 = vmatprep.subr.mxu1 %v10615_v3  ;;  %13703 = vst [vmem:[#allocation41_spill] sm:$0xff] %v10733_v55  ;;  %13704 = vst [vmem:[#allocation42_spill] sm:$0xff] %v10735_v56  ;;  %v10754_v63 = vand.u32 4294901760, %v10738_v57  ;;  %v10761_v2 = vand.u32 4294901760, %v10747_v61  ;;  %v10801_v25 = vsub.f32 %v114_v8, %v10786_v17  ;;  %v10817_v39 = vand.u32 4294901760, %v112_v26 }
  0x59   :  { %8575 = vmatpush3.msra.mxu0 %v10626_v11  ;;  %8576 = vmatprep.mubr.f32.mxu0 %v217_v12  ;;  %13705 = vst [vmem:[#allocation43_spill] sm:$0xff] %v10738_v57  ;;  %13706 = vst [vmem:[#allocation44_spill] sm:$0xff] %v10742_v59  ;;  %v10758_v1 = vand.u32 4294901760, %v877_v60  ;;  %v10777_v12 = vand.u32 4294901760, %v10764_v5  ;;  %v10823_v48 = vand.u32 4294901760, %v111_v42  ;;  %v110_v60 = vld [vmem:[#allocation7 + $0x10] sm:$0xff] }
  0x5a   :  { %8580 = vmatpush3.msra.mxu1 %v10615_v3  ;;  %8577 = vmatmul.mubr.f32.vlgmr.msra.gmra.mxu0 %v227_v14  ;;  %13707 = vst [vmem:[#allocation45_spill] sm:$0xff] %v10747_v61  ;;  %13708 = vst [vmem:[#allocation46_spill] sm:$0xff] %v10749_v62  ;;  %v10780_v14 = vsub.f32 %v115_v0, %v10766_v6  ;;  %v10812_v34 = vand.u32 4294901760, %v10801_v25  ;;  %v10833_v58 = vsub.f32 %v112_v26, %v10817_v39  ;;  %vm718_vm6 = vcmask 1040384  }
  0x5b   :  { %8581 = vmatprep.subr.mxu1 %v10617_v4  ;;  %8586 = vmatprep.subr.mxu0 %v10631_v13  ;;  %13709 = vst [vmem:[#allocation47_spill] sm:$0xff] %v10754_v63  ;;  %13710 = vst [vmem:[#allocation48_spill] sm:$0xff] %v10758_v1  ;;  %v898_v20 = vsub.f32 %v10764_v5, %v10777_v12  ;;  %v10838_v0 = vsub.f32 %v111_v42, %v10823_v48 }
  0x5c   :  { %8582 = vmatpush3.msra.mxu1 %v10617_v4  ;;  %8583 = vmatprep.mubr.f32.mxu1 %v218_v16  ;;  %13711 = vst [vmem:[#allocation49_spill] sm:$0xff] %v10761_v2  ;;  %13712 = vst [vmem:[#allocation50_spill] sm:$0xff] %v10764_v5  ;;  %v10794_v22 = vand.u32 4294901760, %v10780_v14  ;;  %v912_v52 = vsub.f32 %v10801_v25, %v10812_v34 }
  0x5d   :  { %8587 = vmatpush3.msra.mxu0 %v10631_v13  ;;  %8584 = vmatmul.mubr.f32.vlgmr.msra.gmra.mxu1 %v228_v18  ;;  %13713 = vst [vmem:[#allocation51_spill] sm:$0xff] %v10766_v6  ;;  %13714 = vst [vmem:[#allocation52_spill] sm:$0xff] %v10777_v12  ;;  %v113_v18 = vld [vmem:[#allocation7 + $0x28] sm:$0xff]  ;;  %v10805_v28 = vand.u32 4294901760, %v898_v20  ;;  %v10854_v26 = vand.u32 4294901760, %v10838_v0 }
  0x5e   :  { %8588 = vmatprep.subr.mxu0 %v10634_v15  ;;  %8593 = vmatprep.subr.mxu1 %v10615_v3  ;;  %13715 = vst [vmem:[#allocation53_spill] sm:$0xff] %v10780_v14  ;;  %13717 = vst [vmem:[#allocation55_spill] sm:$0xff] %v10786_v17  ;;  %v10796_v24 = vand.u32 4294901760, %v113_v18  ;;  %v905_v33 = vsub.f32 %v10780_v14, %v10794_v22  ;;  %v10844_v8 = vand.u32 4294901760, %v912_v52  ;;  %v109_v20 = vld [vmem:[#allocation7 + $0x8] sm:$0xff] }
  0x5f   :  { %8589 = vmatpush3.msra.mxu0 %v10634_v15  ;;  %8590 = vmatprep.mubr.f32.mxu0 %v216_v7  ;;  %13719 = vst [vmem:[#allocation57_spill] sm:$0xff] %v10794_v22  ;;  %13721 = vst [vmem:[#allocation59_spill] sm:$0xff] %v10801_v25  ;;  %v10859_v42 = vand.u32 4294901760, %v109_v20 }
  0x60   :  { %8594 = vmatpush3.msra.mxu1 %v10615_v3  ;;  %8591 = vmatmul.mubr.f32.vlgmr.msra.gmra.mxu0 %v226_v10  ;;  %13720 = vst [vmem:[#allocation58_spill] sm:$0xff] %v10796_v24  ;;  %13722 = vst [vmem:[#allocation60_spill] sm:$0xff] %v10805_v28  ;;  %v10815_v37 = vsub.f32 %v113_v18, %v10796_v24  ;;  %v10821_v47 = vand.u32 4294901760, %v905_v33  ;;  %v10849_v18 = vand.u32 4294901760, %v10833_v58 }
  0x61   :  { %8595 = vmatprep.subr.mxu1 %v10617_v4  ;;  %8597 = vmatprep.mubr.f32.mxu1 %v216_v7  ;;  %v884_v7 = vsub.f32 %v10738_v57, %v10754_v63  ;;  %13723 = vst [vmem:[#allocation61_spill] sm:$0xff] %v10812_v34  ;;  %13725 = vst [vmem:[#allocation63_spill] sm:$0xff] %v10817_v39 }
  0x62   :  { %8596 = vmatpush3.msra.mxu1 %v10617_v4  ;;  %8600 = vmatprep.subr.mxu0 %v10665_v27  ;;  %13724 = vst [vmem:[#allocation62_spill] sm:$0xff] %v10815_v37  ;;  %13726 = vst [vmem:[#allocation64_spill] sm:$0xff] %v10821_v47  ;;  %v10830_v54 = vand.u32 4294901760, %v10815_v37 }
  0x63   :  { %8598 = vmatmul.mubr.f32.vlgmr.msra.gmra.mxu1 %v226_v10  ;;  %8601 = vmatpush3.msra.mxu0 %v10665_v27  ;;  %v891_v10 = vsub.f32 %v10747_v61, %v10761_v2  ;;  %v10784_v16 = vand.u32 4294901760, %v884_v7  ;;  %13727 = vst [vmem:[#allocation65_spill] sm:$0xff] %v10823_v48  ;;  %13729 = vst [vmem:[#allocation67_spill] sm:$0xff] %v10833_v58  ;;  %v10840_v7 = vand.u32 4294901760, %v110_v60 }
  0x64   :  { %8602 = vmatprep.subr.mxu0 %v10670_v30  ;;  %8635 = vmatprep.subr.mxu1 %v10689_v38  ;;  %13728 = vst [vmem:[#allocation66_spill] sm:$0xff] %v10830_v54  ;;  %13730 = vst [vmem:[#allocation68_spill] sm:$0xff] %v10838_v0 }
  0x65   :  { %8603 = vmatpush3.msra.mxu0 %v10670_v30  ;;  %8636 = vmatpush3.msra.mxu1 %v10689_v38  ;;  %13716 = vst [vmem:[#allocation54_spill] sm:$0xff] %v10784_v16  ;;  %v10789_v19 = vand.u32 4294901760, %v891_v10  ;;  %13731 = vst [vmem:[#allocation69_spill] sm:$0xff] %v10840_v7  ;;  %v919_v10 = vsub.f32 %v10815_v37, %v10830_v54  ;;  %v10857_v33 = vsub.f32 %v110_v60, %v10840_v7 }
  0x66   :  { %8604 = vmatprep.subr.mxu0 %v10687_v36  ;;  %8637 = vmatprep.subr.mxu1 %v10701_v43  ;;  %13732 = vst [vmem:[#allocation70_spill] sm:$0xff] %v10844_v8  ;;  %13733 = vst [vmem:[#allocation71_spill] sm:$0xff] %v10849_v18  ;;  %v933_v60 = vsub.f32 %v10838_v0, %v10854_v26 }
  0x67   :  { %8605 = vmatpush3.msra.mxu0 %v10687_v36  ;;  %8638 = vmatpush3.msra.mxu1 %v10701_v43  ;;  %13718 = vst [vmem:[#allocation56_spill] sm:$0xff] %v10789_v19  ;;  %13734 = vst [vmem:[#allocation72_spill] sm:$0xff] %v10854_v26  ;;  %v10863_v52 = vand.u32 4294901760, %v919_v10 }
  0x68   :  { %8606 = vmatprep.subr.mxu0 %v10696_v41  ;;  %8639 = vmatprep.subr.mxu1 %v10728_v53  ;;  %13735 = vst [vmem:[#allocation73_spill] sm:$0xff] %v10857_v33  ;;  %13736 = vst [vmem:[#allocation74_spill] sm:$0xff] %v10859_v42 }
  0x69   :  { %8607 = vmatpush3.msra.mxu0 %v10696_v41  ;;  %8640 = vmatpush3.msra.mxu1 %v10728_v53  ;;  %13737 = vst [vmem:[#allocation75_spill] sm:$0xff] %v10863_v52 }
  0x6a   :  { %8608 = vmatprep.subr.mxu0 %v10709_v46  ;;  %8641 = vmatprep.subr.mxu1 %v10742_v59 }
  0x6b   :  { %8609 = vmatpush3.msra.mxu0 %v10709_v46  ;;  %8642 = vmatpush3.msra.mxu1 %v10742_v59 }
  0x6c   :  { %8610 = vmatprep.subr.mxu0 %v10725_v51  ;;  %8643 = vmatprep.subr.mxu1 %v10758_v1 }
  0x6d   :  { %8611 = vmatpush3.msra.mxu0 %v10725_v51  ;;  %8644 = vmatpush3.msra.mxu1 %v10758_v1 }
  0x6e   :  { %8612 = vmatprep.subr.mxu0 %v10735_v56  ;;  %8645 = vmatprep.subr.mxu1 %v10784_v16 }
  0x6f   :  { %8613 = vmatpush3.msra.mxu0 %v10735_v56  ;;  %8646 = vmatpush3.msra.mxu1 %v10784_v16  ;;  %v10875_v16 = vsub.f32 %v109_v20, %v10859_v42 }
  0x70   :  { %8614 = vmatprep.subr.mxu0 %v10749_v62  ;;  %8647 = vmatprep.subr.mxu1 %v10789_v19 }
  0x71   :  { %8615 = vmatpush3.msra.mxu0 %v10749_v62  ;;  %8648 = vmatpush3.msra.mxu1 %v10789_v19  ;;  %v108_v19 = vld [vmem:[#allocation7] sm:$0xff]  ;;  %13739 = vst [vmem:[#allocation77_spill] sm:$0xff] %v10875_v16  ;;  %v10890_v20 = vand.u32 4294901760, %v10875_v16 }
  0x72   :  { %8616 = vmatprep.subr.mxu0 %v10766_v6  ;;  %8649 = vmatprep.subr.mxu1 %v10805_v28  ;;  %v10877_v1 = vand.u32 4294901760, %v108_v19 }
  0x73   :  { %8617 = vmatpush3.msra.mxu0 %v10766_v6  ;;  %8650 = vmatpush3.msra.mxu1 %v10805_v28  ;;  %v926_v28 = vsub.f32 %v10833_v58, %v10849_v18  ;;  %13743 = vst [vmem:[#allocation81_spill] sm:$0xff] %v10890_v20 }
  0x74   :  { %8618 = vmatprep.subr.mxu0 %v10786_v17  ;;  %8651 = vmatprep.subr.mxu1 %v10821_v47  ;;  %13740 = vst [vmem:[#allocation78_spill] sm:$0xff] %v10877_v1  ;;  %v10893_v53 = vsub.f32 %v108_v19, %v10877_v1 }
  0x75   :  { %8619 = vmatpush3.msra.mxu0 %v10786_v17  ;;  %8652 = vmatpush3.msra.mxu1 %v10821_v47  ;;  %v10872_v47 = vand.u32 4294901760, %v10857_v33  ;;  %v10881_v10 = vand.u32 4294901760, %v926_v28 }
  0x76   :  { %8620 = vmatprep.subr.mxu0 %v10796_v24  ;;  %8653 = vmatprep.subr.mxu1 %v10844_v8  ;;  %13744 = vst [vmem:[#allocation82_spill] sm:$0xff] %v10893_v53 }
  0x77   :  { %8621 = vmatpush3.msra.mxu0 %v10796_v24  ;;  %8654 = vmatpush3.msra.mxu1 %v10844_v8  ;;  %13738 = vst [vmem:[#allocation76_spill] sm:$0xff] %v10872_v47  ;;  %13741 = vst [vmem:[#allocation79_spill] sm:$0xff] %v10881_v10  ;;  %v10885_v8 = vand.u32 4294901760, %v933_v60  ;;  %v940_v59 = vsub.f32 %v10857_v33, %v10872_v47  ;;  %v947_v60 = vsub.f32 %v10875_v16, %v10890_v20 }
  0x78   :  { %8622 = vmatprep.subr.mxu0 %v10817_v39  ;;  %8655 = vmatprep.subr.mxu1 %v10863_v52 }
  0x79   :  { %8623 = vmatpush3.msra.mxu0 %v10817_v39  ;;  %8656 = vmatpush3.msra.mxu1 %v10863_v52  ;;  %13742 = vst [vmem:[#allocation80_spill] sm:$0xff] %v10885_v8  ;;  %v10899_v28 = vand.u32 4294901760, %v940_v59  ;;  %v10904_v52 = vand.u32 4294901760, %v10893_v53  ;;  %v10910_v19 = vand.u32 4294901760, %v947_v60 }
  0x7a   :  { %8624 = vmatprep.subr.mxu0 %v10823_v48  ;;  %8657 = vmatprep.subr.mxu1 %v10881_v10 }
  0x7b   :  { %8625 = vmatpush3.msra.mxu0 %v10823_v48  ;;  %8658 = vmatpush3.msra.mxu1 %v10881_v10  ;;  %13745 = vst [vmem:[#allocation83_spill] sm:$0xff] %v10899_v28  ;;  %13746 = vst [vmem:[#allocation84_spill] sm:$0xff] %v10904_v52  ;;  %v954_v59 = vsub.f32 %v10893_v53, %v10904_v52 }
  0x7c   :  { %8626 = vmatprep.subr.mxu0 %v10840_v7  ;;  %8659 = vmatprep.subr.mxu1 %v10885_v8  ;;  %13747 = vst [vmem:[#allocation85_spill] sm:$0xff] %v10910_v19 }
  0x7d   :  { %8627 = vmatpush3.msra.mxu0 %v10840_v7  ;;  %8660 = vmatpush3.msra.mxu1 %v10885_v8  ;;  %v10916_v10 = vand.u32 4294901760, %v954_v59 }
  0x7e   :  { %8628 = vmatprep.subr.mxu0 %v10859_v42  ;;  %8661 = vmatprep.subr.mxu1 %v10899_v28 }
  0x7f   :  { %8629 = vmatpush3.msra.mxu0 %v10859_v42  ;;  %8662 = vmatpush3.msra.mxu1 %v10899_v28  ;;  %13748 = vst [vmem:[#allocation86_spill] sm:$0xff] %v10916_v10 }
  0x80   :  { %8630 = vmatprep.subr.mxu0 %v10877_v1  ;;  %8663 = vmatprep.subr.mxu1 %v10910_v19 }
  0x81   :  { %8631 = vmatpush3.msra.mxu0 %v10877_v1  ;;  %8664 = vmatpush3.msra.mxu1 %v10910_v19 }
  0x82   :  { %8670 = vmatprep.subr.mxu0 %v10668_v29  ;;  %8665 = vmatprep.subr.mxu1 %v10916_v10 }
  0x83   :  { %8666 = vmatpush3.msra.mxu1 %v10916_v10 }
  0x84   :  { %8705 = vmatprep.subr.mxu1 %v10665_v27 }
 0x116   :  { %v8564_v60 = vpop.f32.mrf.mxu0 }
 0x117   :  { %v8571_v43 = vpop.f32.mrf.mxu1 }
 0x118   :  { %v222_v8 = vpop.f32.mrf.mxu0  ;;  %v320_v38 = vadd.f32 %v8571_v43, %v8564_v60 }
 0x119   :  { %v313_v15 = vpop.f32.mrf.mxu1 }
 0x11a   :  { %v314_v13 = vadd.f32 %v313_v15, %v222_v8  ;;  %v8578_v11 = vpop.f32.mrf.mxu0 }
 0x11b   :  { %v403_v28 = vadd.f32 %v8578_v11, %v320_v38 }
 0x11c   :  { %v395_v59 = vpop.f32.mrf.mxu0 }
 0x11d   :  { %v396_v9 = vadd.f32 %v395_v59, %v314_v13  ;;  %v8585_v4 = vpop.f32.mrf.mxu1 }
 0x11e   :  { %v486_v3 = vadd.f32 %v8585_v4, %v403_v28 }
 0x11f   :  { %v477_v23 = vpop.f32.mrf.mxu1 }
 0x120   :  { %v478_v19 = vadd.f32 %v477_v23, %v396_v9  ;;  %v8592_v21 = vpop.f32.mrf.mxu0 }
 0x121   :  { %v569_v52 = vadd.f32 %v8592_v21, %v486_v3 }
 0x122   :  { %v562_v20 = vpop.f32.mrf.mxu0 }
 0x123   :  { %v8599_v10 = vpop.f32.mrf.mxu1  ;;  %v563_v47 = vadd.f32 %v562_v20, %v478_v19 }
 0x124   :  { %v648_v26 = vadd.f32 %v8599_v10, %v569_v52 }
 0x125   :  { %v641_v18 = vpop.f32.mrf.mxu1 }
 0x126   :  { %v655_v54 = vrot.slane %v648_v26, 6  ;;  %v642_v43 = vadd.f32 %v641_v18, %v563_v47 }
 0x128   :  { %v661_v15 = vsel %vm653_vm1, %v655_v54, 0.0  ;;  %v654_v8 = vrot.slane %v642_v43, 6 }
 0x129   :  { %v666_v11 = vmul.f32 0.60653067, %v661_v15  ;;  %v686_v26 = vrot.slane %v661_v15, 2  ;;  %v702_v47 = vmul.f32 0.13533528, %v661_v15 }
 0x12a   :  { %v656_v13 = vsel %vm653_vm1, %v654_v8, %v655_v54  ;;  %v660_v4 = vsel %vm653_vm1, 0.0, %v654_v8 }
 0x12b   :  { %v664_v38 = vmul.f32 0.60653067, %v660_v4  ;;  %v665_v9 = vmul.f32 0.60653067, %v656_v13  ;;  %v674_v23 = vrot.slane %v666_v11, 1  ;;  %v683_v10 = vrot.slane %v660_v4, 2 }
 0x12c   :  { %v662_v3 = vmul.f32 0.13533528, %v660_v4  ;;  %v663_v21 = vmul.f32 0.13533528, %v656_v13  ;;  %v684_v28 = vrot.slane %v656_v13, 2  ;;  %v696_v59 = vrot.slane %v666_v11, 3 }
 0x12d   :  { %v671_v20 = vrot.slane %v664_v38, 1  ;;  %v672_v52 = vrot.slane %v665_v9, 1  ;;  %v693_v54 = vrot.slane %v664_v38, 3  ;;  %v694_v60 = vrot.slane %v665_v9, 3 }
 0x12e   :  { %v685_v34 = vsel %vm682_vm3, %v683_v10, %v684_v28  ;;  %v687_v22 = vsel %vm682_vm3, %v684_v28, %v686_v26  ;;  %v707_v12 = vrot.slane %v662_v3, 4  ;;  %v708_v4 = vrot.slane %v663_v21, 4 }
 0x12f   :  { %v673_v18 = vsel %vm670_vm2, %v671_v20, %v672_v52  ;;  %v675_v19 = vsel %vm670_vm2, %v672_v52, %v674_v23  ;;  %v710_v15 = vrot.slane %v702_v47, 4  ;;  %v695_v20 = vsel %vm692_vm4, %v693_v54, %v694_v60 }
 0x130   :  { %v678_v43 = vadd.f32 %v673_v18, %v662_v3  ;;  %v679_v8 = vadd.f32 %v675_v19, %v663_v21  ;;  %v697_v23 = vsel %vm692_vm4, %v694_v60, %v696_v59  ;;  %v709_v11 = vsel %vm706_vm5, %v707_v12, %v708_v4 }
 0x131   :  { %v711_v52 = vsel %vm706_vm5, %v708_v4, %v710_v15 }
 0x132   :  { %v690_v13 = vadd.f32 %v685_v34, %v678_v43  ;;  %v691_v2 = vadd.f32 %v687_v22, %v679_v8 }
 0x134   :  { %v700_v38 = vadd.f32 %v695_v20, %v690_v13  ;;  %v701_v9 = vadd.f32 %v697_v23, %v691_v2 }
 0x136   :  { %v714_v18 = vadd.f32 %v709_v11, %v700_v38  ;;  %v715_v10 = vadd.f32 %v711_v52, %v701_v9 }
 0x138   :  { %v719_v28 = vrot.slane %v714_v18, 7  ;;  %v720_v3 = vrot.slane %v715_v10, 7  ;;  %v727_v21 = vmul.f32 2.0, %v714_v18  ;;  %v728_v34 = vmul.f32 2.0, %v715_v10 }
 0x13a   :  { %v721_v22 = vsel %vm718_vm6, %v719_v28, %v720_v3  ;;  %v725_v26 = vsel %vm718_vm6, 0.0, %v719_v28  ;;  %v726_v47 = vsel %vm718_vm6, %v720_v3, 0.0 }
 0x13b   :  { %v729_v19 = vadd.f32 %v727_v21, %v725_v26  ;;  %v733_v54 = vrot.slane %v725_v26, 2  ;;  %v734_v2 = vrot.slane %v721_v22, 2  ;;  %v730_v60 = vadd.f32 %v728_v34, %v721_v22  ;;  %v139_v21 = vld [vmem:[#allocation8 + $0x78] sm:$0xff] }
 0x13c   :  { %v736_v12 = vrot.slane %v726_v47, 2  ;;  %v11039_v34 = vand.u32 4294901760, %v139_v21 }
 0x13d   :  { %v735_v59 = vsel %vm682_vm3, %v733_v54, %v734_v2  ;;  %v136_v54 = vld [vmem:[#allocation8 + $0x60] sm:$0xff] }
 0x13e   :  { %v740_v43 = vadd.f32 %v735_v59, %v729_v19  ;;  %v737_v8 = vsel %vm682_vm3, %v734_v2, %v736_v12  ;;  %v10939_v4 = vsub.f32 %v725_v26, %v735_v59  ;;  %13749 = vst [vmem:[#allocation87_spill] sm:$0xff] %v11039_v34  ;;  %v137_v26 = vld [vmem:[#allocation8 + $0x68] sm:$0xff]  ;;  %v11052_v19 = vsub.f32 %v139_v21, %v11039_v34  ;;  %v13753_v12 = vld [vmem:[#allocation49_spill] sm:$0xff] }
 0x13f   :  { %v741_v13 = vadd.f32 %v737_v8, %v730_v60  ;;  %v10941_v15 = vsub.f32 %v721_v22, %v737_v8  ;;  %v138_v22 = vld [vmem:[#allocation8 + $0x70] sm:$0xff]  ;;  %v11056_v2 = vand.u32 4294901760, %v137_v26  ;;  %v135_v60 = vld [vmem:[#allocation8 + $0x58] sm:$0xff] }
 0x140   :  { %v10943_v20 = vand.u32 4294901760, %v740_v43  ;;  %v11047_v47 = vand.u32 4294901760, %v138_v22  ;;  %13751 = vst [vmem:[#allocation89_spill] sm:$0xff] %v11052_v19  ;;  %v11070_v8 = vand.u32 4294901760, %v11052_v19  ;;  %v11096_v21 = vand.u32 4294901760, %v10939_v4 }
 0x141   :  { %v10945_v23 = vand.u32 4294901760, %v741_v13  ;;  %13752 = vst [vmem:[#allocation90_spill] sm:$0xff] %v11056_v2 }
 0x142   :  { %8667 = vmatprep.mubr.f32.mxu1 %v10943_v20  ;;  %v826_v38 = vsub.f32 %v740_v43, %v10943_v20  ;;  %13750 = vst [vmem:[#allocation88_spill] sm:$0xff] %v11047_v47  ;;  %v11063_v59 = vsub.f32 %v138_v22, %v11047_v47  ;;  %v11065_v43 = vand.u32 4294901760, %v136_v54  ;;  %13756 = vst [vmem:[#allocation93_spill] sm:$0xff] %v11070_v8  ;;  %v132_v22 = vld [vmem:[#allocation8 + $0x40] sm:$0xff] }
 0x143   :  { %v10950_v9 = vsub.f32 %v741_v13, %v10945_v23  ;;  %8668 = vmatmul.mubr.f32.vlgmr.msra.gmra.mxu1 %v10945_v23  ;;  %v134_v13 = vld [vmem:[#allocation8 + $0x50] sm:$0xff] }
 0x144   :  { %8706 = vmatpush3.msra.mxu1 %v10665_v27  ;;  %v827_v11 = vand.u32 4294901760, %v826_v38  ;;  %13754 = vst [vmem:[#allocation91_spill] sm:$0xff] %v11063_v59  ;;  %13755 = vst [vmem:[#allocation92_spill] sm:$0xff] %v11065_v43 }
 0x145   :  { %8707 = vmatprep.subr.mxu1 %v10670_v30  ;;  %v837_v52 = vand.u32 4294901760, %v10950_v9 }
 0x146   :  { %8708 = vmatpush3.msra.mxu1 %v10670_v30  ;;  %8737 = vmatprep.mubr.f32.mxu1 %v827_v11  ;;  %v828_v18 = vsub.f32 %v826_v38, %v827_v11  ;;  %v133_v11 = vld [vmem:[#allocation8 + $0x48] sm:$0xff] }
 0x147   :  { %8709 = vmatprep.subr.mxu1 %v10687_v36  ;;  %v838_v10 = vsub.f32 %v10950_v9, %v837_v52 }
 0x148   :  { %8710 = vmatpush3.msra.mxu1 %v10687_v36  ;;  %v829_v28 = vand.u32 4294901760, %v828_v18  ;;  %v11084_v18 = vand.u32 4294901760, %v11063_v59 }
 0x149   :  { %8711 = vmatprep.subr.mxu1 %v10696_v41  ;;  %v839_v3 = vand.u32 4294901760, %v838_v10  ;;  %v11087_v10 = vsub.f32 %v136_v54, %v11065_v43 }
 0x14a   :  { %8712 = vmatpush3.msra.mxu1 %v10696_v41  ;;  %8632 = vmatprep.mubr.f32.mxu0 %v829_v28  ;;  %13761 = vst [vmem:[#allocation96_spill] sm:$0xff] %v11084_v18  ;;  %v11089_v28 = vand.u32 4294901760, %v134_v13 }
 0x14b   :  { %8713 = vmatprep.subr.mxu1 %v10709_v46  ;;  %8633 = vmatmul.mubr.f32.vlgmr.msra.gmra.mxu0 %v839_v3  ;;  %13762 = vst [vmem:[#allocation97_spill] sm:$0xff] %v11087_v10  ;;  %v1533_v3 = vsub.f32 %v11052_v19, %v11070_v8 }
 0x14c   :  { %8671 = vmatpush3.msra.mxu0 %v10668_v29  ;;  %8714 = vmatpush3.msra.mxu1 %v10709_v46  ;;  %13763 = vst [vmem:[#allocation98_spill] sm:$0xff] %v11089_v28  ;;  %v126_v29 = vld [vmem:[#allocation8 + $0x10] sm:$0xff] }
 0x14d   :  { %8672 = vmatprep.subr.mxu0 %v10678_v32  ;;  %8702 = vmatprep.mubr.f32.mxu0 %v826_v38  ;;  %v11075_v38 = vsub.f32 %v137_v26, %v11056_v2  ;;  %v13764_v26 = vld [vmem:[#allocation61_spill] sm:$0xff] }
 0x14e   :  { %8715 = vmatprep.subr.mxu1 %v10725_v51  ;;  %8673 = vmatpush3.msra.mxu0 %v10678_v32 }
 0x14f   :  { %8716 = vmatpush3.msra.mxu1 %v10725_v51  ;;  %8674 = vmatprep.subr.mxu0 %v10694_v40  ;;  %13758 = vst [vmem:[#allocation94_spill] sm:$0xff] %v11075_v38  ;;  %v11101_v54 = vand.u32 4294901760, %v11075_v38 }
 0x150   :  { %8717 = vmatprep.subr.mxu1 %v10735_v56  ;;  %8675 = vmatpush3.msra.mxu0 %v10694_v40 }
 0x151   :  { %8718 = vmatpush3.msra.mxu1 %v10735_v56  ;;  %8676 = vmatprep.subr.mxu0 %v10707_v45  ;;  %13765 = vst [vmem:[#allocation99_spill] sm:$0xff] %v11101_v54 }
 0x152   :  { %8719 = vmatprep.subr.mxu1 %v10749_v62  ;;  %8677 = vmatpush3.msra.mxu0 %v10707_v45  ;;  %v13789_v45 = vld [vmem:[#allocation81_spill] sm:$0xff] }
 0x153   :  { %8720 = vmatpush3.msra.mxu1 %v10749_v62  ;;  %8678 = vmatprep.subr.mxu0 %v10721_v50 }
 0x154   :  { %8721 = vmatprep.subr.mxu1 %v10766_v6  ;;  %8679 = vmatpush3.msra.mxu0 %v10721_v50  ;;  %v127_v50 = vld [vmem:[#allocation8 + $0x18] sm:$0xff] }
 0x155   :  { %8722 = vmatpush3.msra.mxu1 %v10766_v6  ;;  %8680 = vmatprep.subr.mxu0 %v10738_v57 }
 0x156   :  { %8723 = vmatprep.subr.mxu1 %v10786_v17  ;;  %8681 = vmatpush3.msra.mxu0 %v10738_v57 }
 0x157   :  { %8724 = vmatpush3.msra.mxu1 %v10786_v17  ;;  %8682 = vmatprep.subr.mxu0 %v10747_v61 }
 0x158   :  { %8725 = vmatprep.subr.mxu1 %v10796_v24  ;;  %8683 = vmatpush3.msra.mxu0 %v10747_v61  ;;  %v13784_v61 = vld [vmem:[#allocation76_spill] sm:$0xff] }
 0x159   :  { %8726 = vmatpush3.msra.mxu1 %v10796_v24  ;;  %8684 = vmatprep.subr.mxu0 %v10764_v5 }
 0x15a   :  { %8727 = vmatprep.subr.mxu1 %v10817_v39  ;;  %8685 = vmatpush3.msra.mxu0 %v10764_v5  ;;  %v128_v5 = vld [vmem:[#allocation8 + $0x20] sm:$0xff] }
 0x15b   :  { %8728 = vmatpush3.msra.mxu1 %v10817_v39  ;;  %8686 = vmatprep.subr.mxu0 %v10780_v14 }
 0x15c   :  { %8729 = vmatprep.subr.mxu1 %v10823_v48  ;;  %8687 = vmatpush3.msra.mxu0 %v10780_v14 }
 0x15d   :  { %8730 = vmatpush3.msra.mxu1 %v10823_v48  ;;  %8688 = vmatprep.subr.mxu0 %v10801_v25 }
 0x15e   :  { %8731 = vmatprep.subr.mxu1 %v10840_v7  ;;  %8689 = vmatpush3.msra.mxu0 %v10801_v25 }
 0x15f   :  { %8732 = vmatpush3.msra.mxu1 %v10840_v7  ;;  %8690 = vmatprep.subr.mxu0 %v10815_v37 }
 0x160   :  { %8733 = vmatprep.subr.mxu1 %v10859_v42  ;;  %8691 = vmatpush3.msra.mxu0 %v10815_v37  ;;  %v129_v37 = vld [vmem:[#allocation8 + $0x28] sm:$0xff] }
 0x161   :  { %8734 = vmatpush3.msra.mxu1 %v10859_v42  ;;  %8692 = vmatprep.subr.mxu0 %v10833_v58  ;;  %v11175_v57 = vand.u32 4294901760, %v129_v37 }
 0x162   :  { %8735 = vmatprep.subr.mxu1 %v10877_v1  ;;  %8693 = vmatpush3.msra.mxu0 %v10833_v58 }
 0x163   :  { %8736 = vmatpush3.msra.mxu1 %v10877_v1  ;;  %8694 = vmatprep.subr.mxu0 %v10838_v0  ;;  %13786 = vst [vmem:[#allocation116_spill] sm:$0xff] %v11175_v57 }
 0x164   :  { %8738 = vmatmul.mubr.f32.vlgmr.msra.gmra.mxu1 %v837_v52  ;;  %8775 = vmatprep.subr.mxu1 %v10665_v27  ;;  %v13760_v52 = vld [vmem:[#allocation57_spill] sm:$0xff] }
 0x165   :  { %8695 = vmatpush3.msra.mxu0 %v10838_v0  ;;  %8776 = vmatpush3.msra.mxu1 %v10665_v27 }
 0x166   :  { %8807 = vmatprep.mubr.f32.mxu1 %v10943_v20  ;;  %8696 = vmatprep.subr.mxu0 %v10857_v33 }
 0x167   :  { %8777 = vmatprep.subr.mxu1 %v10670_v30  ;;  %8697 = vmatpush3.msra.mxu0 %v10857_v33 }
 0x168   :  { %8778 = vmatpush3.msra.mxu1 %v10670_v30  ;;  %8698 = vmatprep.subr.mxu0 %v10875_v16 }
 0x169   :  { %8779 = vmatprep.subr.mxu1 %v10687_v36  ;;  %8699 = vmatpush3.msra.mxu0 %v10875_v16 }
 0x16a   :  { %8780 = vmatpush3.msra.mxu1 %v10687_v36  ;;  %8700 = vmatprep.subr.mxu0 %v10893_v53 }
 0x16b   :  { %8781 = vmatprep.subr.mxu1 %v10696_v41  ;;  %8701 = vmatpush3.msra.mxu0 %v10893_v53 }
 0x16c   :  { %8782 = vmatpush3.msra.mxu1 %v10696_v41  ;;  %8703 = vmatmul.mubr.f32.vlgmr.msra.gmra.mxu0 %v10950_v9  ;;  %v11077_v9 = vand.u32 4294901760, %v135_v60 }
 0x16d   :  { %8740 = vmatprep.subr.mxu0 %v10675_v31  ;;  %8783 = vmatprep.subr.mxu1 %v10709_v46 }
 0x16e   :  { %8741 = vmatpush3.msra.mxu0 %v10675_v31  ;;  %8772 = vmatprep.mubr.f32.mxu0 %v10943_v20  ;;  %v13757_v20 = vld [vmem:[#allocation52_spill] sm:$0xff]  ;;  %13759 = vst [vmem:[#allocation95_spill] sm:$0xff] %v11077_v9  ;;  %v13773_v31 = vld [vmem:[#allocation71_spill] sm:$0xff] }
 0x16f   :  { %8784 = vmatpush3.msra.mxu1 %v10709_v46  ;;  %8742 = vmatprep.subr.mxu0 %v10685_v35  ;;  %v11326_v46 = vand.u32 4294901760, %v10941_v15 }
 0x170   :  { %8785 = vmatprep.subr.mxu1 %v10725_v51  ;;  %8743 = vmatpush3.msra.mxu0 %v10685_v35  ;;  %v11128_v35 = vsub.f32 %v10939_v4, %v11096_v21 }
 0x171   :  { %8786 = vmatpush3.msra.mxu1 %v10725_v51  ;;  %8744 = vmatprep.subr.mxu0 %v10704_v44 }
 0x172   :  { %8787 = vmatprep.subr.mxu1 %v10735_v56  ;;  %8745 = vmatpush3.msra.mxu0 %v10704_v44  ;;  %v131_v44 = vld [vmem:[#allocation8 + $0x38] sm:$0xff] }
 0x173   :  { %8788 = vmatpush3.msra.mxu1 %v10735_v56  ;;  %8746 = vmatprep.subr.mxu0 %v10718_v49  ;;  %v11142_v4 = vand.u32 4294901760, %v131_v44 }
 0x174   :  { %8789 = vmatprep.subr.mxu1 %v10749_v62  ;;  %8747 = vmatpush3.msra.mxu0 %v10718_v49  ;;  %v11118_v49 = vsub.f32 %v134_v13, %v11089_v28  ;;  %v1547_v13 = vsub.f32 %v11075_v38, %v11101_v54 }
 0x175   :  { %8790 = vmatpush3.msra.mxu1 %v10749_v62  ;;  %8748 = vmatprep.subr.mxu0 %v10733_v55  ;;  %13776 = vst [vmem:[#allocation108_spill] sm:$0xff] %v11142_v4 }
 0x176   :  { %8791 = vmatprep.subr.mxu1 %v10766_v6  ;;  %8749 = vmatpush3.msra.mxu0 %v10733_v55  ;;  %v11115_v55 = vand.u32 4294901760, %v11087_v10  ;;  %13770 = vst [vmem:[#allocation103_spill] sm:$0xff] %v11118_v49  ;;  %v11151_v58 = vand.u32 4294901760, %v11118_v49 }
 0x177   :  { %8792 = vmatpush3.msra.mxu1 %v10766_v6  ;;  %8750 = vmatprep.subr.mxu0 %v10754_v63 }
 0x178   :  { %8793 = vmatprep.subr.mxu1 %v10786_v17  ;;  %8751 = vmatpush3.msra.mxu0 %v10754_v63  ;;  %v1540_v63 = vsub.f32 %v11063_v59, %v11084_v18  ;;  %13769 = vst [vmem:[#allocation102_spill] sm:$0xff] %v11115_v55  ;;  %v1554_v0 = vsub.f32 %v11087_v10, %v11115_v55  ;;  %13779 = vst [vmem:[#allocation110_spill] sm:$0xff] %v11151_v58 }
 0x179   :  { %8794 = vmatpush3.msra.mxu1 %v10786_v17  ;;  %8752 = vmatprep.subr.mxu0 %v13753_v12 }
 0x17a   :  { %8795 = vmatprep.subr.mxu1 %v10796_v24  ;;  %8753 = vmatpush3.msra.mxu0 %v13753_v12  ;;  %v11106_v12 = vand.u32 4294901760, %v133_v11  ;;  %v11146_v33 = vand.u32 4294901760, %v1540_v63  ;;  %v11163_v63 = vand.u32 4294901760, %v1547_v13  ;;  %v11179_v13 = vand.u32 4294901760, %v1554_v0 }
 0x17b   :  { %8796 = vmatpush3.msra.mxu1 %v10796_v24  ;;  %8754 = vmatprep.subr.mxu0 %v13757_v20  ;;  %v11194_v0 = vand.u32 4294901760, %v128_v5 }
 0x17c   :  { %8797 = vmatprep.subr.mxu1 %v10817_v39  ;;  %8755 = vmatpush3.msra.mxu0 %v13757_v20  ;;  %v11104_v20 = vsub.f32 %v135_v60, %v11077_v9  ;;  %13767 = vst [vmem:[#allocation101_spill] sm:$0xff] %v11106_v12  ;;  %v11120_v60 = vand.u32 4294901760, %v132_v22  ;;  %v11138_v16 = vsub.f32 %v133_v11, %v11106_v12  ;;  %13778 = vst [vmem:[#allocation109_spill] sm:$0xff] %v11146_v33 }
 0x17d   :  { %8798 = vmatpush3.msra.mxu1 %v10817_v39  ;;  %8756 = vmatprep.subr.mxu0 %v13760_v52  ;;  %13782 = vst [vmem:[#allocation113_spill] sm:$0xff] %v11163_v63  ;;  %13787 = vst [vmem:[#allocation117_spill] sm:$0xff] %v11179_v13  ;;  %v11226_v39 = vand.u32 4294901760, %v126_v29 }
 0x17e   :  { %8799 = vmatprep.subr.mxu1 %v10823_v48  ;;  %8757 = vmatpush3.msra.mxu0 %v13760_v52  ;;  %13766 = vst [vmem:[#allocation100_spill] sm:$0xff] %v11104_v20  ;;  %v13768_v52 = vld [vmem:[#allocation66_spill] sm:$0xff]  ;;  %13771 = vst [vmem:[#allocation104_spill] sm:$0xff] %v11120_v60  ;;  %v11135_v53 = vand.u32 4294901760, %v11104_v20  ;;  %v11154_v11 = vsub.f32 %v132_v22, %v11120_v60  ;;  %v11168_v22 = vand.u32 4294901760, %v11138_v16 }
 0x17f   :  { %8800 = vmatpush3.msra.mxu1 %v10823_v48  ;;  %8758 = vmatprep.subr.mxu0 %v13764_v26  ;;  %13775 = vst [vmem:[#allocation107_spill] sm:$0xff] %v11138_v16  ;;  %13792 = vst [vmem:[#allocation120_spill] sm:$0xff] %v11194_v0  ;;  %v11224_v48 = vsub.f32 %v128_v5, %v11194_v0 }
 0x180   :  { %8801 = vmatprep.subr.mxu1 %v10840_v7  ;;  %8759 = vmatpush3.msra.mxu0 %v13764_v26  ;;  %v11124_v26 = vand.u32 4294901760, %v1533_v3  ;;  %13774 = vst [vmem:[#allocation106_spill] sm:$0xff] %v11135_v53  ;;  %v13777_v3 = vld [vmem:[#allocation72_spill] sm:$0xff]  ;;  %13780 = vst [vmem:[#allocation111_spill] sm:$0xff] %v11154_v11  ;;  %v1561_v14 = vsub.f32 %v11104_v20, %v11135_v53 }
 0x181   :  { %8802 = vmatpush3.msra.mxu1 %v10840_v7  ;;  %8760 = vmatprep.subr.mxu0 %v13768_v52  ;;  %13783 = vst [vmem:[#allocation114_spill] sm:$0xff] %v11168_v22  ;;  %13800 = vst [vmem:[#allocation127_spill] sm:$0xff] %v11224_v48  ;;  %v11252_v24 = vand.u32 4294901760, %v11224_v48 }
 0x182   :  { %8803 = vmatprep.subr.mxu1 %v10859_v42  ;;  %8761 = vmatpush3.msra.mxu0 %v13768_v52  ;;  %13772 = vst [vmem:[#allocation105_spill] sm:$0xff] %v11124_v26  ;;  %v130_v52 = vld [vmem:[#allocation8 + $0x30] sm:$0xff]  ;;  %13801 = vst [vmem:[#allocation128_spill] sm:$0xff] %v11226_v39 }
 0x183   :  { %8804 = vmatpush3.msra.mxu1 %v10859_v42  ;;  %8762 = vmatprep.subr.mxu0 %v13773_v31  ;;  %v11159_v25 = vand.u32 4294901760, %v130_v52  ;;  %v11210_v42 = vand.u32 4294901760, %v127_v50  ;;  %13807 = vst [vmem:[#allocation134_spill] sm:$0xff] %v11252_v24 }
 0x184   :  { %8805 = vmatprep.subr.mxu1 %v10877_v1  ;;  %8763 = vmatpush3.msra.mxu0 %v13773_v31  ;;  %v11173_v31 = vsub.f32 %v131_v44, %v11142_v4  ;;  %v13790_v44 = vand.u32 4294901760, %v11128_v35 }
 0x185   :  { %8806 = vmatpush3.msra.mxu1 %v10877_v1  ;;  %8764 = vmatprep.subr.mxu0 %v13777_v3  ;;  %13781 = vst [vmem:[#allocation112_spill] sm:$0xff] %v11159_v25  ;;  %v11192_v32 = vsub.f32 %v130_v52, %v11159_v25  ;;  %v13794_v1 = vld [vmem:[#allocation84_spill] sm:$0xff]  ;;  %v11208_v52 = vsub.f32 %v129_v37, %v11175_v57  ;;  %13797 = vst [vmem:[#allocation124_spill] sm:$0xff] %v11210_v42 }
 0x186   :  { %8808 = vmatmul.mubr.f32.vlgmr.msra.gmra.mxu1 %v10945_v23  ;;  %8845 = vmatprep.subr.mxu1 %v11124_v26  ;;  %13785 = vst [vmem:[#allocation115_spill] sm:$0xff] %v11173_v31  ;;  %v1512_v40 = vsub.f32 %v11128_v35, %v13790_v44  ;;  %v11205_v44 = vand.u32 4294901760, %v11173_v31  ;;  %v11239_v5 = vsub.f32 %v127_v50, %v11210_v42 }
 0x187   :  { %8765 = vmatpush3.msra.mxu0 %v13777_v3  ;;  %8846 = vmatpush3.msra.mxu1 %v11124_v26  ;;  %v1568_v26 = vsub.f32 %v11118_v49, %v11151_v58  ;;  %v11184_v3 = vand.u32 4294901760, %v11154_v11  ;;  %13791 = vst [vmem:[#allocation119_spill] sm:$0xff] %v11192_v32  ;;  %13796 = vst [vmem:[#allocation123_spill] sm:$0xff] %v11208_v52  ;;  %v11221_v37 = vand.u32 4294901760, %v11192_v32 }
 0x188   :  { %8877 = vmatprep.mubr.f32.mxu1 %v11096_v21  ;;  %8766 = vmatprep.subr.mxu0 %v13784_v61  ;;  %13795 = vst [vmem:[#allocation122_spill] sm:$0xff] %v11205_v44  ;;  %v1513_v7 = vand.u32 4294901760, %v1512_v40  ;;  %v1589_v40 = vsub.f32 %v11173_v31, %v11205_v44  ;;  %13804 = vst [vmem:[#allocation131_spill] sm:$0xff] %v11239_v5  ;;  %v11255_v50 = vsub.f32 %v126_v29, %v11226_v39 }
 0x189   :  { %8847 = vmatprep.subr.mxu1 %v11146_v33  ;;  %8767 = vmatpush3.msra.mxu0 %v13784_v61  ;;  %13788 = vst [vmem:[#allocation118_spill] sm:$0xff] %v11184_v3  ;;  %v11198_v61 = vand.u32 4294901760, %v1561_v14  ;;  %v11214_v14 = vand.u32 4294901760, %v1568_v26  ;;  %13799 = vst [vmem:[#allocation126_spill] sm:$0xff] %v11221_v37  ;;  %v11268_v6 = vand.u32 4294901760, %v11239_v5 }
 0x18a   :  { %8848 = vmatpush3.msra.mxu1 %v11146_v33  ;;  %8768 = vmatprep.subr.mxu0 %v13789_v45  ;;  %v1575_v33 = vsub.f32 %v11138_v16, %v11168_v22  ;;  %13808 = vst [vmem:[#allocation135_spill] sm:$0xff] %v11255_v50  ;;  %v11282_v62 = vand.u32 4294901760, %v11255_v50 }
 0x18b   :  { %8849 = vmatprep.subr.mxu1 %v11163_v63  ;;  %8769 = vmatpush3.msra.mxu0 %v13789_v45  ;;  %13793 = vst [vmem:[#allocation121_spill] sm:$0xff] %v11198_v61  ;;  %13798 = vst [vmem:[#allocation125_spill] sm:$0xff] %v11214_v14  ;;  %v1582_v45 = vsub.f32 %v11154_v11, %v11184_v3 }
 0x18c   :  { %8850 = vmatpush3.msra.mxu1 %v11163_v63  ;;  %8770 = vmatprep.subr.mxu0 %v13794_v1  ;;  %v125_v63 = vld [vmem:[#allocation8 + $0x8] sm:$0xff]  ;;  %v11230_v26 = vand.u32 4294901760, %v1575_v33  ;;  %13811 = vst [vmem:[#allocation138_spill] sm:$0xff] %v11268_v6  ;;  %13814 = vst [vmem:[#allocation141_spill] sm:$0xff] %v11282_v62 }
 0x18d   :  { %8851 = vmatprep.subr.mxu1 %v11179_v13  ;;  %8771 = vmatpush3.msra.mxu0 %v13794_v1  ;;  %v124_v1 = vld [vmem:[#allocation8] sm:$0xff]  ;;  %v11245_v33 = vand.u32 4294901760, %v1582_v45  ;;  %v11263_v45 = vand.u32 4294901760, %v1589_v40  ;;  %v1610_v40 = vsub.f32 %v11224_v48, %v11252_v24 }
 0x18e   :  { %8852 = vmatpush3.msra.mxu1 %v11179_v13  ;;  %8773 = vmatmul.mubr.f32.vlgmr.msra.gmra.mxu0 %v10945_v23  ;;  %13802 = vst [vmem:[#allocation129_spill] sm:$0xff] %v11230_v26  ;;  %v11236_v23 = vand.u32 4294901760, %v11208_v52  ;;  %v11241_v13 = vand.u32 4294901760, %v125_v63  ;;  %v11257_v17 = vand.u32 4294901760, %v124_v1 }
 0x18f   :  { %8810 = vmatprep.subr.mxu0 %v11039_v34  ;;  %8853 = vmatprep.subr.mxu1 %v11198_v61  ;;  %13806 = vst [vmem:[#allocation133_spill] sm:$0xff] %v11245_v33  ;;  %13810 = vst [vmem:[#allocation137_spill] sm:$0xff] %v11263_v45 }
 0x190   :  { %8811 = vmatpush3.msra.mxu0 %v11039_v34  ;;  %8842 = vmatprep.mubr.f32.mxu0 %v1513_v7  ;;  %13803 = vst [vmem:[#allocation130_spill] sm:$0xff] %v11236_v23  ;;  %13805 = vst [vmem:[#allocation132_spill] sm:$0xff] %v11241_v13  ;;  %v1596_v7 = vsub.f32 %v11192_v32, %v11221_v37  ;;  %v11271_v29 = vsub.f32 %v125_v63, %v11241_v13 }
 0x191   :  { %8854 = vmatpush3.msra.mxu1 %v11198_v61  ;;  %8812 = vmatprep.subr.mxu0 %v11047_v47  ;;  %13809 = vst [vmem:[#allocation136_spill] sm:$0xff] %v11257_v17  ;;  %v1603_v61 = vsub.f32 %v11208_v52, %v11236_v23  ;;  %v11285_v56 = vsub.f32 %v124_v1, %v11257_v17  ;;  %v11302_v1 = vand.u32 4294901760, %v1610_v40 }
 0x192   :  { %8855 = vmatprep.subr.mxu1 %v11214_v14  ;;  %8813 = vmatpush3.msra.mxu0 %v11047_v47  ;;  %13812 = vst [vmem:[#allocation139_spill] sm:$0xff] %v11271_v29 }
 0x193   :  { %8856 = vmatpush3.msra.mxu1 %v11214_v14  ;;  %8814 = vmatprep.subr.mxu0 %v11056_v2  ;;  %v11277_v14 = vand.u32 4294901760, %v1596_v7  ;;  %13815 = vst [vmem:[#allocation142_spill] sm:$0xff] %v11285_v56  ;;  %v11291_v63 = vand.u32 4294901760, %v1603_v61  ;;  %v1617_v7 = vsub.f32 %v11239_v5, %v11268_v6  ;;  %13818 = vst [vmem:[#allocation145_spill] sm:$0xff] %v11302_v1 }
 0x194   :  { %8857 = vmatprep.subr.mxu1 %v11230_v26  ;;  %8815 = vmatpush3.msra.mxu0 %v11056_v2  ;;  %v1624_v61 = vsub.f32 %v11255_v50, %v11282_v62 }
 0x195   :  { %8858 = vmatpush3.msra.mxu1 %v11230_v26  ;;  %8816 = vmatprep.subr.mxu0 %v11065_v43  ;;  %13813 = vst [vmem:[#allocation140_spill] sm:$0xff] %v11277_v14  ;;  %13816 = vst [vmem:[#allocation143_spill] sm:$0xff] %v11291_v63  ;;  %v11296_v26 = vand.u32 4294901760, %v11271_v29 }
 0x196   :  { %8859 = vmatprep.subr.mxu1 %v11245_v33  ;;  %8817 = vmatpush3.msra.mxu0 %v11065_v43 }
 0x197   :  { %8860 = vmatpush3.msra.mxu1 %v11245_v33  ;;  %8818 = vmatprep.subr.mxu0 %v11077_v9  ;;  %13817 = vst [vmem:[#allocation144_spill] sm:$0xff] %v11296_v26  ;;  %v11307_v33 = vand.u32 4294901760, %v11285_v56  ;;  %v1631_v40 = vsub.f32 %v11271_v29, %v11296_v26 }
 0x198   :  { %8861 = vmatprep.subr.mxu1 %v11263_v45  ;;  %8819 = vmatpush3.msra.mxu0 %v11077_v9 }
 0x199   :  { %8862 = vmatpush3.msra.mxu1 %v11263_v45  ;;  %8820 = vmatprep.subr.mxu0 %v11089_v28  ;;  %13819 = vst [vmem:[#allocation146_spill] sm:$0xff] %v11307_v33  ;;  %v11313_v45 = vand.u32 4294901760, %v1617_v7  ;;  %v1638_v51 = vsub.f32 %v11285_v56, %v11307_v33  ;;  %v11332_v7 = vand.u32 4294901760, %v1631_v40 }
 0x19a   :  { %8863 = vmatprep.subr.mxu1 %v11277_v14  ;;  %8821 = vmatpush3.msra.mxu0 %v11089_v28 }
 0x19b   :  { %8864 = vmatpush3.msra.mxu1 %v11277_v14  ;;  %8822 = vmatprep.subr.mxu0 %v11106_v12  ;;  %13820 = vst [vmem:[#allocation147_spill] sm:$0xff] %v11313_v45  ;;  %v11321_v14 = vand.u32 4294901760, %v1624_v61  ;;  %13822 = vst [vmem:[#allocation149_spill] sm:$0xff] %v11332_v7  ;;  %v11338_v61 = vand.u32 4294901760, %v1638_v51 }
 0x19c   :  { %8865 = vmatprep.subr.mxu1 %v11291_v63  ;;  %8823 = vmatpush3.msra.mxu0 %v11106_v12 }
 0x19d   :  { %8866 = vmatpush3.msra.mxu1 %v11291_v63  ;;  %8824 = vmatprep.subr.mxu0 %v11120_v60  ;;  %13821 = vst [vmem:[#allocation148_spill] sm:$0xff] %v11321_v14  ;;  %13823 = vst [vmem:[#allocation150_spill] sm:$0xff] %v11338_v61 }
 0x19e   :  { %8867 = vmatprep.subr.mxu1 %v11302_v1  ;;  %8825 = vmatpush3.msra.mxu0 %v11120_v60 }
 0x19f   :  { %8868 = vmatpush3.msra.mxu1 %v11302_v1  ;;  %8826 = vmatprep.subr.mxu0 %v11142_v4  ;;  %v11342_v1 = vsub.f32 %v10941_v15, %v11326_v46  ;;  %v13824_v15 = vand.u32 4294901760, %v11128_v35 }
 0x1a0   :  { %8869 = vmatprep.subr.mxu1 %v11313_v45  ;;  %8827 = vmatpush3.msra.mxu0 %v11142_v4 }
 0x1a1   :  { %8870 = vmatpush3.msra.mxu1 %v11313_v45  ;;  %8828 = vmatprep.subr.mxu0 %v11159_v25  ;;  %v1521_v51 = vand.u32 4294901760, %v11342_v1 }
 0x1a2   :  { %8871 = vmatprep.subr.mxu1 %v11321_v14  ;;  %8829 = vmatpush3.msra.mxu0 %v11159_v25 }
 0x1a3   :  { %8872 = vmatpush3.msra.mxu1 %v11321_v14  ;;  %8830 = vmatprep.subr.mxu0 %v11175_v57  ;;  %v1522_v40 = vsub.f32 %v11342_v1, %v1521_v51 }
 0x1a4   :  { %8873 = vmatprep.subr.mxu1 %v11332_v7  ;;  %8831 = vmatpush3.msra.mxu0 %v11175_v57 }
 0x1a5   :  { %8874 = vmatpush3.msra.mxu1 %v11332_v7  ;;  %8832 = vmatprep.subr.mxu0 %v11194_v0 }
 0x1a6   :  { %8875 = vmatprep.subr.mxu1 %v11338_v61  ;;  %8833 = vmatpush3.msra.mxu0 %v11194_v0 }
 0x1a7   :  { %8876 = vmatpush3.msra.mxu1 %v11338_v61  ;;  %8834 = vmatprep.subr.mxu0 %v11210_v42 }
 0x1a8   :  { %8878 = vmatmul.mubr.f32.vlgmr.msra.gmra.mxu1 %v11326_v46  ;;  %8915 = vmatprep.subr.mxu1 %v11039_v34 }
 0x1a9   :  { %8835 = vmatpush3.msra.mxu0 %v11210_v42  ;;  %8916 = vmatpush3.msra.mxu1 %v11039_v34 }
 0x1aa   :  { %8947 = vmatprep.mubr.f32.mxu1 %v13824_v15  ;;  %8836 = vmatprep.subr.mxu0 %v11226_v39  ;;  %v1523_v15 = vand.u32 4294901760, %v1522_v40 }
 0x1ab   :  { %8917 = vmatprep.subr.mxu1 %v11047_v47  ;;  %8837 = vmatpush3.msra.mxu0 %v11226_v39 }
 0x1ac   :  { %8918 = vmatpush3.msra.mxu1 %v11047_v47  ;;  %8838 = vmatprep.subr.mxu0 %v11241_v13 }
 0x1ad   :  { %8919 = vmatprep.subr.mxu1 %v11056_v2  ;;  %8839 = vmatpush3.msra.mxu0 %v11241_v13 }
 0x1ae   :  { %8920 = vmatpush3.msra.mxu1 %v11056_v2  ;;  %8840 = vmatprep.subr.mxu0 %v11257_v17 }
 0x1af   :  { %8921 = vmatprep.subr.mxu1 %v11065_v43  ;;  %8841 = vmatpush3.msra.mxu0 %v11257_v17 }
 0x1b0   :  { %8922 = vmatpush3.msra.mxu1 %v11065_v43  ;;  %8843 = vmatmul.mubr.f32.vlgmr.msra.gmra.mxu0 %v1523_v15 }
 0x1b1   :  { %8880 = vmatprep.subr.mxu0 %v11052_v19  ;;  %8923 = vmatprep.subr.mxu1 %v11077_v9 }
 0x1b2   :  { %8881 = vmatpush3.msra.mxu0 %v11052_v19  ;;  %8912 = vmatprep.mubr.f32.mxu0 %v11128_v35  ;;  %v2135_v35 = vld [vmem:[#allocation2 + $0x10] sm:$0xff] }
 0x1b3   :  { %8924 = vmatpush3.msra.mxu1 %v11077_v9  ;;  %8882 = vmatprep.subr.mxu0 %v11063_v59 }
 0x1b4   :  { %8925 = vmatprep.subr.mxu1 %v11089_v28  ;;  %8883 = vmatpush3.msra.mxu0 %v11063_v59 }
 0x1b5   :  { %8926 = vmatpush3.msra.mxu1 %v11089_v28  ;;  %8884 = vmatprep.subr.mxu0 %v11075_v38 }
 0x1b6   :  { %8927 = vmatprep.subr.mxu1 %v11106_v12  ;;  %8885 = vmatpush3.msra.mxu0 %v11075_v38 }
 0x1b7   :  { %8928 = vmatpush3.msra.mxu1 %v11106_v12  ;;  %8886 = vmatprep.subr.mxu0 %v11087_v10 }
 0x1b8   :  { %8929 = vmatprep.subr.mxu1 %v11120_v60  ;;  %8887 = vmatpush3.msra.mxu0 %v11087_v10 }
 0x1b9   :  { %8930 = vmatpush3.msra.mxu1 %v11120_v60  ;;  %8888 = vmatprep.subr.mxu0 %v11104_v20 }
 0x1ba   :  { %8931 = vmatprep.subr.mxu1 %v11142_v4  ;;  %8889 = vmatpush3.msra.mxu0 %v11104_v20 }
 0x1bb   :  { %8932 = vmatpush3.msra.mxu1 %v11142_v4  ;;  %8890 = vmatprep.subr.mxu0 %v11118_v49 }
 0x1bc   :  { %8933 = vmatprep.subr.mxu1 %v11159_v25  ;;  %8891 = vmatpush3.msra.mxu0 %v11118_v49 }
 0x1bd   :  { %8934 = vmatpush3.msra.mxu1 %v11159_v25  ;;  %8892 = vmatprep.subr.mxu0 %v11138_v16 }
 0x1be   :  { %8935 = vmatprep.subr.mxu1 %v11175_v57  ;;  %8893 = vmatpush3.msra.mxu0 %v11138_v16 }
 0x1bf   :  { %8936 = vmatpush3.msra.mxu1 %v11175_v57  ;;  %8894 = vmatprep.subr.mxu0 %v11154_v11 }
 0x1c0   :  { %8937 = vmatprep.subr.mxu1 %v11194_v0  ;;  %8895 = vmatpush3.msra.mxu0 %v11154_v11 }
 0x1c1   :  { %8938 = vmatpush3.msra.mxu1 %v11194_v0  ;;  %8896 = vmatprep.subr.mxu0 %v11173_v31 }
 0x1c2   :  { %8939 = vmatprep.subr.mxu1 %v11210_v42  ;;  %8897 = vmatpush3.msra.mxu0 %v11173_v31 }
 0x1c3   :  { %8940 = vmatpush3.msra.mxu1 %v11210_v42  ;;  %8898 = vmatprep.subr.mxu0 %v11192_v32 }
 0x1c4   :  { %8941 = vmatprep.subr.mxu1 %v11226_v39  ;;  %8899 = vmatpush3.msra.mxu0 %v11192_v32 }
 0x1c5   :  { %8942 = vmatpush3.msra.mxu1 %v11226_v39  ;;  %8900 = vmatprep.subr.mxu0 %v11208_v52 }
 0x1c6   :  { %8943 = vmatprep.subr.mxu1 %v11241_v13  ;;  %8901 = vmatpush3.msra.mxu0 %v11208_v52 }
 0x1c7   :  { %8944 = vmatpush3.msra.mxu1 %v11241_v13  ;;  %8902 = vmatprep.subr.mxu0 %v11224_v48 }
 0x1c8   :  { %8945 = vmatprep.subr.mxu1 %v11257_v17  ;;  %8903 = vmatpush3.msra.mxu0 %v11224_v48 }
 0x1c9   :  { %8946 = vmatpush3.msra.mxu1 %v11257_v17  ;;  %8904 = vmatprep.subr.mxu0 %v11239_v5 }
 0x1ca   :  { %8948 = vmatmul.mubr.f32.vlgmr.msra.gmra.mxu1 %v1521_v51  ;;  %8985 = vmatprep.subr.mxu1 %v11039_v34 }
 0x1cb   :  { %8905 = vmatpush3.msra.mxu0 %v11239_v5  ;;  %8986 = vmatpush3.msra.mxu1 %v11039_v34 }
 0x1cc   :  { %9017 = vmatprep.mubr.f32.mxu1 %v11096_v21  ;;  %8906 = vmatprep.subr.mxu0 %v11255_v50 }
 0x1cd   :  { %8987 = vmatprep.subr.mxu1 %v11047_v47  ;;  %8907 = vmatpush3.msra.mxu0 %v11255_v50 }
 0x1ce   :  { %8988 = vmatpush3.msra.mxu1 %v11047_v47  ;;  %8908 = vmatprep.subr.mxu0 %v11271_v29 }
 0x1cf   :  { %8989 = vmatprep.subr.mxu1 %v11056_v2  ;;  %8909 = vmatpush3.msra.mxu0 %v11271_v29 }
 0x1d0   :  { %8990 = vmatpush3.msra.mxu1 %v11056_v2  ;;  %8910 = vmatprep.subr.mxu0 %v11285_v56 }
 0x1d1   :  { %8991 = vmatprep.subr.mxu1 %v11065_v43  ;;  %8911 = vmatpush3.msra.mxu0 %v11285_v56 }
 0x1d2   :  { %8992 = vmatpush3.msra.mxu1 %v11065_v43  ;;  %8913 = vmatmul.mubr.f32.vlgmr.msra.gmra.mxu0 %v11342_v1  ;;  %v2136_v1 = vld [vmem:[#allocation2 + $0x18] sm:$0xff] }
 0x1d3   :  { %8950 = vmatprep.subr.mxu0 %v11070_v8  ;;  %8993 = vmatprep.subr.mxu1 %v11077_v9  ;;  %v2141_v40 = vsel %vm142_vm0, %v2136_v1, 0 }
 0x1d4   :  { %8951 = vmatpush3.msra.mxu0 %v11070_v8  ;;  %8982 = vmatprep.mubr.f32.mxu0 %v11096_v21  ;;  %v2138_v21 = vsel %vm142_vm0, %v2135_v35, 0  ;;  %v11483_v15 = vand.u32 4294901760, %v2141_v40 }
 0x1d5   :  { %8994 = vmatpush3.msra.mxu1 %v11077_v9  ;;  %8952 = vmatprep.subr.mxu0 %v11084_v18  ;;  %v11474_v51 = vand.u32 4294901760, %v2138_v21 }
 0x1d6   :  { %8995 = vmatprep.subr.mxu1 %v11089_v28  ;;  %8953 = vmatpush3.msra.mxu0 %v11084_v18  ;;  %v2221_v1 = vsub.f32 %v2141_v40, %v11483_v15 }
 0x1d7   :  { %8996 = vmatpush3.msra.mxu1 %v11089_v28  ;;  %8954 = vmatprep.subr.mxu0 %v11101_v54  ;;  %v2211_v35 = vsub.f32 %v2138_v21, %v11474_v51 }
 0x1d8   :  { %8997 = vmatprep.subr.mxu1 %v11106_v12  ;;  %8955 = vmatpush3.msra.mxu0 %v11101_v54  ;;  %v2222_v21 = vand.u32 4294901760, %v2221_v1 }
 0x1d9   :  { %8998 = vmatpush3.msra.mxu1 %v11106_v12  ;;  %8956 = vmatprep.subr.mxu0 %v11115_v55 }
 0x1da   :  { %8999 = vmatprep.subr.mxu1 %v11120_v60  ;;  %8957 = vmatpush3.msra.mxu0 %v11115_v55 }
 0x1db   :  { %9000 = vmatpush3.msra.mxu1 %v11120_v60  ;;  %8958 = vmatprep.subr.mxu0 %v11135_v53 }
 0x1dc   :  { %9001 = vmatprep.subr.mxu1 %v11142_v4  ;;  %8959 = vmatpush3.msra.mxu0 %v11135_v53 }
 0x1dd   :  { %9002 = vmatpush3.msra.mxu1 %v11142_v4  ;;  %8960 = vmatprep.subr.mxu0 %v11151_v58 }
 0x1de   :  { %9003 = vmatprep.subr.mxu1 %v11159_v25  ;;  %8961 = vmatpush3.msra.mxu0 %v11151_v58 }
 0x1df   :  { %9004 = vmatpush3.msra.mxu1 %v11159_v25  ;;  %8962 = vmatprep.subr.mxu0 %v11168_v22 }
 0x1e0   :  { %9005 = vmatprep.subr.mxu1 %v11175_v57  ;;  %8963 = vmatpush3.msra.mxu0 %v11168_v22  ;;  %v13859_v22 = vld [vmem:[#allocation86_spill] sm:$0xff] }
 0x1e1   :  { %9006 = vmatpush3.msra.mxu1 %v11175_v57  ;;  %8964 = vmatprep.subr.mxu0 %v11184_v3 }
 0x1e2   :  { %9007 = vmatprep.subr.mxu1 %v11194_v0  ;;  %8965 = vmatpush3.msra.mxu0 %v11184_v3 }
 0x1e3   :  { %9008 = vmatpush3.msra.mxu1 %v11194_v0  ;;  %8966 = vmatprep.subr.mxu0 %v11205_v44 }
 0x1e4   :  { %9009 = vmatprep.subr.mxu1 %v11210_v42  ;;  %8967 = vmatpush3.msra.mxu0 %v11205_v44  ;;  %v2212_v44 = vand.u32 4294901760, %v2211_v35 }
 0x1e5   :  { %9010 = vmatpush3.msra.mxu1 %v11210_v42  ;;  %8968 = vmatprep.subr.mxu0 %v11221_v37 }
 0x1e6   :  { %9011 = vmatprep.subr.mxu1 %v11226_v39  ;;  %8969 = vmatpush3.msra.mxu0 %v11221_v37  ;;  %v2213_v40 = vsub.f32 %v2211_v35, %v2212_v44  ;;  %v2223_v37 = vsub.f32 %v2221_v1, %v2222_v21 }
 0x1e7   :  { %9012 = vmatpush3.msra.mxu1 %v11226_v39  ;;  %8970 = vmatprep.subr.mxu0 %v11236_v23 }
 0x1e8   :  { %9013 = vmatprep.subr.mxu1 %v11241_v13  ;;  %8971 = vmatpush3.msra.mxu0 %v11236_v23  ;;  %v13825_v23 = vld [vmem:[#allocation25_spill] sm:$0xff]  ;;  %v2214_v3 = vand.u32 4294901760, %v2213_v40 }
 0x1e9   :  { %9014 = vmatpush3.msra.mxu1 %v11241_v13  ;;  %8972 = vmatprep.subr.mxu0 %v11252_v24  ;;  %v13829_v40 = vld [vmem:[#allocation21_spill] sm:$0xff] }
 0x1ea   :  { %9015 = vmatprep.subr.mxu1 %v11257_v17  ;;  %8973 = vmatpush3.msra.mxu0 %v11252_v24  ;;  %v13826_v24 = vld [vmem:[#allocation26_spill] sm:$0xff] }
 0x1eb   :  { %9016 = vmatpush3.msra.mxu1 %v11257_v17  ;;  %8974 = vmatprep.subr.mxu0 %v11268_v6 }
 0x1ec   :  { %9018 = vmatmul.mubr.f32.vlgmr.msra.gmra.mxu1 %v11326_v46  ;;  %8975 = vmatpush3.msra.mxu0 %v11268_v6  ;;  %v13857_v6 = vld [vmem:[#allocation85_spill] sm:$0xff] }
 0x1ed   :  { %8976 = vmatprep.subr.mxu0 %v11282_v62  ;;  %9027 = vmatprep.subr.mxu1 %v13825_v23 }
 0x1ee   :  { %8977 = vmatpush3.msra.mxu0 %v11282_v62  ;;  %9028 = vmatpush3.msra.mxu1 %v13825_v23  ;;  %v13827_v23 = vld [vmem:[#allocation19_spill] sm:$0xff]  ;;  %v2224_v62 = vand.u32 4294901760, %v2223_v37  ;;  %v13834_v37 = vld [vmem:[#allocation33_spill] sm:$0xff] }
 0x1ef   :  { %8978 = vmatprep.subr.mxu0 %v11296_v26  ;;  %9029 = vmatprep.subr.mxu1 %v13826_v24 }
 0x1f0   :  { %8979 = vmatpush3.msra.mxu0 %v11296_v26  ;;  %9030 = vmatpush3.msra.mxu1 %v13826_v24  ;;  %v13828_v26 = vld [vmem:[#allocation20_spill] sm:$0xff]  ;;  %v13855_v24 = vld [vmem:[#allocation83_spill] sm:$0xff] }
 0x1f1   :  { %8980 = vmatprep.subr.mxu0 %v11307_v33  ;;  %9031 = vmatprep.mubr.f32.mxu1 %v11474_v51 }
 0x1f2   :  { %8981 = vmatpush3.msra.mxu0 %v11307_v33  ;;  %9032 = vmatmul.mubr.f32.vlgmr.msra.gmra.mxu1 %v11483_v15  ;;  %v13853_v33 = vld [vmem:[#allocation80_spill] sm:$0xff] }
 0x1f3   :  { %8983 = vmatmul.mubr.f32.vlgmr.msra.gmra.mxu0 %v11326_v46  ;;  %9020 = vmatprep.subr.mxu0 %v13827_v23  ;;  %v13830_v46 = vld [vmem:[#allocation22_spill] sm:$0xff] }
 0x1f4   :  { %9021 = vmatpush3.msra.mxu0 %v13827_v23  ;;  %9024 = vmatprep.mubr.f32.mxu0 %v2214_v3  ;;  %v13831_v3 = vld [vmem:[#allocation23_spill] sm:$0xff] }
 0x1f5   :  { %9022 = vmatprep.subr.mxu0 %v13828_v26  ;;  %9041 = vmatprep.subr.mxu1 %v13827_v23 }
 0x1f6   :  { %9023 = vmatpush3.msra.mxu0 %v13828_v26  ;;  %9042 = vmatpush3.msra.mxu1 %v13827_v23 }
 0x1f7   :  { %9025 = vmatmul.mubr.f32.vlgmr.msra.gmra.mxu0 %v2224_v62  ;;  %9034 = vmatprep.subr.mxu0 %v13829_v40  ;;  %v13832_v62 = vld [vmem:[#allocation24_spill] sm:$0xff] }
 0x1f8   :  { %9035 = vmatpush3.msra.mxu0 %v13829_v40  ;;  %9043 = vmatprep.subr.mxu1 %v13828_v26  ;;  %v13841_v40 = vld [vmem:[#allocation56_spill] sm:$0xff] }
 0x1f9   :  { %9036 = vmatprep.subr.mxu0 %v13830_v46  ;;  %9038 = vmatprep.mubr.f32.mxu0 %v2211_v35  ;;  %v13835_v35 = vld [vmem:[#allocation40_spill] sm:$0xff] }
 0x1fa   :  { %9037 = vmatpush3.msra.mxu0 %v13830_v46  ;;  %9044 = vmatpush3.msra.mxu1 %v13828_v26 }
 0x1fb   :  { %9045 = vmatprep.mubr.f32.mxu1 %v2212_v44  ;;  %9039 = vmatmul.mubr.f32.vlgmr.msra.gmra.mxu0 %v2221_v1  ;;  %v13833_v44 = vld [vmem:[#allocation31_spill] sm:$0xff]  ;;  %v13837_v1 = vld [vmem:[#allocation48_spill] sm:$0xff] }
 0x1fc   :  { %9046 = vmatmul.mubr.f32.vlgmr.msra.gmra.mxu1 %v2222_v21  ;;  %9048 = vmatprep.subr.mxu0 %v13831_v3 }
 0x1fd   :  { %9055 = vmatprep.subr.mxu1 %v13827_v23  ;;  %9049 = vmatpush3.msra.mxu0 %v13831_v3 }
 0x1fe   :  { %9056 = vmatpush3.msra.mxu1 %v13827_v23  ;;  %9050 = vmatprep.subr.mxu0 %v13832_v62  ;;  %v13851_v23 = vld [vmem:[#allocation79_spill] sm:$0xff] }
 0x1ff   :  { %9057 = vmatprep.subr.mxu1 %v13828_v26  ;;  %9051 = vmatpush3.msra.mxu0 %v13832_v62 }
 0x200   :  { %9052 = vmatprep.mubr.f32.mxu0 %v11474_v51  ;;  %9058 = vmatpush3.msra.mxu1 %v13828_v26  ;;  %v13849_v26 = vld [vmem:[#allocation75_spill] sm:$0xff] }
 0x201   :  { %9059 = vmatprep.mubr.f32.mxu1 %v11474_v51  ;;  %9053 = vmatmul.mubr.f32.vlgmr.msra.gmra.mxu0 %v11483_v15  ;;  %v13836_v51 = vld [vmem:[#allocation44_spill] sm:$0xff] }
 0x202   :  { %9060 = vmatmul.mubr.f32.vlgmr.msra.gmra.mxu1 %v11483_v15  ;;  %9097 = vmatprep.subr.mxu1 %v13833_v44 }
 0x203   :  { %9098 = vmatpush3.msra.mxu1 %v13833_v44  ;;  %9062 = vmatprep.subr.mxu0 %v10665_v27  ;;  %v8669_v15 = vpop.f32.mrf.mxu1  ;;  %v13839_v44 = vld [vmem:[#allocation54_spill] sm:$0xff] }
 0x204   :  { %9099 = vmatprep.subr.mxu1 %v13834_v37  ;;  %9063 = vmatpush3.msra.mxu0 %v10665_v27 }
 0x205   :  { %9100 = vmatpush3.msra.mxu1 %v13834_v37  ;;  %9064 = vmatprep.subr.mxu0 %v10670_v30  ;;  %v13838_v37 = vld [vmem:[#allocation36_spill] sm:$0xff]  ;;  %v992_v62 = vpop.f32.mrf.mxu1 }
 0x206   :  { %9101 = vmatprep.subr.mxu1 %v13835_v35  ;;  %9065 = vmatpush3.msra.mxu0 %v10670_v30 }
 0x207   :  { %9102 = vmatpush3.msra.mxu1 %v13835_v35  ;;  %9066 = vmatprep.subr.mxu0 %v10687_v36 }
 0x208   :  { %9103 = vmatprep.subr.mxu1 %v13836_v51  ;;  %9067 = vmatpush3.msra.mxu0 %v10687_v36 }
 0x209   :  { %9104 = vmatpush3.msra.mxu1 %v13836_v51  ;;  %9068 = vmatprep.subr.mxu0 %v10696_v41  ;;  %v13840_v51 = vld [vmem:[#allocation39_spill] sm:$0xff] }
 0x20a   :  { %9105 = vmatprep.subr.mxu1 %v13837_v1  ;;  %9069 = vmatpush3.msra.mxu0 %v10696_v41 }
 0x20b   :  { %v8634_v21 = vpop.f32.mrf.mxu0  ;;  %9106 = vmatpush3.msra.mxu1 %v13837_v1  ;;  %9070 = vmatprep.subr.mxu0 %v13838_v37  ;;  %v13842_v1 = vld [vmem:[#allocation42_spill] sm:$0xff] }
 0x20c   :  { %v999_v35 = vadd.f32 %v8669_v15, %v8634_v21  ;;  %9107 = vmatprep.subr.mxu1 %v13839_v44  ;;  %9071 = vmatpush3.msra.mxu0 %v13838_v37  ;;  %v13843_v15 = vld [vmem:[#allocation60_spill] sm:$0xff]  ;;  %v13844_v21 = vld [vmem:[#allocation46_spill] sm:$0xff] }
 0x20d   :  { %v831_v3 = vpop.f32.mrf.mxu0  ;;  %9108 = vmatpush3.msra.mxu1 %v13839_v44  ;;  %9072 = vmatprep.subr.mxu0 %v13840_v51  ;;  %v13845_v44 = vld [vmem:[#allocation64_spill] sm:$0xff] }
 0x20e   :  { %v993_v46 = vadd.f32 %v992_v62, %v831_v3  ;;  %9109 = vmatprep.subr.mxu1 %v13841_v40  ;;  %9073 = vmatpush3.msra.mxu0 %v13840_v51  ;;  %v13846_v3 = vld [vmem:[#allocation51_spill] sm:$0xff]  ;;  %v13847_v62 = vld [vmem:[#allocation70_spill] sm:$0xff] }
 0x20f   :  { %9110 = vmatpush3.msra.mxu1 %v13841_v40  ;;  %9074 = vmatprep.subr.mxu0 %v13842_v1  ;;  %v13848_v40 = vld [vmem:[#allocation55_spill] sm:$0xff] }
 0x210   :  { %9111 = vmatprep.subr.mxu1 %v13843_v15  ;;  %9075 = vmatpush3.msra.mxu0 %v13842_v1 }
 0x211   :  { %9112 = vmatpush3.msra.mxu1 %v13843_v15  ;;  %9076 = vmatprep.subr.mxu0 %v13844_v21  ;;  %v13850_v15 = vld [vmem:[#allocation58_spill] sm:$0xff] }
 0x212   :  { %9113 = vmatprep.subr.mxu1 %v13845_v44  ;;  %9077 = vmatpush3.msra.mxu0 %v13844_v21 }
 0x213   :  { %9114 = vmatpush3.msra.mxu1 %v13845_v44  ;;  %9078 = vmatprep.subr.mxu0 %v13846_v3  ;;  %v13852_v44 = vld [vmem:[#allocation63_spill] sm:$0xff] }
 0x214   :  { %9115 = vmatprep.subr.mxu1 %v13847_v62  ;;  %9079 = vmatpush3.msra.mxu0 %v13846_v3 }
 0x215   :  { %9116 = vmatpush3.msra.mxu1 %v13847_v62  ;;  %9080 = vmatprep.subr.mxu0 %v13848_v40  ;;  %v13854_v62 = vld [vmem:[#allocation65_spill] sm:$0xff] }
 0x216   :  { %9117 = vmatprep.subr.mxu1 %v13849_v26  ;;  %9081 = vmatpush3.msra.mxu0 %v13848_v40 }
 0x217   :  { %9118 = vmatpush3.msra.mxu1 %v13849_v26  ;;  %9082 = vmatprep.subr.mxu0 %v13850_v15  ;;  %v13856_v26 = vld [vmem:[#allocation69_spill] sm:$0xff] }
 0x218   :  { %9119 = vmatprep.subr.mxu1 %v13851_v23  ;;  %9083 = vmatpush3.msra.mxu0 %v13850_v15 }
 0x219   :  { %9120 = vmatpush3.msra.mxu1 %v13851_v23  ;;  %9084 = vmatprep.subr.mxu0 %v13852_v44  ;;  %v13858_v23 = vld [vmem:[#allocation74_spill] sm:$0xff] }
 0x21a   :  { %9121 = vmatprep.subr.mxu1 %v13853_v33  ;;  %9085 = vmatpush3.msra.mxu0 %v13852_v44 }
 0x21b   :  { %9122 = vmatpush3.msra.mxu1 %v13853_v33  ;;  %9086 = vmatprep.subr.mxu0 %v13854_v62  ;;  %v13860_v33 = vld [vmem:[#allocation78_spill] sm:$0xff] }
 0x21c   :  { %9123 = vmatprep.subr.mxu1 %v13855_v24  ;;  %9087 = vmatpush3.msra.mxu0 %v13854_v62 }
 0x21d   :  { %9124 = vmatpush3.msra.mxu1 %v13855_v24  ;;  %9088 = vmatprep.subr.mxu0 %v13856_v26  ;;  %v13861_v24 = vld [vmem:[#allocation27_spill] sm:$0xff] }
 0x21e   :  { %9125 = vmatprep.subr.mxu1 %v13857_v6  ;;  %9089 = vmatpush3.msra.mxu0 %v13856_v26 }
 0x21f   :  { %9126 = vmatpush3.msra.mxu1 %v13857_v6  ;;  %9090 = vmatprep.subr.mxu0 %v13858_v23 }
 0x220   :  { %9127 = vmatprep.subr.mxu1 %v13859_v22  ;;  %9091 = vmatpush3.msra.mxu0 %v13858_v23 }
 0x221   :  { %9128 = vmatpush3.msra.mxu1 %v13859_v22  ;;  %9092 = vmatprep.subr.mxu0 %v13860_v33 }
 0x222   :  { %9167 = vmatprep.subr.mxu1 %v10665_v27  ;;  %9093 = vmatpush3.msra.mxu0 %v13860_v33 }
 0x223   :  { %9132 = vmatprep.subr.mxu0 %v13861_v24 }
 0x224   :  { %v8739_v58 = vpop.f32.mrf.mxu1 }
 0x226   :  { %v1198_v8 = vpop.f32.mrf.mxu1 }
 0x22c   :  { %v8704_v53 = vpop.f32.mrf.mxu0 }
 0x22d   :  { %v1110_v55 = vadd.f32 %v8704_v53, %v999_v35 }
 0x22e   :  { %v1102_v6 = vpop.f32.mrf.mxu0 }
 0x22f   :  { %v1103_v54 = vadd.f32 %v1102_v6, %v993_v46  ;;  %v1207_v18 = vadd.f32 %v8739_v58, %v1110_v55 }
 0x231   :  { %v1199_v56 = vadd.f32 %v1198_v8, %v1103_v54 }
 0x246   :  { %v8809_v29 = vpop.f32.mrf.mxu1 }
 0x248   :  { %v1418_v32 = vpop.f32.mrf.mxu1 }
 0x24e   :  { %v8774_v50 = vpop.f32.mrf.mxu0 }
 0x24f   :  { %v1332_v5 = vadd.f32 %v8774_v50, %v1207_v18 }
 0x250   :  { %v1325_v22 = vpop.f32.mrf.mxu0 }
 0x251   :  { %v1425_v48 = vadd.f32 %v8809_v29, %v1332_v5  ;;  %v1326_v52 = vadd.f32 %v1325_v22, %v1199_v56 }
 0x253   :  { %v1419_v31 = vadd.f32 %v1418_v32, %v1326_v52 }
 0x268   :  { %v8879_v11 = vpop.f32.mrf.mxu1 }
 0x26a   :  { %v1676_v20 = vpop.f32.mrf.mxu1 }
 0x270   :  { %v8844_v16 = vpop.f32.mrf.mxu0 }
 0x271   :  { %v1683_v49 = vadd.f32 %v8879_v11, %v8844_v16  ;;  %v2113_v11 = vmul.f32 %v1425_v48, %v1425_v48 }
 0x272   :  { %v1515_v10 = vpop.f32.mrf.mxu0 }
 0x273   :  { %v1677_v38 = vadd.f32 %v1676_v20, %v1515_v10 }
 0x28a   :  { %v8949_v53 = vpop.f32.mrf.mxu1 }
 0x28c   :  { %v1882_v54 = vpop.f32.mrf.mxu1 }
 0x292   :  { %v8914_v35 = vpop.f32.mrf.mxu0 }
 0x293   :  { %v1794_v6 = vadd.f32 %v8914_v35, %v1683_v49 }
 0x294   :  { %v1786_v55 = vpop.f32.mrf.mxu0 }
 0x295   :  { %v1787_v58 = vadd.f32 %v1786_v55, %v1677_v38  ;;  %v1891_v8 = vadd.f32 %v8949_v53, %v1794_v6  ;;  %v2112_v53 = vmul.f32 %v1419_v31, %v1419_v31 }
 0x297   :  { %v1883_v46 = vadd.f32 %v1882_v54, %v1787_v58 }
 0x2ac   :  { %v9019_v18 = vpop.f32.mrf.mxu1 }
 0x2ae   :  { %v2102_v50 = vpop.f32.mrf.mxu1 }
 0x2b2   :  { %v9033_v22 = vpop.f32.mrf.mxu1 }
 0x2b3   :  { %v8984_v5 = vpop.f32.mrf.mxu0 }
 0x2b4   :  { %v2016_v56 = vadd.f32 %v8984_v5, %v1891_v8  ;;  %v2307_v10 = vpop.f32.mrf.mxu1 }
 0x2b5   :  { %v2009_v32 = vpop.f32.mrf.mxu0 }
 0x2b6   :  { %v2109_v52 = vadd.f32 %v9019_v18, %v2016_v56  ;;  %v2010_v29 = vadd.f32 %v2009_v32, %v1883_v46 }
 0x2b7   :  { %v9026_v16 = vpop.f32.mrf.mxu0 }
 0x2b8   :  { %v2115_v59 = vmul.f32 %v2109_v52, %v2109_v52  ;;  %v2103_v20 = vadd.f32 %v2102_v50, %v2010_v29  ;;  %v2314_v35 = vadd.f32 %v9033_v22, %v9026_v16 }
 0x2b9   :  { %v2216_v19 = vpop.f32.mrf.mxu0 }
 0x2ba   :  { %v11608_v49 = vadd.f32 %v2115_v59, %v2113_v11  ;;  %v2114_v38 = vmul.f32 %v2103_v20, %v2103_v20  ;;  %v2308_v55 = vadd.f32 %v2307_v10, %v2216_v19 }
 0x2bb   :  { %v9040_v6 = vpop.f32.mrf.mxu0 }
 0x2bc   :  { %13862 = vst [vmem:[#allocation36_spill] sm:$0xff] %v11608_v49  ;;  %v9047_v58 = vpop.f32.mrf.mxu1  ;;  %v11610_v54 = vadd.f32 %v2114_v38, %v2112_v53  ;;  %v2397_v8 = vadd.f32 %v9040_v6, %v2314_v35 }
 0x2bd   :  { %v2389_v5 = vpop.f32.mrf.mxu0 }
 0x2be   :  { %13863 = vst [vmem:[#allocation39_spill] sm:$0xff] %v11610_v54  ;;  %v2390_v18 = vadd.f32 %v2389_v5, %v2308_v55  ;;  %v2471_v46 = vpop.f32.mrf.mxu1  ;;  %v2480_v56 = vadd.f32 %v9047_v58, %v2397_v8 }
 0x2c0   :  { %v2472_v48 = vadd.f32 %v2471_v46, %v2390_v18 }
 0x2c1   :  { %v9054_v32 = vpop.f32.mrf.mxu0 }
 0x2c2   :  { %v2563_v50 = vadd.f32 %v9054_v32, %v2480_v56  ;;  %v9061_v52 = vpop.f32.mrf.mxu1 }
 0x2c3   :  { %v2556_v29 = vpop.f32.mrf.mxu0 }
 0x2c4   :  { %v2642_v59 = vadd.f32 %v9061_v52, %v2563_v50  ;;  %v2557_v11 = vadd.f32 %v2556_v29, %v2472_v48  ;;  %v2635_v20 = vpop.f32.mrf.mxu1 }
 0x2c6   :  { %v2648_v31 = vrot.slane %v2642_v59, 6  ;;  %v2636_v22 = vadd.f32 %v2635_v20, %v2557_v11 }
 0x2c8   :  { %v2654_v19 = vsel %vm653_vm1, %v2648_v31, 0.0  ;;  %v2647_v16 = vrot.slane %v2636_v22, 6 }
 0x2c9   :  { %v2659_v10 = vmul.f32 0.60653067, %v2654_v19  ;;  %v2677_v48 = vrot.slane %v2654_v19, 2  ;;  %v2692_v32 = vmul.f32 0.13533528, %v2654_v19 }
 0x2ca   :  { %v2649_v38 = vsel %vm653_vm1, %v2647_v16, %v2648_v31  ;;  %v2653_v53 = vsel %vm653_vm1, 0.0, %v2647_v16 }
 0x2cb   :  { %v2657_v35 = vmul.f32 0.60653067, %v2653_v53  ;;  %v2658_v6 = vmul.f32 0.60653067, %v2649_v38  ;;  %v2666_v55 = vrot.slane %v2659_v10, 1  ;;  %v2674_v46 = vrot.slane %v2653_v53, 2 }
 0x2cc   :  { %v2655_v58 = vmul.f32 0.13533528, %v2653_v53  ;;  %v2656_v8 = vmul.f32 0.13533528, %v2649_v38  ;;  %v2675_v56 = vrot.slane %v2649_v38, 2  ;;  %v2686_v11 = vrot.slane %v2659_v10, 3 }
 0x2cd   :  { %v2663_v5 = vrot.slane %v2657_v35, 1  ;;  %v2664_v18 = vrot.slane %v2658_v6, 1  ;;  %v2683_v29 = vrot.slane %v2657_v35, 3  ;;  %v2684_v59 = vrot.slane %v2658_v6, 3 }
 0x2ce   :  { %v2676_v22 = vsel %vm682_vm3, %v2674_v46, %v2675_v56  ;;  %v2678_v16 = vsel %vm682_vm3, %v2675_v56, %v2677_v48  ;;  %v2696_v54 = vrot.slane %v2655_v58, 4  ;;  %v2697_v49 = vrot.slane %v2656_v8, 4 }
 0x2cf   :  { %v2665_v50 = vsel %vm670_vm2, %v2663_v5, %v2664_v18  ;;  %v2667_v52 = vsel %vm670_vm2, %v2664_v18, %v2666_v55  ;;  %v2699_v38 = vrot.slane %v2692_v32, 4  ;;  %v2685_v19 = vsel %vm692_vm4, %v2683_v29, %v2684_v59 }
 0x2d0   :  { %v2670_v20 = vadd.f32 %v2665_v50, %v2655_v58  ;;  %v2671_v31 = vadd.f32 %v2667_v52, %v2656_v8  ;;  %v2687_v5 = vsel %vm692_vm4, %v2684_v59, %v2686_v11  ;;  %v2698_v35 = vsel %vm706_vm5, %v2696_v54, %v2697_v49 }
 0x2d1   :  { %v2700_v10 = vsel %vm706_vm5, %v2697_v49, %v2699_v38 }
 0x2d2   :  { %v2681_v17 = vadd.f32 %v2676_v22, %v2670_v20  ;;  %v2682_v53 = vadd.f32 %v2678_v16, %v2671_v31 }
 0x2d4   :  { %v2690_v13 = vadd.f32 %v2685_v19, %v2681_v17  ;;  %v2691_v55 = vadd.f32 %v2687_v5, %v2682_v53 }
 0x2d6   :  { %v2703_v6 = vadd.f32 %v2698_v35, %v2690_v13  ;;  %v2704_v18 = vadd.f32 %v2700_v10, %v2691_v55 }
 0x2d8   :  { %v2707_v46 = vrot.slane %v2703_v6, 7  ;;  %v2708_v50 = vrot.slane %v2704_v18, 7  ;;  %v2715_v56 = vmul.f32 2.0, %v2703_v6  ;;  %v2716_v58 = vmul.f32 2.0, %v2704_v18 }
 0x2da   :  { %v2709_v8 = vsel %vm718_vm6, %v2707_v46, %v2708_v50  ;;  %v2713_v48 = vsel %vm718_vm6, 0.0, %v2707_v46  ;;  %v2714_v32 = vsel %vm718_vm6, %v2708_v50, 0.0  ;;  %v13864_v46 = vld [vmem:[#allocation29_spill] sm:$0xff]  ;;  %v13865_v50 = vld [vmem:[#allocation32_spill] sm:$0xff] }
 0x2db   :  { %v2717_v52 = vadd.f32 %v2715_v56, %v2713_v48  ;;  %v2721_v29 = vrot.slane %v2713_v48, 2  ;;  %v2722_v17 = vrot.slane %v2709_v8, 2  ;;  %v2718_v59 = vadd.f32 %v2716_v58, %v2709_v8  ;;  %v13866_v56 = vld [vmem:[#allocation35_spill] sm:$0xff]  ;;  %v13867_v58 = vld [vmem:[#allocation38_spill] sm:$0xff] }
 0x2dc   :  { %v2724_v11 = vrot.slane %v2714_v32, 2  ;;  %v13870_v32 = vld [vmem:[#allocation50_spill] sm:$0xff] }
 0x2dd   :  { %v2723_v54 = vsel %vm682_vm3, %v2721_v29, %v2722_v17  ;;  %v13872_v29 = vld [vmem:[#allocation59_spill] sm:$0xff] }
 0x2de   :  { %v2728_v49 = vadd.f32 %v2723_v54, %v2717_v52  ;;  %v2725_v13 = vsel %vm682_vm3, %v2722_v17, %v2724_v11  ;;  %v11628_v20 = vsub.f32 %v2713_v48, %v2723_v54  ;;  %v13869_v48 = vld [vmem:[#allocation45_spill] sm:$0xff]  ;;  %v13873_v17 = vld [vmem:[#allocation62_spill] sm:$0xff]  ;;  %v13875_v11 = vld [vmem:[#allocation68_spill] sm:$0xff] }
 0x2df   :  { %v2729_v31 = vadd.f32 %v2725_v13, %v2718_v59  ;;  %v11630_v22 = vsub.f32 %v2709_v8, %v2725_v13  ;;  %v13868_v8 = vld [vmem:[#allocation43_spill] sm:$0xff]  ;;  %v13871_v52 = vld [vmem:[#allocation53_spill] sm:$0xff]  ;;  %v13878_v13 = vld [vmem:[#allocation82_spill] sm:$0xff] }
 0x2e0   :  { %v11632_v16 = vand.u32 4294901760, %v2728_v49  ;;  %v13874_v59 = vld [vmem:[#allocation67_spill] sm:$0xff]  ;;  %v13876_v54 = vld [vmem:[#allocation73_spill] sm:$0xff] }
 0x2e1   :  { %v11634_v53 = vand.u32 4294901760, %v2729_v31 }
 0x2e2   :  { %9129 = vmatprep.mubr.f32.mxu1 %v11632_v16  ;;  %v2814_v38 = vsub.f32 %v2728_v49, %v11632_v16  ;;  %v13877_v49 = vld [vmem:[#allocation77_spill] sm:$0xff] }
 0x2e3   :  { %v11639_v19 = vsub.f32 %v2729_v31, %v11634_v53  ;;  %9130 = vmatmul.mubr.f32.vlgmr.msra.gmra.mxu1 %v11634_v53  ;;  %v13879_v31 = vld [vmem:[#allocation28_spill] sm:$0xff] }
 0x2e4   :  { %9168 = vmatpush3.msra.mxu1 %v10665_v27  ;;  %v2815_v5 = vand.u32 4294901760, %v2814_v38 }
 0x2e5   :  { %9169 = vmatprep.subr.mxu1 %v10670_v30  ;;  %v2825_v55 = vand.u32 4294901760, %v11639_v19 }
 0x2e6   :  { %9170 = vmatpush3.msra.mxu1 %v10670_v30  ;;  %9199 = vmatprep.mubr.f32.mxu1 %v2815_v5  ;;  %v2816_v35 = vsub.f32 %v2814_v38, %v2815_v5  ;;  %v13881_v5 = vld [vmem:[#allocation34_spill] sm:$0xff] }
 0x2e7   :  { %9171 = vmatprep.subr.mxu1 %v10687_v36  ;;  %v2826_v10 = vsub.f32 %v11639_v19, %v2825_v55 }
 0x2e8   :  { %9172 = vmatpush3.msra.mxu1 %v10687_v36  ;;  %v2817_v6 = vand.u32 4294901760, %v2816_v35  ;;  %v13885_v35 = vld [vmem:[#allocation49_spill] sm:$0xff] }
 0x2e9   :  { %9173 = vmatprep.subr.mxu1 %v10696_v41  ;;  %v2827_v18 = vand.u32 4294901760, %v2826_v10  ;;  %v13886_v10 = vld [vmem:[#allocation52_spill] sm:$0xff] }
 0x2ea   :  { %9174 = vmatpush3.msra.mxu1 %v10696_v41  ;;  %9094 = vmatprep.mubr.f32.mxu0 %v2817_v6  ;;  %v13887_v6 = vld [vmem:[#allocation57_spill] sm:$0xff] }
 0x2eb   :  { %9175 = vmatprep.subr.mxu1 %v13838_v37  ;;  %9095 = vmatmul.mubr.f32.vlgmr.msra.gmra.mxu0 %v2827_v18  ;;  %v11753_v18 = vand.u32 4294901760, %v11628_v20 }
 0x2ec   :  { %9133 = vmatpush3.msra.mxu0 %v13861_v24  ;;  %9176 = vmatpush3.msra.mxu1 %v13838_v37 }
 0x2ed   :  { %9134 = vmatprep.subr.mxu0 %v13864_v46  ;;  %9164 = vmatprep.mubr.f32.mxu0 %v2814_v38  ;;  %v13880_v38 = vld [vmem:[#allocation30_spill] sm:$0xff] }
 0x2ee   :  { %9177 = vmatprep.subr.mxu1 %v13840_v51  ;;  %9135 = vmatpush3.msra.mxu0 %v13864_v46 }
 0x2ef   :  { %9178 = vmatpush3.msra.mxu1 %v13840_v51  ;;  %9136 = vmatprep.subr.mxu0 %v13865_v50 }
 0x2f0   :  { %9179 = vmatprep.subr.mxu1 %v13842_v1  ;;  %9137 = vmatpush3.msra.mxu0 %v13865_v50 }
 0x2f1   :  { %9180 = vmatpush3.msra.mxu1 %v13842_v1  ;;  %9138 = vmatprep.subr.mxu0 %v13866_v56 }
 0x2f2   :  { %9181 = vmatprep.subr.mxu1 %v13844_v21  ;;  %9139 = vmatpush3.msra.mxu0 %v13866_v56 }
 0x2f3   :  { %9182 = vmatpush3.msra.mxu1 %v13844_v21  ;;  %9140 = vmatprep.subr.mxu0 %v13867_v58 }
 0x2f4   :  { %9183 = vmatprep.subr.mxu1 %v13846_v3  ;;  %9141 = vmatpush3.msra.mxu0 %v13867_v58 }
 0x2f5   :  { %9184 = vmatpush3.msra.mxu1 %v13846_v3  ;;  %9142 = vmatprep.subr.mxu0 %v13868_v8 }
 0x2f6   :  { %9185 = vmatprep.subr.mxu1 %v13848_v40  ;;  %9143 = vmatpush3.msra.mxu0 %v13868_v8 }
 0x2f7   :  { %9186 = vmatpush3.msra.mxu1 %v13848_v40  ;;  %9144 = vmatprep.subr.mxu0 %v13869_v48 }
 0x2f8   :  { %9187 = vmatprep.subr.mxu1 %v13850_v15  ;;  %9145 = vmatpush3.msra.mxu0 %v13869_v48 }
 0x2f9   :  { %9188 = vmatpush3.msra.mxu1 %v13850_v15  ;;  %9146 = vmatprep.subr.mxu0 %v13870_v32 }
 0x2fa   :  { %9189 = vmatprep.subr.mxu1 %v13852_v44  ;;  %9147 = vmatpush3.msra.mxu0 %v13870_v32 }
 0x2fb   :  { %9190 = vmatpush3.msra.mxu1 %v13852_v44  ;;  %9148 = vmatprep.subr.mxu0 %v13871_v52 }
 0x2fc   :  { %9191 = vmatprep.subr.mxu1 %v13854_v62  ;;  %9149 = vmatpush3.msra.mxu0 %v13871_v52 }
 0x2fd   :  { %9192 = vmatpush3.msra.mxu1 %v13854_v62  ;;  %9150 = vmatprep.subr.mxu0 %v13872_v29 }
 0x2fe   :  { %9193 = vmatprep.subr.mxu1 %v13856_v26  ;;  %9151 = vmatpush3.msra.mxu0 %v13872_v29 }
 0x2ff   :  { %9194 = vmatpush3.msra.mxu1 %v13856_v26  ;;  %9152 = vmatprep.subr.mxu0 %v13873_v17 }
 0x300   :  { %9195 = vmatprep.subr.mxu1 %v13858_v23  ;;  %9153 = vmatpush3.msra.mxu0 %v13873_v17 }
 0x301   :  { %9196 = vmatpush3.msra.mxu1 %v13858_v23  ;;  %9154 = vmatprep.subr.mxu0 %v13874_v59 }
 0x302   :  { %9197 = vmatprep.subr.mxu1 %v13860_v33  ;;  %9155 = vmatpush3.msra.mxu0 %v13874_v59 }
 0x303   :  { %9198 = vmatpush3.msra.mxu1 %v13860_v33  ;;  %9156 = vmatprep.subr.mxu0 %v13875_v11 }
 0x304   :  { %9200 = vmatmul.mubr.f32.vlgmr.msra.gmra.mxu1 %v2825_v55  ;;  %9237 = vmatprep.subr.mxu1 %v10665_v27  ;;  %v13884_v55 = vld [vmem:[#allocation47_spill] sm:$0xff] }
 0x305   :  { %9157 = vmatpush3.msra.mxu0 %v13875_v11  ;;  %9238 = vmatpush3.msra.mxu1 %v10665_v27 }
 0x306   :  { %9269 = vmatprep.mubr.f32.mxu1 %v11632_v16  ;;  %9158 = vmatprep.subr.mxu0 %v13876_v54 }
 0x307   :  { %9239 = vmatprep.subr.mxu1 %v10670_v30  ;;  %9159 = vmatpush3.msra.mxu0 %v13876_v54 }
 0x308   :  { %9240 = vmatpush3.msra.mxu1 %v10670_v30  ;;  %9160 = vmatprep.subr.mxu0 %v13877_v49 }
 0x309   :  { %9241 = vmatprep.subr.mxu1 %v10687_v36  ;;  %9161 = vmatpush3.msra.mxu0 %v13877_v49 }
 0x30a   :  { %9242 = vmatpush3.msra.mxu1 %v10687_v36  ;;  %9162 = vmatprep.subr.mxu0 %v13878_v13 }
 0x30b   :  { %9243 = vmatprep.subr.mxu1 %v10696_v41  ;;  %9163 = vmatpush3.msra.mxu0 %v13878_v13 }
 0x30c   :  { %9244 = vmatpush3.msra.mxu1 %v10696_v41  ;;  %9165 = vmatmul.mubr.f32.vlgmr.msra.gmra.mxu0 %v11639_v19  ;;  %v13882_v19 = vld [vmem:[#allocation37_spill] sm:$0xff] }
 0x30d   :  { %9202 = vmatprep.subr.mxu0 %v13879_v31  ;;  %9245 = vmatprep.subr.mxu1 %v13838_v37 }
 0x30e   :  { %9203 = vmatpush3.msra.mxu0 %v13879_v31  ;;  %9234 = vmatprep.mubr.f32.mxu0 %v11632_v16  ;;  %v13883_v16 = vld [vmem:[#allocation41_spill] sm:$0xff] }
 0x30f   :  { %9246 = vmatpush3.msra.mxu1 %v13838_v37  ;;  %9204 = vmatprep.subr.mxu0 %v13880_v38 }
 0x310   :  { %9247 = vmatprep.subr.mxu1 %v13840_v51  ;;  %9205 = vmatpush3.msra.mxu0 %v13880_v38  ;;  %v13896_v38 = vld [vmem:[#allocation113_spill] sm:$0xff] }
 0x311   :  { %9248 = vmatpush3.msra.mxu1 %v13840_v51  ;;  %9206 = vmatprep.subr.mxu0 %v13881_v5 }
 0x312   :  { %9249 = vmatprep.subr.mxu1 %v13842_v1  ;;  %9207 = vmatpush3.msra.mxu0 %v13881_v5 }
 0x313   :  { %9250 = vmatpush3.msra.mxu1 %v13842_v1  ;;  %9208 = vmatprep.subr.mxu0 %v13882_v19 }
 0x314   :  { %9251 = vmatprep.subr.mxu1 %v13844_v21  ;;  %9209 = vmatpush3.msra.mxu0 %v13882_v19  ;;  %v13894_v19 = vld [vmem:[#allocation109_spill] sm:$0xff] }
 0x315   :  { %9252 = vmatpush3.msra.mxu1 %v13844_v21  ;;  %9210 = vmatprep.subr.mxu0 %v13883_v16 }
 0x316   :  { %9253 = vmatprep.subr.mxu1 %v13846_v3  ;;  %9211 = vmatpush3.msra.mxu0 %v13883_v16  ;;  %v13892_v16 = vld [vmem:[#allocation105_spill] sm:$0xff] }
 0x317   :  { %9254 = vmatpush3.msra.mxu1 %v13846_v3  ;;  %9212 = vmatprep.subr.mxu0 %v13884_v55 }
 0x318   :  { %9255 = vmatprep.subr.mxu1 %v13848_v40  ;;  %9213 = vmatpush3.msra.mxu0 %v13884_v55  ;;  %v13890_v55 = vld [vmem:[#allocation71_spill] sm:$0xff] }
 0x319   :  { %9256 = vmatpush3.msra.mxu1 %v13848_v40  ;;  %9214 = vmatprep.subr.mxu0 %v13885_v35 }
 0x31a   :  { %9257 = vmatprep.subr.mxu1 %v13850_v15  ;;  %9215 = vmatpush3.msra.mxu0 %v13885_v35  ;;  %v13888_v35 = vld [vmem:[#allocation61_spill] sm:$0xff] }
 0x31b   :  { %9258 = vmatpush3.msra.mxu1 %v13850_v15  ;;  %9216 = vmatprep.subr.mxu0 %v13886_v10 }
 0x31c   :  { %9259 = vmatprep.subr.mxu1 %v13852_v44  ;;  %9217 = vmatpush3.msra.mxu0 %v13886_v10  ;;  %v13889_v10 = vld [vmem:[#allocation66_spill] sm:$0xff] }
 0x31d   :  { %9260 = vmatpush3.msra.mxu1 %v13852_v44  ;;  %9218 = vmatprep.subr.mxu0 %v13887_v6 }
 0x31e   :  { %9261 = vmatprep.subr.mxu1 %v13854_v62  ;;  %9219 = vmatpush3.msra.mxu0 %v13887_v6  ;;  %v11765_v6 = vsub.f32 %v11628_v20, %v11753_v18  ;;  %v13893_v20 = vld [vmem:[#allocation76_spill] sm:$0xff] }
 0x31f   :  { %9262 = vmatpush3.msra.mxu1 %v13854_v62  ;;  %9220 = vmatprep.subr.mxu0 %v13888_v35 }
 0x320   :  { %9263 = vmatprep.subr.mxu1 %v13856_v26  ;;  %9221 = vmatpush3.msra.mxu0 %v13888_v35  ;;  %v13891_v35 = vld [vmem:[#allocation72_spill] sm:$0xff] }
 0x321   :  { %9264 = vmatpush3.msra.mxu1 %v13856_v26  ;;  %9222 = vmatprep.subr.mxu0 %v13889_v10 }
 0x322   :  { %9265 = vmatprep.subr.mxu1 %v13858_v23  ;;  %9223 = vmatpush3.msra.mxu0 %v13889_v10  ;;  %v13552_v10 = vand.u32 4294901760, %v11765_v6 }
 0x323   :  { %9266 = vmatpush3.msra.mxu1 %v13858_v23  ;;  %9224 = vmatprep.subr.mxu0 %v13890_v55 }
 0x324   :  { %9267 = vmatprep.subr.mxu1 %v13860_v33  ;;  %9225 = vmatpush3.msra.mxu0 %v13890_v55  ;;  %v13895_v55 = vld [vmem:[#allocation81_spill] sm:$0xff]  ;;  %v3500_v5 = vsub.f32 %v11765_v6, %v13552_v10 }
 0x325   :  { %9268 = vmatpush3.msra.mxu1 %v13860_v33  ;;  %9226 = vmatprep.subr.mxu0 %v13891_v35  ;;  %v13899_v10 = vld [vmem:[#allocation121_spill] sm:$0xff] }
 0x326   :  { %9270 = vmatmul.mubr.f32.vlgmr.msra.gmra.mxu1 %v11634_v53  ;;  %9307 = vmatprep.subr.mxu1 %v13892_v16 }
 0x327   :  { %9227 = vmatpush3.msra.mxu0 %v13891_v35  ;;  %9308 = vmatpush3.msra.mxu1 %v13892_v16  ;;  %v13897_v16 = vld [vmem:[#allocation84_spill] sm:$0xff]  ;;  %v13898_v35 = vld [vmem:[#allocation117_spill] sm:$0xff] }
 0x328   :  { %9339 = vmatprep.mubr.f32.mxu1 %v11753_v18  ;;  %9228 = vmatprep.subr.mxu0 %v13893_v20 }
 0x329   :  { %9309 = vmatprep.subr.mxu1 %v13894_v19  ;;  %9229 = vmatpush3.msra.mxu0 %v13893_v20 }
 0x32a   :  { %9310 = vmatpush3.msra.mxu1 %v13894_v19  ;;  %9230 = vmatprep.subr.mxu0 %v13895_v55  ;;  %v3501_v19 = vand.u32 4294901760, %v3500_v5  ;;  %v13902_v5 = vld [vmem:[#allocation133_spill] sm:$0xff] }
 0x32b   :  { %9311 = vmatprep.subr.mxu1 %v13896_v38  ;;  %9231 = vmatpush3.msra.mxu0 %v13895_v55 }
 0x32c   :  { %9312 = vmatpush3.msra.mxu1 %v13896_v38  ;;  %9232 = vmatprep.subr.mxu0 %v13897_v16  ;;  %v13900_v38 = vld [vmem:[#allocation125_spill] sm:$0xff] }
 0x32d   :  { %9313 = vmatprep.subr.mxu1 %v13898_v35  ;;  %9233 = vmatpush3.msra.mxu0 %v13897_v16 }
 0x32e   :  { %9314 = vmatpush3.msra.mxu1 %v13898_v35  ;;  %9235 = vmatmul.mubr.f32.vlgmr.msra.gmra.mxu0 %v11634_v53  ;;  %v13901_v53 = vld [vmem:[#allocation129_spill] sm:$0xff] }
 0x32f   :  { %9272 = vmatprep.subr.mxu0 %v11039_v34  ;;  %9315 = vmatprep.subr.mxu1 %v13899_v10 }
 0x330   :  { %9273 = vmatpush3.msra.mxu0 %v11039_v34  ;;  %9304 = vmatprep.mubr.f32.mxu0 %v3501_v19  ;;  %v13903_v19 = vld [vmem:[#allocation137_spill] sm:$0xff] }
 0x331   :  { %9316 = vmatpush3.msra.mxu1 %v13899_v10  ;;  %9274 = vmatprep.subr.mxu0 %v11047_v47 }
 0x332   :  { %9317 = vmatprep.subr.mxu1 %v13900_v38  ;;  %9275 = vmatpush3.msra.mxu0 %v11047_v47 }
 0x333   :  { %9318 = vmatpush3.msra.mxu1 %v13900_v38  ;;  %9276 = vmatprep.subr.mxu0 %v11056_v2  ;;  %v13904_v38 = vld [vmem:[#allocation140_spill] sm:$0xff] }
 0x334   :  { %9319 = vmatprep.subr.mxu1 %v13901_v53  ;;  %9277 = vmatpush3.msra.mxu0 %v11056_v2 }
 0x335   :  { %9320 = vmatpush3.msra.mxu1 %v13901_v53  ;;  %9278 = vmatprep.subr.mxu0 %v11065_v43 }
 0x336   :  { %9321 = vmatprep.subr.mxu1 %v13902_v5  ;;  %9279 = vmatpush3.msra.mxu0 %v11065_v43 }
 0x337   :  { %9322 = vmatpush3.msra.mxu1 %v13902_v5  ;;  %9280 = vmatprep.subr.mxu0 %v11077_v9  ;;  %v13905_v5 = vld [vmem:[#allocation145_spill] sm:$0xff] }
 0x338   :  { %9323 = vmatprep.subr.mxu1 %v13903_v19  ;;  %9281 = vmatpush3.msra.mxu0 %v11077_v9 }
 0x339   :  { %9324 = vmatpush3.msra.mxu1 %v13903_v19  ;;  %9282 = vmatprep.subr.mxu0 %v11089_v28  ;;  %v11827_v19 = vand.u32 4294901760, %v11630_v22 }
 0x33a   :  { %9325 = vmatprep.subr.mxu1 %v13904_v38  ;;  %9283 = vmatpush3.msra.mxu0 %v11089_v28 }
 0x33b   :  { %9326 = vmatpush3.msra.mxu1 %v13904_v38  ;;  %9284 = vmatprep.subr.mxu0 %v11106_v12 }
 0x33c   :  { %9327 = vmatprep.subr.mxu1 %v11291_v63  ;;  %9285 = vmatpush3.msra.mxu0 %v11106_v12 }
 0x33d   :  { %9328 = vmatpush3.msra.mxu1 %v11291_v63  ;;  %9286 = vmatprep.subr.mxu0 %v11120_v60  ;;  %v11839_v63 = vsub.f32 %v11630_v22, %v11827_v19  ;;  %v13906_v22 = vand.u32 4294901760, %v11765_v6 }
 0x33e   :  { %9329 = vmatprep.subr.mxu1 %v13905_v5  ;;  %9287 = vmatpush3.msra.mxu0 %v11120_v60 }
 0x33f   :  { %9330 = vmatpush3.msra.mxu1 %v13905_v5  ;;  %9288 = vmatprep.subr.mxu0 %v11142_v4  ;;  %v13910_v5 = vld [vmem:[#allocation91_spill] sm:$0xff] }
 0x340   :  { %9331 = vmatprep.subr.mxu1 %v11313_v45  ;;  %9289 = vmatpush3.msra.mxu0 %v11142_v4 }
 0x341   :  { %9332 = vmatpush3.msra.mxu1 %v11313_v45  ;;  %9290 = vmatprep.subr.mxu0 %v11159_v25  ;;  %v13567_v45 = vand.u32 4294901760, %v11839_v63 }
 0x342   :  { %9333 = vmatprep.subr.mxu1 %v11321_v14  ;;  %9291 = vmatpush3.msra.mxu0 %v11159_v25 }
 0x343   :  { %9334 = vmatpush3.msra.mxu1 %v11321_v14  ;;  %9292 = vmatprep.subr.mxu0 %v11175_v57 }
 0x344   :  { %9335 = vmatprep.subr.mxu1 %v11332_v7  ;;  %9293 = vmatpush3.msra.mxu0 %v11175_v57 }
 0x345   :  { %9336 = vmatpush3.msra.mxu1 %v11332_v7  ;;  %9294 = vmatprep.subr.mxu0 %v11194_v0  ;;  %v3510_v7 = vsub.f32 %v11839_v63, %v13567_v45  ;;  %v13909_v45 = vld [vmem:[#allocation89_spill] sm:$0xff] }
 0x346   :  { %9337 = vmatprep.subr.mxu1 %v11338_v61  ;;  %9295 = vmatpush3.msra.mxu0 %v11194_v0 }
 0x347   :  { %9338 = vmatpush3.msra.mxu1 %v11338_v61  ;;  %9296 = vmatprep.subr.mxu0 %v11210_v42  ;;  %v13907_v61 = vld [vmem:[#allocation132_spill] sm:$0xff]  ;;  %v3511_v14 = vand.u32 4294901760, %v3510_v7  ;;  %v13911_v7 = vld [vmem:[#allocation94_spill] sm:$0xff] }
 0x348   :  { %9340 = vmatmul.mubr.f32.vlgmr.msra.gmra.mxu1 %v11827_v19  ;;  %9377 = vmatprep.subr.mxu1 %v11039_v34 }
 0x349   :  { %9297 = vmatpush3.msra.mxu0 %v11210_v42  ;;  %9378 = vmatpush3.msra.mxu1 %v11039_v34 }
 0x34a   :  { %9409 = vmatprep.mubr.f32.mxu1 %v13906_v22  ;;  %9298 = vmatprep.subr.mxu0 %v11226_v39  ;;  %v13908_v22 = vld [vmem:[#allocation136_spill] sm:$0xff] }
 0x34b   :  { %9379 = vmatprep.subr.mxu1 %v11047_v47  ;;  %9299 = vmatpush3.msra.mxu0 %v11226_v39 }
 0x34c   :  { %9380 = vmatpush3.msra.mxu1 %v11047_v47  ;;  %9300 = vmatprep.subr.mxu0 %v13907_v61 }
 0x34d   :  { %9381 = vmatprep.subr.mxu1 %v11056_v2  ;;  %9301 = vmatpush3.msra.mxu0 %v13907_v61 }
 0x34e   :  { %9382 = vmatpush3.msra.mxu1 %v11056_v2  ;;  %9302 = vmatprep.subr.mxu0 %v13908_v22 }
 0x34f   :  { %9383 = vmatprep.subr.mxu1 %v11065_v43  ;;  %9303 = vmatpush3.msra.mxu0 %v13908_v22 }
 0x350   :  { %9384 = vmatpush3.msra.mxu1 %v11065_v43  ;;  %9305 = vmatmul.mubr.f32.vlgmr.msra.gmra.mxu0 %v3511_v14  ;;  %v13912_v14 = vld [vmem:[#allocation97_spill] sm:$0xff] }
 0x351   :  { %9342 = vmatprep.subr.mxu0 %v13909_v45  ;;  %9385 = vmatprep.subr.mxu1 %v11077_v9 }
 0x352   :  { %9343 = vmatpush3.msra.mxu0 %v13909_v45  ;;  %9374 = vmatprep.mubr.f32.mxu0 %v11765_v6  ;;  %v13913_v6 = vld [vmem:[#allocation100_spill] sm:$0xff] }
 0x353   :  { %9386 = vmatpush3.msra.mxu1 %v11077_v9  ;;  %9344 = vmatprep.subr.mxu0 %v13910_v5 }
 0x354   :  { %9387 = vmatprep.subr.mxu1 %v11089_v28  ;;  %9345 = vmatpush3.msra.mxu0 %v13910_v5  ;;  %v13914_v5 = vld [vmem:[#allocation103_spill] sm:$0xff] }
 0x355   :  { %9388 = vmatpush3.msra.mxu1 %v11089_v28  ;;  %9346 = vmatprep.subr.mxu0 %v13911_v7 }
 0x356   :  { %9389 = vmatprep.subr.mxu1 %v11106_v12  ;;  %9347 = vmatpush3.msra.mxu0 %v13911_v7  ;;  %v13915_v7 = vld [vmem:[#allocation107_spill] sm:$0xff] }
 0x357   :  { %9390 = vmatpush3.msra.mxu1 %v11106_v12  ;;  %9348 = vmatprep.subr.mxu0 %v13912_v14 }
 0x358   :  { %9391 = vmatprep.subr.mxu1 %v11120_v60  ;;  %9349 = vmatpush3.msra.mxu0 %v13912_v14  ;;  %v13916_v14 = vld [vmem:[#allocation111_spill] sm:$0xff] }
 0x359   :  { %9392 = vmatpush3.msra.mxu1 %v11120_v60  ;;  %9350 = vmatprep.subr.mxu0 %v13913_v6 }
 0x35a   :  { %9393 = vmatprep.subr.mxu1 %v11142_v4  ;;  %9351 = vmatpush3.msra.mxu0 %v13913_v6  ;;  %v13917_v6 = vld [vmem:[#allocation115_spill] sm:$0xff] }
 0x35b   :  { %9394 = vmatpush3.msra.mxu1 %v11142_v4  ;;  %9352 = vmatprep.subr.mxu0 %v13914_v5 }
 0x35c   :  { %9395 = vmatprep.subr.mxu1 %v11159_v25  ;;  %9353 = vmatpush3.msra.mxu0 %v13914_v5  ;;  %v13918_v5 = vld [vmem:[#allocation119_spill] sm:$0xff] }
 0x35d   :  { %9396 = vmatpush3.msra.mxu1 %v11159_v25  ;;  %9354 = vmatprep.subr.mxu0 %v13915_v7 }
 0x35e   :  { %9397 = vmatprep.subr.mxu1 %v11175_v57  ;;  %9355 = vmatpush3.msra.mxu0 %v13915_v7  ;;  %v13919_v7 = vld [vmem:[#allocation123_spill] sm:$0xff] }
 0x35f   :  { %9398 = vmatpush3.msra.mxu1 %v11175_v57  ;;  %9356 = vmatprep.subr.mxu0 %v13916_v14 }
 0x360   :  { %9399 = vmatprep.subr.mxu1 %v11194_v0  ;;  %9357 = vmatpush3.msra.mxu0 %v13916_v14  ;;  %v13920_v14 = vld [vmem:[#allocation127_spill] sm:$0xff] }
 0x361   :  { %9400 = vmatpush3.msra.mxu1 %v11194_v0  ;;  %9358 = vmatprep.subr.mxu0 %v13917_v6 }
 0x362   :  { %9401 = vmatprep.subr.mxu1 %v11210_v42  ;;  %9359 = vmatpush3.msra.mxu0 %v13917_v6  ;;  %v13921_v6 = vld [vmem:[#allocation131_spill] sm:$0xff] }
 0x363   :  { %9402 = vmatpush3.msra.mxu1 %v11210_v42  ;;  %9360 = vmatprep.subr.mxu0 %v13918_v5 }
 0x364   :  { %9403 = vmatprep.subr.mxu1 %v11226_v39  ;;  %9361 = vmatpush3.msra.mxu0 %v13918_v5  ;;  %v13922_v5 = vand.u32 4294901760, %v11839_v63 }
 0x365   :  { %9404 = vmatpush3.msra.mxu1 %v11226_v39  ;;  %9362 = vmatprep.subr.mxu0 %v13919_v7 }
 0x366   :  { %9405 = vmatprep.subr.mxu1 %v13907_v61  ;;  %9363 = vmatpush3.msra.mxu0 %v13919_v7  ;;  %v13923_v7 = vld [vmem:[#allocation135_spill] sm:$0xff] }
 0x367   :  { %9406 = vmatpush3.msra.mxu1 %v13907_v61  ;;  %9364 = vmatprep.subr.mxu0 %v13920_v14 }
 0x368   :  { %9407 = vmatprep.subr.mxu1 %v13908_v22  ;;  %9365 = vmatpush3.msra.mxu0 %v13920_v14  ;;  %v13924_v14 = vld [vmem:[#allocation139_spill] sm:$0xff] }
 0x369   :  { %9408 = vmatpush3.msra.mxu1 %v13908_v22  ;;  %9366 = vmatprep.subr.mxu0 %v13921_v6 }
 0x36a   :  { %9410 = vmatmul.mubr.f32.vlgmr.msra.gmra.mxu1 %v13922_v5  ;;  %9447 = vmatprep.subr.mxu1 %v11039_v34  ;;  %v13925_v5 = vld [vmem:[#allocation142_spill] sm:$0xff] }
 0x36b   :  { %9367 = vmatpush3.msra.mxu0 %v13921_v6  ;;  %9448 = vmatpush3.msra.mxu1 %v11039_v34  ;;  %v4124_v6 = vld [vmem:[#allocation2 + $0x28] sm:$0xff] }
 0x36c   :  { %9479 = vmatprep.mubr.f32.mxu1 %v11753_v18  ;;  %9368 = vmatprep.subr.mxu0 %v13923_v7  ;;  %v4129_v45 = vsel %vm142_vm0, %v4124_v6, 0 }
 0x36d   :  { %9449 = vmatprep.subr.mxu1 %v11047_v47  ;;  %9369 = vmatpush3.msra.mxu0 %v13923_v7  ;;  %v13926_v7 = vld [vmem:[#allocation93_spill] sm:$0xff] }
 0x36e   :  { %9450 = vmatpush3.msra.mxu1 %v11047_v47  ;;  %9370 = vmatprep.subr.mxu0 %v13924_v14 }
 0x36f   :  { %9451 = vmatprep.subr.mxu1 %v11056_v2  ;;  %9371 = vmatpush3.msra.mxu0 %v13924_v14  ;;  %v13927_v14 = vld [vmem:[#allocation96_spill] sm:$0xff] }
 0x370   :  { %9452 = vmatpush3.msra.mxu1 %v11056_v2  ;;  %9372 = vmatprep.subr.mxu0 %v13925_v5 }
 0x371   :  { %9453 = vmatprep.subr.mxu1 %v11065_v43  ;;  %9373 = vmatpush3.msra.mxu0 %v13925_v5  ;;  %v13928_v5 = vld [vmem:[#allocation99_spill] sm:$0xff] }
 0x372   :  { %9454 = vmatpush3.msra.mxu1 %v11065_v43  ;;  %9375 = vmatmul.mubr.f32.vlgmr.msra.gmra.mxu0 %v11839_v63  ;;  %v13929_v63 = vld [vmem:[#allocation102_spill] sm:$0xff] }
 0x373   :  { %9412 = vmatprep.subr.mxu0 %v13926_v7  ;;  %9455 = vmatprep.subr.mxu1 %v11077_v9 }
 0x374   :  { %9413 = vmatpush3.msra.mxu0 %v13926_v7  ;;  %9444 = vmatprep.mubr.f32.mxu0 %v11753_v18  ;;  %v4123_v18 = vld [vmem:[#allocation2 + $0x20] sm:$0xff] }
 0x375   :  { %9456 = vmatpush3.msra.mxu1 %v11077_v9  ;;  %9414 = vmatprep.subr.mxu0 %v13927_v14  ;;  %v4126_v7 = vsel %vm142_vm0, %v4123_v18, 0  ;;  %v13933_v18 = vld [vmem:[#allocation118_spill] sm:$0xff] }
 0x376   :  { %9457 = vmatprep.subr.mxu1 %v11089_v28  ;;  %9415 = vmatpush3.msra.mxu0 %v13927_v14  ;;  %v13930_v14 = vld [vmem:[#allocation106_spill] sm:$0xff] }
 0x377   :  { %9458 = vmatpush3.msra.mxu1 %v11089_v28  ;;  %9416 = vmatprep.subr.mxu0 %v13928_v5 }
 0x378   :  { %9459 = vmatprep.subr.mxu1 %v11106_v12  ;;  %9417 = vmatpush3.msra.mxu0 %v13928_v5  ;;  %v13931_v5 = vld [vmem:[#allocation110_spill] sm:$0xff] }
 0x379   :  { %9460 = vmatpush3.msra.mxu1 %v11106_v12  ;;  %9418 = vmatprep.subr.mxu0 %v13929_v63 }
 0x37a   :  { %9461 = vmatprep.subr.mxu1 %v11120_v60  ;;  %9419 = vmatpush3.msra.mxu0 %v13929_v63  ;;  %v13932_v63 = vld [vmem:[#allocation114_spill] sm:$0xff] }
 0x37b   :  { %9462 = vmatpush3.msra.mxu1 %v11120_v60  ;;  %9420 = vmatprep.subr.mxu0 %v13930_v14 }
 0x37c   :  { %9463 = vmatprep.subr.mxu1 %v11142_v4  ;;  %9421 = vmatpush3.msra.mxu0 %v13930_v14  ;;  %v11971_v14 = vand.u32 4294901760, %v4126_v7 }
 0x37d   :  { %9464 = vmatpush3.msra.mxu1 %v11142_v4  ;;  %9422 = vmatprep.subr.mxu0 %v13931_v5 }
 0x37e   :  { %9465 = vmatprep.subr.mxu1 %v11159_v25  ;;  %9423 = vmatpush3.msra.mxu0 %v13931_v5  ;;  %v13934_v5 = vld [vmem:[#allocation122_spill] sm:$0xff]  ;;  %v4199_v6 = vsub.f32 %v4126_v7, %v11971_v14 }
 0x37f   :  { %9466 = vmatpush3.msra.mxu1 %v11159_v25  ;;  %9424 = vmatprep.subr.mxu0 %v13932_v63  ;;  %v11980_v25 = vand.u32 4294901760, %v4129_v45  ;;  %v13937_v7 = vld [vmem:[#allocation134_spill] sm:$0xff] }
 0x380   :  { %9467 = vmatprep.subr.mxu1 %v11175_v57  ;;  %9425 = vmatpush3.msra.mxu0 %v13932_v63  ;;  %v13935_v63 = vld [vmem:[#allocation126_spill] sm:$0xff] }
 0x381   :  { %9468 = vmatpush3.msra.mxu1 %v11175_v57  ;;  %9426 = vmatprep.subr.mxu0 %v13933_v18 }
 0x382   :  { %9469 = vmatprep.subr.mxu1 %v11194_v0  ;;  %9427 = vmatpush3.msra.mxu0 %v13933_v18  ;;  %v13936_v18 = vld [vmem:[#allocation130_spill] sm:$0xff] }
 0x383   :  { %9470 = vmatpush3.msra.mxu1 %v11194_v0  ;;  %9428 = vmatprep.subr.mxu0 %v13934_v5  ;;  %v4209_v0 = vsub.f32 %v4129_v45, %v11980_v25 }
 0x384   :  { %9471 = vmatprep.subr.mxu1 %v11210_v42  ;;  %9429 = vmatpush3.msra.mxu0 %v13934_v5  ;;  %v4200_v5 = vand.u32 4294901760, %v4199_v6 }
 0x385   :  { %9472 = vmatpush3.msra.mxu1 %v11210_v42  ;;  %9430 = vmatprep.subr.mxu0 %v13935_v63  ;;  %v13940_v42 = vld [vmem:[#allocation25_spill] sm:$0xff] }
 0x386   :  { %9473 = vmatprep.subr.mxu1 %v11226_v39  ;;  %9431 = vmatpush3.msra.mxu0 %v13935_v63  ;;  %v13938_v63 = vld [vmem:[#allocation138_spill] sm:$0xff]  ;;  %v4201_v45 = vsub.f32 %v4199_v6, %v4200_v5 }
 0x387   :  { %9474 = vmatpush3.msra.mxu1 %v11226_v39  ;;  %9432 = vmatprep.subr.mxu0 %v13936_v18  ;;  %v4210_v39 = vand.u32 4294901760, %v4209_v0 }
 0x388   :  { %9475 = vmatprep.subr.mxu1 %v13907_v61  ;;  %9433 = vmatpush3.msra.mxu0 %v13936_v18  ;;  %v13939_v18 = vld [vmem:[#allocation141_spill] sm:$0xff]  ;;  %v4202_v57 = vand.u32 4294901760, %v4201_v45  ;;  %v13955_v45 = vld [vmem:[#allocation54_spill] sm:$0xff] }
 0x389   :  { %9476 = vmatpush3.msra.mxu1 %v13907_v61  ;;  %9434 = vmatprep.subr.mxu0 %v13937_v7  ;;  %v13941_v61 = vld [vmem:[#allocation144_spill] sm:$0xff] }
 0x38a   :  { %9477 = vmatprep.subr.mxu1 %v13908_v22  ;;  %9435 = vmatpush3.msra.mxu0 %v13937_v7  ;;  %v13942_v7 = vld [vmem:[#allocation26_spill] sm:$0xff] }
 0x38b   :  { %9478 = vmatpush3.msra.mxu1 %v13908_v22  ;;  %9436 = vmatprep.subr.mxu0 %v13938_v63  ;;  %v4211_v22 = vsub.f32 %v4209_v0, %v4210_v39 }
 0x38c   :  { %9480 = vmatmul.mubr.f32.vlgmr.msra.gmra.mxu1 %v11827_v19  ;;  %9437 = vmatpush3.msra.mxu0 %v13938_v63  ;;  %v13943_v63 = vld [vmem:[#allocation146_spill] sm:$0xff] }
 0x38d   :  { %9438 = vmatprep.subr.mxu0 %v13939_v18  ;;  %9489 = vmatprep.subr.mxu1 %v13940_v42 }
 0x38e   :  { %9439 = vmatpush3.msra.mxu0 %v13939_v18  ;;  %9490 = vmatpush3.msra.mxu1 %v13940_v42  ;;  %v13944_v42 = vld [vmem:[#allocation19_spill] sm:$0xff]  ;;  %v4212_v18 = vand.u32 4294901760, %v4211_v22  ;;  %v13949_v22 = vld [vmem:[#allocation24_spill] sm:$0xff] }
 0x38f   :  { %9440 = vmatprep.subr.mxu0 %v13941_v61  ;;  %9491 = vmatprep.subr.mxu1 %v13942_v7 }
 0x390   :  { %9441 = vmatpush3.msra.mxu0 %v13941_v61  ;;  %9492 = vmatpush3.msra.mxu1 %v13942_v7  ;;  %v13945_v61 = vld [vmem:[#allocation20_spill] sm:$0xff]  ;;  %v13946_v7 = vld [vmem:[#allocation21_spill] sm:$0xff] }
 0x391   :  { %9442 = vmatprep.subr.mxu0 %v13943_v63  ;;  %9493 = vmatprep.mubr.f32.mxu1 %v11971_v14 }
 0x392   :  { %9443 = vmatpush3.msra.mxu0 %v13943_v63  ;;  %9494 = vmatmul.mubr.f32.vlgmr.msra.gmra.mxu1 %v11980_v25 }
 0x393   :  { %9445 = vmatmul.mubr.f32.vlgmr.msra.gmra.mxu0 %v11827_v19  ;;  %9482 = vmatprep.subr.mxu0 %v13944_v42  ;;  %v13947_v19 = vld [vmem:[#allocation22_spill] sm:$0xff] }
 0x394   :  { %9483 = vmatpush3.msra.mxu0 %v13944_v42  ;;  %9486 = vmatprep.mubr.f32.mxu0 %v4202_v57  ;;  %v13948_v57 = vld [vmem:[#allocation23_spill] sm:$0xff] }
 0x395   :  { %9484 = vmatprep.subr.mxu0 %v13945_v61  ;;  %9503 = vmatprep.subr.mxu1 %v13944_v42 }
 0x396   :  { %9485 = vmatpush3.msra.mxu0 %v13945_v61  ;;  %9504 = vmatpush3.msra.mxu1 %v13944_v42 }
 0x397   :  { %9487 = vmatmul.mubr.f32.vlgmr.msra.gmra.mxu0 %v4212_v18  ;;  %9496 = vmatprep.subr.mxu0 %v13946_v7 }
 0x398   :  { %9497 = vmatpush3.msra.mxu0 %v13946_v7  ;;  %9500 = vmatprep.mubr.f32.mxu0 %v4199_v6 }
 0x399   :  { %9498 = vmatprep.subr.mxu0 %v13947_v19  ;;  %9505 = vmatprep.subr.mxu1 %v13945_v61 }
 0x39a   :  { %9499 = vmatpush3.msra.mxu0 %v13947_v19  ;;  %9506 = vmatpush3.msra.mxu1 %v13945_v61 }
 0x39b   :  { %9501 = vmatmul.mubr.f32.vlgmr.msra.gmra.mxu0 %v4209_v0  ;;  %9507 = vmatprep.mubr.f32.mxu1 %v4200_v5  ;;  %v13951_v0 = vld [vmem:[#allocation33_spill] sm:$0xff]  ;;  %v13952_v5 = vld [vmem:[#allocation40_spill] sm:$0xff] }
 0x39c   :  { %9510 = vmatprep.subr.mxu0 %v13948_v57  ;;  %9508 = vmatmul.mubr.f32.vlgmr.msra.gmra.mxu1 %v4210_v39  ;;  %v13950_v39 = vld [vmem:[#allocation31_spill] sm:$0xff] }
 0x39d   :  { %9511 = vmatpush3.msra.mxu0 %v13948_v57  ;;  %9517 = vmatprep.subr.mxu1 %v13944_v42  ;;  %v13956_v57 = vld [vmem:[#allocation56_spill] sm:$0xff] }
 0x39e   :  { %9512 = vmatprep.subr.mxu0 %v13949_v22  ;;  %9518 = vmatpush3.msra.mxu1 %v13944_v42 }
 0x39f   :  { %9513 = vmatpush3.msra.mxu0 %v13949_v22  ;;  %9514 = vmatprep.mubr.f32.mxu0 %v11971_v14  ;;  %v13957_v22 = vld [vmem:[#allocation60_spill] sm:$0xff] }
 0x3a0   :  { %9519 = vmatprep.subr.mxu1 %v13945_v61  ;;  %9515 = vmatmul.mubr.f32.vlgmr.msra.gmra.mxu0 %v11980_v25 }
 0x3a1   :  { %9520 = vmatpush3.msra.mxu1 %v13945_v61  ;;  %9521 = vmatprep.mubr.f32.mxu1 %v11971_v14  ;;  %v13954_v14 = vld [vmem:[#allocation48_spill] sm:$0xff] }
 0x3a2   :  { %9522 = vmatmul.mubr.f32.vlgmr.msra.gmra.mxu1 %v11980_v25  ;;  %9559 = vmatprep.subr.mxu1 %v13950_v39  ;;  %v13953_v25 = vld [vmem:[#allocation44_spill] sm:$0xff] }
 0x3a3   :  { %9560 = vmatpush3.msra.mxu1 %v13950_v39  ;;  %9524 = vmatprep.subr.mxu0 %v10665_v27  ;;  %v9131_v61 = vpop.f32.mrf.mxu1  ;;  %v13958_v39 = vld [vmem:[#allocation64_spill] sm:$0xff] }
 0x3a4   :  { %9561 = vmatprep.subr.mxu1 %v13951_v0  ;;  %9525 = vmatpush3.msra.mxu0 %v10665_v27 }
 0x3a5   :  { %9562 = vmatpush3.msra.mxu1 %v13951_v0  ;;  %9526 = vmatprep.subr.mxu0 %v10670_v30  ;;  %v2980_v42 = vpop.f32.mrf.mxu1  ;;  %v13959_v0 = vld [vmem:[#allocation70_spill] sm:$0xff] }
 0x3a6   :  { %9563 = vmatprep.subr.mxu1 %v13952_v5  ;;  %9527 = vmatpush3.msra.mxu0 %v10670_v30 }
 0x3a7   :  { %9564 = vmatpush3.msra.mxu1 %v13952_v5  ;;  %9528 = vmatprep.subr.mxu0 %v10687_v36  ;;  %v13960_v5 = vld [vmem:[#allocation75_spill] sm:$0xff] }
 0x3a8   :  { %9565 = vmatprep.subr.mxu1 %v13953_v25  ;;  %9529 = vmatpush3.msra.mxu0 %v10687_v36 }
 0x3a9   :  { %9566 = vmatpush3.msra.mxu1 %v13953_v25  ;;  %9530 = vmatprep.subr.mxu0 %v10696_v41  ;;  %v13961_v25 = vld [vmem:[#allocation79_spill] sm:$0xff] }
 0x3aa   :  { %9567 = vmatprep.subr.mxu1 %v13954_v14  ;;  %9531 = vmatpush3.msra.mxu0 %v10696_v41 }
 0x3ab   :  { %v9096_v18 = vpop.f32.mrf.mxu0  ;;  %9568 = vmatpush3.msra.mxu1 %v13954_v14  ;;  %9532 = vmatprep.subr.mxu0 %v13838_v37  ;;  %v13963_v14 = vld [vmem:[#allocation83_spill] sm:$0xff] }
 0x3ac   :  { %v2987_v6 = vadd.f32 %v9131_v61, %v9096_v18  ;;  %9569 = vmatprep.subr.mxu1 %v13955_v45  ;;  %9533 = vmatpush3.msra.mxu0 %v13838_v37  ;;  %v13962_v61 = vld [vmem:[#allocation80_spill] sm:$0xff]  ;;  %v13964_v18 = vld [vmem:[#allocation85_spill] sm:$0xff] }
 0x3ad   :  { %v2819_v7 = vpop.f32.mrf.mxu0  ;;  %9570 = vmatpush3.msra.mxu1 %v13955_v45  ;;  %9534 = vmatprep.subr.mxu0 %v13840_v51  ;;  %v13965_v45 = vld [vmem:[#allocation86_spill] sm:$0xff] }
 0x3ae   :  { %v2981_v19 = vadd.f32 %v2980_v42, %v2819_v7  ;;  %9571 = vmatprep.subr.mxu1 %v13956_v57  ;;  %9535 = vmatpush3.msra.mxu0 %v13840_v51 }
 0x3af   :  { %9572 = vmatpush3.msra.mxu1 %v13956_v57  ;;  %9536 = vmatprep.subr.mxu0 %v13842_v1 }
 0x3b0   :  { %9573 = vmatprep.subr.mxu1 %v13957_v22  ;;  %9537 = vmatpush3.msra.mxu0 %v13842_v1 }
 0x3b1   :  { %9574 = vmatpush3.msra.mxu1 %v13957_v22  ;;  %9538 = vmatprep.subr.mxu0 %v13844_v21 }
 0x3b2   :  { %9575 = vmatprep.subr.mxu1 %v13958_v39  ;;  %9539 = vmatpush3.msra.mxu0 %v13844_v21 }
 0x3b3   :  { %9576 = vmatpush3.msra.mxu1 %v13958_v39  ;;  %9540 = vmatprep.subr.mxu0 %v13846_v3 }
 0x3b4   :  { %9577 = vmatprep.subr.mxu1 %v13959_v0  ;;  %9541 = vmatpush3.msra.mxu0 %v13846_v3 }
 0x3b5   :  { %9578 = vmatpush3.msra.mxu1 %v13959_v0  ;;  %9542 = vmatprep.subr.mxu0 %v13848_v40 }
 0x3b6   :  { %9579 = vmatprep.subr.mxu1 %v13960_v5  ;;  %9543 = vmatpush3.msra.mxu0 %v13848_v40 }
 0x3b7   :  { %9580 = vmatpush3.msra.mxu1 %v13960_v5  ;;  %9544 = vmatprep.subr.mxu0 %v13850_v15 }
 0x3b8   :  { %9581 = vmatprep.subr.mxu1 %v13961_v25  ;;  %9545 = vmatpush3.msra.mxu0 %v13850_v15 }
 0x3b9   :  { %9582 = vmatpush3.msra.mxu1 %v13961_v25  ;;  %9546 = vmatprep.subr.mxu0 %v13852_v44 }
 0x3ba   :  { %9583 = vmatprep.subr.mxu1 %v13962_v61  ;;  %9547 = vmatpush3.msra.mxu0 %v13852_v44 }
 0x3bb   :  { %9584 = vmatpush3.msra.mxu1 %v13962_v61  ;;  %9548 = vmatprep.subr.mxu0 %v13854_v62 }
 0x3bc   :  { %9585 = vmatprep.subr.mxu1 %v13963_v14  ;;  %9549 = vmatpush3.msra.mxu0 %v13854_v62 }
 0x3bd   :  { %9586 = vmatpush3.msra.mxu1 %v13963_v14  ;;  %9550 = vmatprep.subr.mxu0 %v13856_v26 }
 0x3be   :  { %9587 = vmatprep.subr.mxu1 %v13964_v18  ;;  %9551 = vmatpush3.msra.mxu0 %v13856_v26 }
 0x3bf   :  { %9588 = vmatpush3.msra.mxu1 %v13964_v18  ;;  %9552 = vmatprep.subr.mxu0 %v13858_v23 }
 0x3c0   :  { %9589 = vmatprep.subr.mxu1 %v13965_v45  ;;  %9553 = vmatpush3.msra.mxu0 %v13858_v23 }
 0x3c1   :  { %9590 = vmatpush3.msra.mxu1 %v13965_v45  ;;  %9554 = vmatprep.subr.mxu0 %v13860_v33 }
 0x3c2   :  { %9629 = vmatprep.subr.mxu1 %v10665_v27  ;;  %9555 = vmatpush3.msra.mxu0 %v13860_v33 }
 0x3c3   :  { %9594 = vmatprep.subr.mxu0 %v13861_v24 }
 0x3c4   :  { %v9201_v42 = vpop.f32.mrf.mxu1 }
 0x3c6   :  { %v3186_v5 = vpop.f32.mrf.mxu1 }
 0x3cc   :  { %v9166_v7 = vpop.f32.mrf.mxu0 }
 0x3cd   :  { %v3098_v57 = vadd.f32 %v9166_v7, %v2987_v6 }
 0x3ce   :  { %v3090_v22 = vpop.f32.mrf.mxu0 }
 0x3cf   :  { %v3091_v39 = vadd.f32 %v3090_v22, %v2981_v19  ;;  %v3195_v0 = vadd.f32 %v9201_v42, %v3098_v57 }
 0x3d1   :  { %v3187_v25 = vadd.f32 %v3186_v5, %v3091_v39 }
 0x3e6   :  { %v9271_v61 = vpop.f32.mrf.mxu1 }
 0x3e8   :  { %v3406_v60 = vpop.f32.mrf.mxu1 }
 0x3ee   :  { %v9236_v14 = vpop.f32.mrf.mxu0 }
 0x3ef   :  { %v3320_v18 = vadd.f32 %v9236_v14, %v3195_v0  ;;  %v13966_v14 = vld [vmem:[#allocation36_spill] sm:$0xff] }
 0x3f0   :  { %v3313_v45 = vpop.f32.mrf.mxu0  ;;  %10373 = vrsqrt.f32 %v13966_v14  ;;  %vm2127_vm7 = vcmp.eq.f32.partialorder %v13966_v14, inf  ;;  %vm2129_vm9 = vcmp.eq.f32.partialorder %v13966_v14, 0.0 }
 0x3f1   :  { %v3413_v63 = vadd.f32 %v9271_v61, %v3320_v18  ;;  %v3314_v4 = vadd.f32 %v3313_v45, %v3187_v25  ;;  %v13967_v25 = vld [vmem:[#allocation39_spill] sm:$0xff] }
 0x3f2   :  { %10375 = vrsqrt.f32 %v13967_v25  ;;  %vm2120_vm8 = vcmp.eq.f32.partialorder %v13967_v25, inf  ;;  %vm2122_vm10 = vcmp.eq.f32.partialorder %v13967_v25, 0.0 }
 0x3f3   :  { %v3407_v12 = vadd.f32 %v3406_v60, %v3314_v4  ;;  %v4101_v45 = vmul.f32 %v3413_v63, %v3413_v63 }
 0x408   :  { %v9341_v38 = vpop.f32.mrf.mxu1 }
 0x40a   :  { %v3664_v43 = vpop.f32.mrf.mxu1 }
 0x410   :  { %v9306_v28 = vpop.f32.mrf.mxu0 }
 0x411   :  { %v3671_v9 = vadd.f32 %v9341_v38, %v9306_v28 }
 0x412   :  { %v3503_v53 = vpop.f32.mrf.mxu0 }
 0x413   :  { %v3665_v2 = vadd.f32 %v3664_v43, %v3503_v53 }
 0x42a   :  { %v9411_v6 = vpop.f32.mrf.mxu1 }
 0x42c   :  { %v3870_v39 = vpop.f32.mrf.mxu1 }
 0x432   :  { %v9376_v7 = vpop.f32.mrf.mxu0 }
 0x433   :  { %v3782_v19 = vadd.f32 %v9376_v7, %v3671_v9 }
 0x434   :  { %v3774_v42 = vpop.f32.mrf.mxu0 }
 0x435   :  { %v3775_v57 = vadd.f32 %v3774_v42, %v3665_v2  ;;  %v3879_v22 = vadd.f32 %v9411_v6, %v3782_v19 }
 0x437   :  { %v3871_v5 = vadd.f32 %v3870_v39, %v3775_v57  ;;  %v4100_v57 = vmul.f32 %v3407_v12, %v3407_v12 }
 0x44c   :  { %v9481_v0 = vpop.f32.mrf.mxu1 }
 0x44e   :  { %v4090_v60 = vpop.f32.mrf.mxu1 }
 0x452   :  { %v9495_v28 = vpop.f32.mrf.mxu1 }
 0x453   :  { %v9446_v4 = vpop.f32.mrf.mxu0 }
 0x454   :  { %v4004_v61 = vadd.f32 %v9446_v4, %v3879_v22  ;;  %v4295_v2 = vpop.f32.mrf.mxu1  ;;  %v10374_v4 = vpop.eup %10373 }
 0x455   :  { %v3997_v38 = vpop.f32.mrf.mxu0  ;;  %v10376_v63 = vpop.eup %10375 }
 0x456   :  { %v4097_v18 = vadd.f32 %v9481_v0, %v4004_v61  ;;  %v3998_v43 = vadd.f32 %v3997_v38, %v3871_v5  ;;  %v2126_v38 = vmul.f32 %v10374_v4, %v13966_v14 }
 0x457   :  { %v9488_v53 = vpop.f32.mrf.mxu0 }
 0x458   :  { %v4103_v9 = vmul.f32 %v4097_v18, %v4097_v18  ;;  %v4091_v7 = vadd.f32 %v4090_v60, %v3998_v43  ;;  %v4302_v39 = vadd.f32 %v9495_v28, %v9488_v53  ;;  %v2119_v43 = vmul.f32 %v10376_v63, %v13967_v25 }
 0x459   :  { %v4204_v6 = vpop.f32.mrf.mxu0 }
 0x45a   :  { %v12107_v19 = vadd.f32 %v4103_v9, %v4101_v45  ;;  %v4102_v42 = vmul.f32 %v4091_v7, %v4091_v7  ;;  %v4296_v10 = vadd.f32 %v4295_v2, %v4204_v6  ;;  %v2130_v6 = vand.u32 2147483648, %v13966_v14 }
 0x45b   :  { %v9502_v47 = vpop.f32.mrf.mxu0 }
 0x45c   :  { %10377 = vrsqrt.f32 %v12107_v19  ;;  %v9509_v22 = vpop.f32.mrf.mxu1  ;;  %v12110_v34 = vadd.f32 %v4102_v42, %v4100_v57  ;;  %v4385_v5 = vadd.f32 %v9502_v47, %v4302_v39  ;;  %v2128_v47 = vsel %vm2127_vm7, %v13966_v14, %v2126_v38 }
 0x45d   :  { %v4377_v0 = vpop.f32.mrf.mxu0  ;;  %v2121_v42 = vsel %vm2120_vm8, %v13967_v25, %v2119_v43  ;;  %v2123_v39 = vand.u32 2147483648, %v13967_v25  ;;  %v2131_v4 = vsel %vm2129_vm9, %v2130_v6, %v2128_v47  ;;  %vm4115_vm11 = vcmp.eq.f32.partialorder %v12107_v19, inf }
 0x45e   :  { %v4378_v61 = vadd.f32 %v4377_v0, %v4296_v10  ;;  %v4459_v60 = vpop.f32.mrf.mxu1  ;;  %10379 = vrsqrt.f32 %v12110_v34  ;;  %v4468_v18 = vadd.f32 %v9509_v22, %v4385_v5  ;;  %vm4117_vm12 = vcmp.eq.f32.partialorder %v12107_v19, 0.0 }
 0x45f   :  { %v2124_v0 = vsel %vm2122_vm10, %v2123_v39, %v2121_v42  ;;  %vm4108_vm13 = vcmp.eq.f32.partialorder %v12110_v34, inf  ;;  %v4111_v25 = vand.u32 2147483648, %v12110_v34  ;;  %vm4110_vm14 = vcmp.eq.f32.partialorder %v12110_v34, 0.0 }
 0x460   :  { %v4460_v12 = vadd.f32 %v4459_v60, %v4378_v61  ;;  %v9516_v28 = vpop.f32.mrf.mxu0  ;;  %v4118_v60 = vand.u32 2147483648, %v12107_v19 }
 0x461   :  { %v4551_v53 = vadd.f32 %v9516_v28, %v4468_v18 }
 0x462   :  { %v9523_v45 = vpop.f32.mrf.mxu1  ;;  %v4544_v9 = vpop.f32.mrf.mxu0 }
 0x463   :  { %v4545_v7 = vadd.f32 %v4544_v9, %v4460_v12  ;;  %v4630_v10 = vadd.f32 %v9523_v45, %v4551_v53 }
 0x464   :  { %v4623_v2 = vpop.f32.mrf.mxu1 }
 0x465   :  { %v4624_v57 = vadd.f32 %v4623_v2, %v4545_v7  ;;  %v4636_v22 = vrot.slane %v4630_v10, 6 }
 0x467   :  { %v4635_v5 = vrot.slane %v4624_v57, 6  ;;  %v4642_v63 = vsel %vm653_vm1, %v4636_v22, 0.0 }
 0x468   :  { %v4647_v14 = vmul.f32 0.60653067, %v4642_v63  ;;  %v4665_v53 = vrot.slane %v4642_v63, 2  ;;  %v4680_v45 = vmul.f32 0.13533528, %v4642_v63 }
 0x469   :  { %v10378_v61 = vpop.eup %10377  ;;  %v4637_v38 = vsel %vm653_vm1, %v4635_v5, %v4636_v22  ;;  %v4641_v12 = vsel %vm653_vm1, 0.0, %v4635_v5 }
 0x46a   :  { %v4114_v18 = vmul.f32 %v10378_v61, %v12107_v19  ;;  %v4646_v28 = vmul.f32 0.60653067, %v4637_v38  ;;  %v4654_v43 = vrot.slane %v4647_v14, 1  ;;  %v4644_v9 = vmul.f32 0.13533528, %v4637_v38 }
 0x46b   :  { %v10380_v7 = vpop.eup %10379  ;;  %v4643_v10 = vmul.f32 0.13533528, %v4641_v12  ;;  %v4645_v2 = vmul.f32 0.60653067, %v4641_v12  ;;  %v4662_v39 = vrot.slane %v4641_v12, 2  ;;  %v4663_v22 = vrot.slane %v4637_v38, 2 }
 0x46c   :  { %v4116_v47 = vsel %vm4115_vm11, %v12107_v19, %v4114_v18  ;;  %v4652_v6 = vrot.slane %v4646_v28, 1  ;;  %v4107_v57 = vmul.f32 %v10380_v7, %v12110_v34  ;;  %v4672_v35 = vrot.slane %v4646_v28, 3 }
 0x46d   :  { %v4119_v42 = vsel %vm4117_vm12, %v4118_v60, %v4116_v47  ;;  %v4651_v61 = vrot.slane %v4645_v2, 1  ;;  %v4674_v16 = vrot.slane %v4647_v14, 3  ;;  %v4666_v12 = vsel %vm682_vm3, %v4663_v22, %v4665_v53 }
 0x46e   :  { %v12138_v5 = vadd.f32 %v4119_v42, %v2131_v4  ;;  %v4655_v63 = vsel %vm670_vm2, %v4652_v6, %v4654_v43  ;;  %v4109_v18 = vsel %vm4108_vm13, %v12110_v34, %v4107_v57  ;;  %v4671_v38 = vrot.slane %v4645_v2, 3 }
 0x46f   :  { %v4659_v55 = vadd.f32 %v4655_v63, %v4644_v9  ;;  %v4112_v19 = vsel %vm4110_vm14, %v4111_v25, %v4109_v18  ;;  %v4653_v60 = vsel %vm670_vm2, %v4651_v61, %v4652_v6  ;;  %v4687_v7 = vrot.slane %v4680_v45, 4 }
 0x470   :  { %13968 = vst [vmem:[#allocation42_spill] sm:$0xff] %v12138_v5  ;;  %v12147_v4 = vadd.f32 %v4112_v19, %v2124_v0  ;;  %v4658_v47 = vadd.f32 %v4653_v60, %v4643_v10  ;;  %v4664_v28 = vsel %vm682_vm3, %v4662_v39, %v4663_v22  ;;  %v4675_v42 = vsel %vm692_vm4, %v4672_v35, %v4674_v16 }
 0x471   :  { %v4670_v43 = vadd.f32 %v4666_v12, %v4659_v55  ;;  %v4684_v57 = vrot.slane %v4643_v10, 4  ;;  %v4685_v5 = vrot.slane %v4644_v9, 4  ;;  %v4673_v25 = vsel %vm692_vm4, %v4671_v38, %v4672_v35 }
 0x472   :  { %v4669_v34 = vadd.f32 %v4664_v28, %v4658_v47 }
 0x473   :  { %v4679_v14 = vadd.f32 %v4675_v42, %v4670_v43  ;;  %v4688_v6 = vsel %vm706_vm5, %v4685_v5, %v4687_v7  ;;  %v4686_v0 = vsel %vm706_vm5, %v4684_v57, %v4685_v5 }
 0x474   :  { %v4678_v61 = vadd.f32 %v4673_v25, %v4669_v34 }
 0x475   :  { %v4692_v53 = vadd.f32 %v4688_v6, %v4679_v14 }
 0x476   :  { %v4691_v2 = vadd.f32 %v4686_v0, %v4678_v61 }
 0x477   :  { %v4696_v45 = vrot.slane %v4692_v53, 7  ;;  %v4704_v63 = vmul.f32 2.0, %v4692_v53 }
 0x478   :  { %v4695_v55 = vrot.slane %v4691_v2, 7  ;;  %v4703_v18 = vmul.f32 2.0, %v4691_v2  ;;  %v13998_v2 = vld [vmem:[#allocation140_spill] sm:$0xff] }
 0x479   :  { %v4702_v39 = vsel %vm718_vm6, %v4696_v45, 0.0 }
 0x47a   :  { %v4712_v16 = vrot.slane %v4702_v39, 2  ;;  %v4697_v9 = vsel %vm718_vm6, %v4695_v55, %v4696_v45  ;;  %v4701_v10 = vsel %vm718_vm6, 0.0, %v4695_v55  ;;  %v13999_v45 = vld [vmem:[#allocation101_spill] sm:$0xff]  ;;  %v14001_v55 = vld [vmem:[#allocation104_spill] sm:$0xff] }
 0x47b   :  { %v4705_v22 = vadd.f32 %v4703_v18, %v4701_v10  ;;  %v4709_v35 = vrot.slane %v4701_v10, 2  ;;  %v4710_v19 = vrot.slane %v4697_v9, 2  ;;  %v4706_v60 = vadd.f32 %v4704_v63, %v4697_v9  ;;  %v14000_v63 = vld [vmem:[#allocation143_spill] sm:$0xff]  ;;  %v14002_v18 = vld [vmem:[#allocation145_spill] sm:$0xff] }
 0x47d   :  { %v4711_v12 = vsel %vm682_vm3, %v4709_v35, %v4710_v19  ;;  %v4713_v5 = vsel %vm682_vm3, %v4710_v19, %v4712_v16  ;;  %v14003_v16 = vld [vmem:[#allocation108_spill] sm:$0xff] }
 0x47e   :  { %v4716_v38 = vadd.f32 %v4711_v12, %v4705_v22  ;;  %v4717_v7 = vadd.f32 %v4713_v5, %v4706_v60  ;;  %v12159_v47 = vsub.f32 %v4701_v10, %v4711_v12  ;;  %v12161_v43 = vsub.f32 %v4697_v9, %v4713_v5  ;;  %v14004_v9 = vld [vmem:[#allocation147_spill] sm:$0xff]  ;;  %v14005_v10 = vld [vmem:[#allocation112_spill] sm:$0xff]  ;;  %v14008_v60 = vld [vmem:[#allocation149_spill] sm:$0xff] }
 0x47f   :  { %v14006_v22 = vld [vmem:[#allocation148_spill] sm:$0xff]  ;;  %v14010_v5 = vld [vmem:[#allocation150_spill] sm:$0xff] }
 0x480   :  { %v12163_v28 = vand.u32 4294901760, %v4716_v38  ;;  %v12165_v42 = vand.u32 4294901760, %v4717_v7  ;;  %v12358_v39 = vand.u32 4294901760, %v12161_v43  ;;  %v14007_v19 = vld [vmem:[#allocation116_spill] sm:$0xff] }
 0x481   :  { %v14009_v12 = vld [vmem:[#allocation120_spill] sm:$0xff] }
 0x482   :  { %9591 = vmatprep.mubr.f32.mxu1 %v12163_v28  ;;  %v12169_v57 = vsub.f32 %v4717_v7, %v12165_v42  ;;  %v4802_v34 = vsub.f32 %v4716_v38, %v12163_v28  ;;  %v12370_v35 = vsub.f32 %v12161_v43, %v12358_v39  ;;  %v14011_v7 = vld [vmem:[#allocation124_spill] sm:$0xff] }
 0x483   :  { %9592 = vmatmul.mubr.f32.vlgmr.msra.gmra.mxu1 %v12165_v42 }
 0x484   :  { %9630 = vmatpush3.msra.mxu1 %v10665_v27  ;;  %v4803_v14 = vand.u32 4294901760, %v4802_v34  ;;  %v4813_v25 = vand.u32 4294901760, %v12169_v57  ;;  %v5497_v38 = vand.u32 4294901760, %v12370_v35 }
 0x485   :  { %9631 = vmatprep.subr.mxu1 %v10670_v30 }
 0x486   :  { %9632 = vmatpush3.msra.mxu1 %v10670_v30  ;;  %9661 = vmatprep.mubr.f32.mxu1 %v4803_v14  ;;  %v4804_v6 = vsub.f32 %v4802_v34, %v4803_v14  ;;  %v4814_v61 = vsub.f32 %v12169_v57, %v4813_v25  ;;  %v5498_v43 = vsub.f32 %v12370_v35, %v5497_v38  ;;  %v14016_v14 = vld [vmem:[#allocation91_spill] sm:$0xff] }
 0x487   :  { %9633 = vmatprep.subr.mxu1 %v10687_v36 }
 0x488   :  { %9634 = vmatpush3.msra.mxu1 %v10687_v36  ;;  %v4805_v53 = vand.u32 4294901760, %v4804_v6  ;;  %v4815_v0 = vand.u32 4294901760, %v4814_v61  ;;  %v14018_v6 = vld [vmem:[#allocation97_spill] sm:$0xff]  ;;  %v14019_v61 = vld [vmem:[#allocation100_spill] sm:$0xff] }
 0x489   :  { %9635 = vmatprep.subr.mxu1 %v10696_v41 }
 0x48a   :  { %9636 = vmatpush3.msra.mxu1 %v10696_v41  ;;  %9556 = vmatprep.mubr.f32.mxu0 %v4805_v53  ;;  %v14020_v53 = vld [vmem:[#allocation103_spill] sm:$0xff] }
 0x48b   :  { %9637 = vmatprep.subr.mxu1 %v13838_v37  ;;  %9557 = vmatmul.mubr.f32.vlgmr.msra.gmra.mxu0 %v4815_v0  ;;  %v14021_v0 = vld [vmem:[#allocation107_spill] sm:$0xff] }
 0x48c   :  { %9595 = vmatpush3.msra.mxu0 %v13861_v24  ;;  %9638 = vmatpush3.msra.mxu1 %v13838_v37  ;;  %v13973_v24 = vld [vmem:[#allocation47_spill] sm:$0xff] }
 0x48d   :  { %9596 = vmatprep.subr.mxu0 %v13864_v46  ;;  %9626 = vmatprep.mubr.f32.mxu0 %v4802_v34  ;;  %v14015_v34 = vld [vmem:[#allocation89_spill] sm:$0xff] }
 0x48e   :  { %9639 = vmatprep.subr.mxu1 %v13840_v51  ;;  %9597 = vmatpush3.msra.mxu0 %v13864_v46 }
 0x48f   :  { %9640 = vmatpush3.msra.mxu1 %v13840_v51  ;;  %9598 = vmatprep.subr.mxu0 %v13865_v50 }
 0x490   :  { %9641 = vmatprep.subr.mxu1 %v13842_v1  ;;  %9599 = vmatpush3.msra.mxu0 %v13865_v50 }
 0x491   :  { %9642 = vmatpush3.msra.mxu1 %v13842_v1  ;;  %9600 = vmatprep.subr.mxu0 %v13866_v56 }
 0x492   :  { %9643 = vmatprep.subr.mxu1 %v13844_v21  ;;  %9601 = vmatpush3.msra.mxu0 %v13866_v56  ;;  %v13984_v56 = vld [vmem:[#allocation113_spill] sm:$0xff] }
 0x493   :  { %9644 = vmatpush3.msra.mxu1 %v13844_v21  ;;  %9602 = vmatprep.subr.mxu0 %v13867_v58 }
 0x494   :  { %9645 = vmatprep.subr.mxu1 %v13846_v3  ;;  %9603 = vmatpush3.msra.mxu0 %v13867_v58  ;;  %v13985_v58 = vld [vmem:[#allocation84_spill] sm:$0xff] }
 0x495   :  { %9646 = vmatpush3.msra.mxu1 %v13846_v3  ;;  %9604 = vmatprep.subr.mxu0 %v13868_v8 }
 0x496   :  { %9647 = vmatprep.subr.mxu1 %v13848_v40  ;;  %9605 = vmatpush3.msra.mxu0 %v13868_v8  ;;  %v13986_v8 = vld [vmem:[#allocation117_spill] sm:$0xff] }
 0x497   :  { %9648 = vmatpush3.msra.mxu1 %v13848_v40  ;;  %9606 = vmatprep.subr.mxu0 %v13869_v48 }
 0x498   :  { %9649 = vmatprep.subr.mxu1 %v13850_v15  ;;  %9607 = vmatpush3.msra.mxu0 %v13869_v48 }
 0x499   :  { %9650 = vmatpush3.msra.mxu1 %v13850_v15  ;;  %9608 = vmatprep.subr.mxu0 %v13870_v32 }
 0x49a   :  { %9651 = vmatprep.subr.mxu1 %v13852_v44  ;;  %9609 = vmatpush3.msra.mxu0 %v13870_v32  ;;  %v13987_v32 = vld [vmem:[#allocation87_spill] sm:$0xff] }
 0x49b   :  { %9652 = vmatpush3.msra.mxu1 %v13852_v44  ;;  %9610 = vmatprep.subr.mxu0 %v13871_v52 }
 0x49c   :  { %9653 = vmatprep.subr.mxu1 %v13854_v62  ;;  %9611 = vmatpush3.msra.mxu0 %v13871_v52  ;;  %v13988_v52 = vld [vmem:[#allocation121_spill] sm:$0xff] }
 0x49d   :  { %9654 = vmatpush3.msra.mxu1 %v13854_v62  ;;  %9612 = vmatprep.subr.mxu0 %v13872_v29 }
 0x49e   :  { %9655 = vmatprep.subr.mxu1 %v13856_v26  ;;  %9613 = vmatpush3.msra.mxu0 %v13872_v29  ;;  %v13989_v29 = vld [vmem:[#allocation88_spill] sm:$0xff] }
 0x49f   :  { %9656 = vmatpush3.msra.mxu1 %v13856_v26  ;;  %9614 = vmatprep.subr.mxu0 %v13873_v17 }
 0x4a0   :  { %9657 = vmatprep.subr.mxu1 %v13858_v23  ;;  %9615 = vmatpush3.msra.mxu0 %v13873_v17  ;;  %v13990_v17 = vld [vmem:[#allocation125_spill] sm:$0xff] }
 0x4a1   :  { %9658 = vmatpush3.msra.mxu1 %v13858_v23  ;;  %9616 = vmatprep.subr.mxu0 %v13874_v59 }
 0x4a2   :  { %9659 = vmatprep.subr.mxu1 %v13860_v33  ;;  %9617 = vmatpush3.msra.mxu0 %v13874_v59  ;;  %v13991_v59 = vld [vmem:[#allocation90_spill] sm:$0xff] }
 0x4a3   :  { %9660 = vmatpush3.msra.mxu1 %v13860_v33  ;;  %9618 = vmatprep.subr.mxu0 %v13875_v11 }
 0x4a4   :  { %9662 = vmatmul.mubr.f32.vlgmr.msra.gmra.mxu1 %v4813_v25  ;;  %9699 = vmatprep.subr.mxu1 %v10665_v27  ;;  %v14017_v25 = vld [vmem:[#allocation94_spill] sm:$0xff] }
 0x4a5   :  { %9619 = vmatpush3.msra.mxu0 %v13875_v11  ;;  %9700 = vmatpush3.msra.mxu1 %v10665_v27  ;;  %v13969_v27 = vld [vmem:[#allocation30_spill] sm:$0xff]  ;;  %v13992_v11 = vld [vmem:[#allocation129_spill] sm:$0xff] }
 0x4a6   :  { %9731 = vmatprep.mubr.f32.mxu1 %v12163_v28  ;;  %9620 = vmatprep.subr.mxu0 %v13876_v54 }
 0x4a7   :  { %9701 = vmatprep.subr.mxu1 %v10670_v30  ;;  %9621 = vmatpush3.msra.mxu0 %v13876_v54  ;;  %v13993_v54 = vld [vmem:[#allocation92_spill] sm:$0xff] }
 0x4a8   :  { %9702 = vmatpush3.msra.mxu1 %v10670_v30  ;;  %9622 = vmatprep.subr.mxu0 %v13877_v49  ;;  %v13970_v30 = vld [vmem:[#allocation34_spill] sm:$0xff] }
 0x4a9   :  { %9703 = vmatprep.subr.mxu1 %v10687_v36  ;;  %9623 = vmatpush3.msra.mxu0 %v13877_v49  ;;  %v13994_v49 = vld [vmem:[#allocation133_spill] sm:$0xff] }
 0x4aa   :  { %9704 = vmatpush3.msra.mxu1 %v10687_v36  ;;  %9624 = vmatprep.subr.mxu0 %v13878_v13  ;;  %v13971_v36 = vld [vmem:[#allocation37_spill] sm:$0xff] }
 0x4ab   :  { %9705 = vmatprep.subr.mxu1 %v10696_v41  ;;  %9625 = vmatpush3.msra.mxu0 %v13878_v13  ;;  %v13995_v13 = vld [vmem:[#allocation95_spill] sm:$0xff] }
 0x4ac   :  { %9706 = vmatpush3.msra.mxu1 %v10696_v41  ;;  %9627 = vmatmul.mubr.f32.vlgmr.msra.gmra.mxu0 %v12169_v57  ;;  %v13972_v41 = vld [vmem:[#allocation41_spill] sm:$0xff]  ;;  %v5499_v57 = vand.u32 4294901760, %v5498_v43 }
 0x4ad   :  { %9664 = vmatprep.subr.mxu0 %v13879_v31  ;;  %9707 = vmatprep.subr.mxu1 %v13838_v37 }
 0x4ae   :  { %9665 = vmatpush3.msra.mxu0 %v13879_v31  ;;  %9696 = vmatprep.mubr.f32.mxu0 %v12163_v28  ;;  %v13996_v31 = vld [vmem:[#allocation137_spill] sm:$0xff]  ;;  %v14013_v28 = vld [vmem:[#allocation132_spill] sm:$0xff] }
 0x4af   :  { %9708 = vmatpush3.msra.mxu1 %v13838_v37  ;;  %9666 = vmatprep.subr.mxu0 %v13969_v27  ;;  %v13974_v37 = vld [vmem:[#allocation49_spill] sm:$0xff] }
 0x4b0   :  { %9709 = vmatprep.subr.mxu1 %v13840_v51  ;;  %9667 = vmatpush3.msra.mxu0 %v13969_v27  ;;  %v14022_v27 = vld [vmem:[#allocation111_spill] sm:$0xff] }
 0x4b1   :  { %9710 = vmatpush3.msra.mxu1 %v13840_v51  ;;  %9668 = vmatprep.subr.mxu0 %v13970_v30  ;;  %v13975_v51 = vld [vmem:[#allocation52_spill] sm:$0xff] }
 0x4b2   :  { %9711 = vmatprep.subr.mxu1 %v13842_v1  ;;  %9669 = vmatpush3.msra.mxu0 %v13970_v30  ;;  %v14023_v30 = vld [vmem:[#allocation115_spill] sm:$0xff] }
 0x4b3   :  { %9712 = vmatpush3.msra.mxu1 %v13842_v1  ;;  %9670 = vmatprep.subr.mxu0 %v13971_v36  ;;  %v13976_v1 = vld [vmem:[#allocation57_spill] sm:$0xff] }
 0x4b4   :  { %9713 = vmatprep.subr.mxu1 %v13844_v21  ;;  %9671 = vmatpush3.msra.mxu0 %v13971_v36  ;;  %v14024_v36 = vld [vmem:[#allocation119_spill] sm:$0xff] }
 0x4b5   :  { %9714 = vmatpush3.msra.mxu1 %v13844_v21  ;;  %9672 = vmatprep.subr.mxu0 %v13972_v41 }
 0x4b6   :  { %9715 = vmatprep.subr.mxu1 %v13846_v3  ;;  %9673 = vmatpush3.msra.mxu0 %v13972_v41  ;;  %v14025_v41 = vld [vmem:[#allocation123_spill] sm:$0xff] }
 0x4b7   :  { %9716 = vmatpush3.msra.mxu1 %v13846_v3  ;;  %9674 = vmatprep.subr.mxu0 %v13973_v24  ;;  %v13979_v3 = vld [vmem:[#allocation71_spill] sm:$0xff] }
 0x4b8   :  { %9717 = vmatprep.subr.mxu1 %v13848_v40  ;;  %9675 = vmatpush3.msra.mxu0 %v13973_v24  ;;  %v14026_v24 = vld [vmem:[#allocation127_spill] sm:$0xff] }
 0x4b9   :  { %9718 = vmatpush3.msra.mxu1 %v13848_v40  ;;  %9676 = vmatprep.subr.mxu0 %v13974_v37  ;;  %v12284_v40 = vand.u32 4294901760, %v12159_v47 }
 0x4ba   :  { %9719 = vmatprep.subr.mxu1 %v13850_v15  ;;  %9677 = vmatpush3.msra.mxu0 %v13974_v37  ;;  %v14027_v37 = vld [vmem:[#allocation131_spill] sm:$0xff] }
 0x4bb   :  { %9720 = vmatpush3.msra.mxu1 %v13850_v15  ;;  %9678 = vmatprep.subr.mxu0 %v13975_v51  ;;  %v13977_v15 = vld [vmem:[#allocation61_spill] sm:$0xff]  ;;  %v12296_v21 = vsub.f32 %v12159_v47, %v12284_v40  ;;  %v14012_v47 = vld [vmem:[#allocation128_spill] sm:$0xff] }
 0x4bc   :  { %9721 = vmatprep.subr.mxu1 %v13852_v44  ;;  %9679 = vmatpush3.msra.mxu0 %v13975_v51  ;;  %v14028_v51 = vld [vmem:[#allocation135_spill] sm:$0xff] }
 0x4bd   :  { %9722 = vmatpush3.msra.mxu1 %v13852_v44  ;;  %9680 = vmatprep.subr.mxu0 %v13976_v1  ;;  %v13978_v44 = vld [vmem:[#allocation66_spill] sm:$0xff]  ;;  %v5487_v46 = vand.u32 4294901760, %v12296_v21 }
 0x4be   :  { %9723 = vmatprep.subr.mxu1 %v13854_v62  ;;  %9681 = vmatpush3.msra.mxu0 %v13976_v1  ;;  %v14029_v1 = vld [vmem:[#allocation139_spill] sm:$0xff] }
 0x4bf   :  { %9724 = vmatpush3.msra.mxu1 %v13854_v62  ;;  %9682 = vmatprep.subr.mxu0 %v13977_v15  ;;  %v13981_v62 = vld [vmem:[#allocation105_spill] sm:$0xff]  ;;  %v5488_v50 = vsub.f32 %v12296_v21, %v5487_v46 }
 0x4c0   :  { %9725 = vmatprep.subr.mxu1 %v13856_v26  ;;  %9683 = vmatpush3.msra.mxu0 %v13977_v15  ;;  %v14030_v15 = vld [vmem:[#allocation142_spill] sm:$0xff] }
 0x4c1   :  { %9726 = vmatpush3.msra.mxu1 %v13856_v26  ;;  %9684 = vmatprep.subr.mxu0 %v13978_v44  ;;  %v13980_v26 = vld [vmem:[#allocation72_spill] sm:$0xff]  ;;  %v5489_v48 = vand.u32 4294901760, %v5488_v50  ;;  %v14040_v50 = vld [vmem:[#allocation126_spill] sm:$0xff] }
 0x4c2   :  { %9727 = vmatprep.subr.mxu1 %v13858_v23  ;;  %9685 = vmatpush3.msra.mxu0 %v13978_v44  ;;  %v14031_v44 = vld [vmem:[#allocation93_spill] sm:$0xff] }
 0x4c3   :  { %9728 = vmatpush3.msra.mxu1 %v13858_v23  ;;  %9686 = vmatprep.subr.mxu0 %v13979_v3  ;;  %v13982_v23 = vld [vmem:[#allocation109_spill] sm:$0xff] }
 0x4c4   :  { %9729 = vmatprep.subr.mxu1 %v13860_v33  ;;  %9687 = vmatpush3.msra.mxu0 %v13979_v3  ;;  %v14033_v3 = vld [vmem:[#allocation99_spill] sm:$0xff] }
 0x4c5   :  { %9730 = vmatpush3.msra.mxu1 %v13860_v33  ;;  %9688 = vmatprep.subr.mxu0 %v13980_v26  ;;  %v13983_v33 = vld [vmem:[#allocation81_spill] sm:$0xff] }
 0x4c6   :  { %9732 = vmatmul.mubr.f32.vlgmr.msra.gmra.mxu1 %v12165_v42  ;;  %9769 = vmatprep.subr.mxu1 %v13981_v62 }
 0x4c7   :  { %9689 = vmatpush3.msra.mxu0 %v13980_v26  ;;  %9770 = vmatpush3.msra.mxu1 %v13981_v62  ;;  %v14034_v26 = vld [vmem:[#allocation102_spill] sm:$0xff] }
 0x4c8   :  { %9801 = vmatprep.mubr.f32.mxu1 %v12284_v40  ;;  %9690 = vmatprep.subr.mxu0 %v13893_v20  ;;  %v14036_v62 = vld [vmem:[#allocation110_spill] sm:$0xff] }
 0x4c9   :  { %9771 = vmatprep.subr.mxu1 %v13982_v23  ;;  %9691 = vmatpush3.msra.mxu0 %v13893_v20  ;;  %v13997_v20 = vld [vmem:[#allocation98_spill] sm:$0xff] }
 0x4ca   :  { %9772 = vmatpush3.msra.mxu1 %v13982_v23  ;;  %9692 = vmatprep.subr.mxu0 %v13983_v33  ;;  %v14038_v23 = vld [vmem:[#allocation118_spill] sm:$0xff] }
 0x4cb   :  { %9773 = vmatprep.subr.mxu1 %v13984_v56  ;;  %9693 = vmatpush3.msra.mxu0 %v13983_v33  ;;  %v14039_v33 = vld [vmem:[#allocation122_spill] sm:$0xff] }
 0x4cc   :  { %9774 = vmatpush3.msra.mxu1 %v13984_v56  ;;  %9694 = vmatprep.subr.mxu0 %v13985_v58  ;;  %v14041_v56 = vld [vmem:[#allocation130_spill] sm:$0xff] }
 0x4cd   :  { %9775 = vmatprep.subr.mxu1 %v13986_v8  ;;  %9695 = vmatpush3.msra.mxu0 %v13985_v58  ;;  %v14042_v58 = vld [vmem:[#allocation134_spill] sm:$0xff] }
 0x4ce   :  { %9776 = vmatpush3.msra.mxu1 %v13986_v8  ;;  %9697 = vmatmul.mubr.f32.vlgmr.msra.gmra.mxu0 %v12165_v42  ;;  %v14014_v42 = vld [vmem:[#allocation136_spill] sm:$0xff]  ;;  %v14043_v8 = vld [vmem:[#allocation138_spill] sm:$0xff] }
 0x4cf   :  { %9734 = vmatprep.subr.mxu0 %v13987_v32  ;;  %9777 = vmatprep.subr.mxu1 %v13988_v52 }
 0x4d0   :  { %9735 = vmatpush3.msra.mxu0 %v13987_v32  ;;  %9766 = vmatprep.mubr.f32.mxu0 %v5489_v48  ;;  %v14044_v48 = vld [vmem:[#allocation141_spill] sm:$0xff] }
 0x4d1   :  { %9778 = vmatpush3.msra.mxu1 %v13988_v52  ;;  %9736 = vmatprep.subr.mxu0 %v13989_v29  ;;  %v14046_v52 = vld [vmem:[#allocation146_spill] sm:$0xff] }
 0x4d2   :  { %9779 = vmatprep.subr.mxu1 %v13990_v17  ;;  %9737 = vmatpush3.msra.mxu0 %v13989_v29 }
 0x4d3   :  { %9780 = vmatpush3.msra.mxu1 %v13990_v17  ;;  %9738 = vmatprep.subr.mxu0 %v13991_v59 }
 0x4d4   :  { %9781 = vmatprep.subr.mxu1 %v13992_v11  ;;  %9739 = vmatpush3.msra.mxu0 %v13991_v59 }
 0x4d5   :  { %9782 = vmatpush3.msra.mxu1 %v13992_v11  ;;  %9740 = vmatprep.subr.mxu0 %v13993_v54 }
 0x4d6   :  { %9783 = vmatprep.subr.mxu1 %v13994_v49  ;;  %9741 = vmatpush3.msra.mxu0 %v13993_v54 }
 0x4d7   :  { %9784 = vmatpush3.msra.mxu1 %v13994_v49  ;;  %9742 = vmatprep.subr.mxu0 %v13995_v13  ;;  %v6123_v49 = vld [vmem:[#allocation10 + $0x68] sm:$0xff] }
 0x4d8   :  { %9785 = vmatprep.subr.mxu1 %v13996_v31  ;;  %9743 = vmatpush3.msra.mxu0 %v13995_v13 }
 0x4d9   :  { %9786 = vmatpush3.msra.mxu1 %v13996_v31  ;;  %9744 = vmatprep.subr.mxu0 %v13997_v20 }
 0x4da   :  { %9787 = vmatprep.subr.mxu1 %v13998_v2  ;;  %9745 = vmatpush3.msra.mxu0 %v13997_v20 }
 0x4db   :  { %9788 = vmatpush3.msra.mxu1 %v13998_v2  ;;  %9746 = vmatprep.subr.mxu0 %v13999_v45  ;;  %v6122_v2 = vld [vmem:[#allocation10 + $0x60] sm:$0xff] }
 0x4dc   :  { %9789 = vmatprep.subr.mxu1 %v14000_v63  ;;  %9747 = vmatpush3.msra.mxu0 %v13999_v45 }
 0x4dd   :  { %9790 = vmatpush3.msra.mxu1 %v14000_v63  ;;  %9748 = vmatprep.subr.mxu0 %v14001_v55 }
 0x4de   :  { %9791 = vmatprep.subr.mxu1 %v14002_v18  ;;  %9749 = vmatpush3.msra.mxu0 %v14001_v55 }
 0x4df   :  { %9792 = vmatpush3.msra.mxu1 %v14002_v18  ;;  %9750 = vmatprep.subr.mxu0 %v14003_v16 }
 0x4e0   :  { %9793 = vmatprep.subr.mxu1 %v14004_v9  ;;  %9751 = vmatpush3.msra.mxu0 %v14003_v16 }
 0x4e1   :  { %9794 = vmatpush3.msra.mxu1 %v14004_v9  ;;  %9752 = vmatprep.subr.mxu0 %v14005_v10 }
 0x4e2   :  { %9795 = vmatprep.subr.mxu1 %v14006_v22  ;;  %9753 = vmatpush3.msra.mxu0 %v14005_v10 }
 0x4e3   :  { %9796 = vmatpush3.msra.mxu1 %v14006_v22  ;;  %9754 = vmatprep.subr.mxu0 %v14007_v19 }
 0x4e4   :  { %9797 = vmatprep.subr.mxu1 %v14008_v60  ;;  %9755 = vmatpush3.msra.mxu0 %v14007_v19 }
 0x4e5   :  { %9798 = vmatpush3.msra.mxu1 %v14008_v60  ;;  %9756 = vmatprep.subr.mxu0 %v14009_v12 }
 0x4e6   :  { %9799 = vmatprep.subr.mxu1 %v14010_v5  ;;  %9757 = vmatpush3.msra.mxu0 %v14009_v12 }
 0x4e7   :  { %9800 = vmatpush3.msra.mxu1 %v14010_v5  ;;  %9758 = vmatprep.subr.mxu0 %v14011_v7 }
 0x4e8   :  { %9802 = vmatmul.mubr.f32.vlgmr.msra.gmra.mxu1 %v12358_v39  ;;  %9839 = vmatprep.subr.mxu1 %v13987_v32 }
 0x4e9   :  { %9759 = vmatpush3.msra.mxu0 %v14011_v7  ;;  %9840 = vmatpush3.msra.mxu1 %v13987_v32 }
 0x4ea   :  { %9871 = vmatprep.mubr.f32.mxu1 %v5487_v46  ;;  %9760 = vmatprep.subr.mxu0 %v14012_v47  ;;  %v14037_v46 = vld [vmem:[#allocation114_spill] sm:$0xff] }
 0x4eb   :  { %9841 = vmatprep.subr.mxu1 %v13989_v29  ;;  %9761 = vmatpush3.msra.mxu0 %v14012_v47 }
 0x4ec   :  { %9842 = vmatpush3.msra.mxu1 %v13989_v29  ;;  %9762 = vmatprep.subr.mxu0 %v14013_v28 }
 0x4ed   :  { %9843 = vmatprep.subr.mxu1 %v13991_v59  ;;  %9763 = vmatpush3.msra.mxu0 %v14013_v28 }
 0x4ee   :  { %9844 = vmatpush3.msra.mxu1 %v13991_v59  ;;  %9764 = vmatprep.subr.mxu0 %v14014_v42 }
 0x4ef   :  { %9845 = vmatprep.subr.mxu1 %v13993_v54  ;;  %9765 = vmatpush3.msra.mxu0 %v14014_v42 }
 0x4f0   :  { %9846 = vmatpush3.msra.mxu1 %v13993_v54  ;;  %9767 = vmatmul.mubr.f32.vlgmr.msra.gmra.mxu0 %v5499_v57 }
 0x4f1   :  { %9804 = vmatprep.subr.mxu0 %v14015_v34  ;;  %9847 = vmatprep.subr.mxu1 %v13995_v13 }
 0x4f2   :  { %9805 = vmatpush3.msra.mxu0 %v14015_v34  ;;  %9836 = vmatprep.mubr.f32.mxu0 %v12296_v21  ;;  %v14032_v21 = vld [vmem:[#allocation96_spill] sm:$0xff] }
 0x4f3   :  { %9848 = vmatpush3.msra.mxu1 %v13995_v13  ;;  %9806 = vmatprep.subr.mxu0 %v14016_v14 }
 0x4f4   :  { %9849 = vmatprep.subr.mxu1 %v13997_v20  ;;  %9807 = vmatpush3.msra.mxu0 %v14016_v14  ;;  %v6118_v14 = vld [vmem:[#allocation10 + $0x40] sm:$0xff] }
 0x4f5   :  { %9850 = vmatpush3.msra.mxu1 %v13997_v20  ;;  %9808 = vmatprep.subr.mxu0 %v14017_v25 }
 0x4f6   :  { %9851 = vmatprep.subr.mxu1 %v13999_v45  ;;  %9809 = vmatpush3.msra.mxu0 %v14017_v25 }
 0x4f7   :  { %9852 = vmatpush3.msra.mxu1 %v13999_v45  ;;  %9810 = vmatprep.subr.mxu0 %v14018_v6 }
 0x4f8   :  { %9853 = vmatprep.subr.mxu1 %v14001_v55  ;;  %9811 = vmatpush3.msra.mxu0 %v14018_v6 }
 0x4f9   :  { %9854 = vmatpush3.msra.mxu1 %v14001_v55  ;;  %9812 = vmatprep.subr.mxu0 %v14019_v61 }
 0x4fa   :  { %9855 = vmatprep.subr.mxu1 %v14003_v16  ;;  %9813 = vmatpush3.msra.mxu0 %v14019_v61 }
 0x4fb   :  { %9856 = vmatpush3.msra.mxu1 %v14003_v16  ;;  %9814 = vmatprep.subr.mxu0 %v14020_v53 }
 0x4fc   :  { %9857 = vmatprep.subr.mxu1 %v14005_v10  ;;  %9815 = vmatpush3.msra.mxu0 %v14020_v53 }
 0x4fd   :  { %9858 = vmatpush3.msra.mxu1 %v14005_v10  ;;  %9816 = vmatprep.subr.mxu0 %v14021_v0 }
 0x4fe   :  { %9859 = vmatprep.subr.mxu1 %v14007_v19  ;;  %9817 = vmatpush3.msra.mxu0 %v14021_v0  ;;  %v12607_v0 = vand.u32 4294901760, %v6118_v14 }
 0x4ff   :  { %9860 = vmatpush3.msra.mxu1 %v14007_v19  ;;  %9818 = vmatprep.subr.mxu0 %v14022_v27 }
 0x500   :  { %9861 = vmatprep.subr.mxu1 %v14009_v12  ;;  %9819 = vmatpush3.msra.mxu0 %v14022_v27  ;;  %v6117_v27 = vld [vmem:[#allocation10 + $0x38] sm:$0xff] }
 0x501   :  { %9862 = vmatpush3.msra.mxu1 %v14009_v12  ;;  %9820 = vmatprep.subr.mxu0 %v14023_v30 }
 0x502   :  { %9863 = vmatprep.subr.mxu1 %v14011_v7  ;;  %9821 = vmatpush3.msra.mxu0 %v14023_v30 }
 0x503   :  { %9864 = vmatpush3.msra.mxu1 %v14011_v7  ;;  %9822 = vmatprep.subr.mxu0 %v14024_v36 }
 0x504   :  { %9865 = vmatprep.subr.mxu1 %v14012_v47  ;;  %9823 = vmatpush3.msra.mxu0 %v14024_v36 }
 0x505   :  { %9866 = vmatpush3.msra.mxu1 %v14012_v47  ;;  %9824 = vmatprep.subr.mxu0 %v14025_v41 }
 0x506   :  { %9867 = vmatprep.subr.mxu1 %v14013_v28  ;;  %9825 = vmatpush3.msra.mxu0 %v14025_v41 }
 0x507   :  { %9868 = vmatpush3.msra.mxu1 %v14013_v28  ;;  %9826 = vmatprep.subr.mxu0 %v14026_v24 }
 0x508   :  { %9869 = vmatprep.subr.mxu1 %v14014_v42  ;;  %9827 = vmatpush3.msra.mxu0 %v14026_v24  ;;  %v12615_v24 = vand.u32 4294901760, %v6117_v27 }
 0x509   :  { %9870 = vmatpush3.msra.mxu1 %v14014_v42  ;;  %9828 = vmatprep.subr.mxu0 %v14027_v37 }
 0x50a   :  { %9872 = vmatmul.mubr.f32.vlgmr.msra.gmra.mxu1 %v5497_v38  ;;  %9909 = vmatprep.subr.mxu1 %v13987_v32 }
 0x50b   :  { %9829 = vmatpush3.msra.mxu0 %v14027_v37  ;;  %9910 = vmatpush3.msra.mxu1 %v13987_v32  ;;  %v14045_v32 = vld [vmem:[#allocation144_spill] sm:$0xff]  ;;  %v12619_v37 = vsub.f32 %v6118_v14, %v12607_v0 }
 0x50c   :  { %9941 = vmatprep.mubr.f32.mxu1 %v12284_v40  ;;  %9830 = vmatprep.subr.mxu0 %v14028_v51 }
 0x50d   :  { %9911 = vmatprep.subr.mxu1 %v13989_v29  ;;  %9831 = vmatpush3.msra.mxu0 %v14028_v51  ;;  %v6116_v51 = vld [vmem:[#allocation10 + $0x30] sm:$0xff] }
 0x50e   :  { %9912 = vmatpush3.msra.mxu1 %v13989_v29  ;;  %9832 = vmatprep.subr.mxu0 %v14029_v1  ;;  %v6125_v29 = vld [vmem:[#allocation10 + $0x78] sm:$0xff] }
 0x50f   :  { %9913 = vmatprep.subr.mxu1 %v13991_v59  ;;  %9833 = vmatpush3.msra.mxu0 %v14029_v1  ;;  %v12532_v17 = vand.u32 4294901760, %v6125_v29 }
 0x510   :  { %9914 = vmatpush3.msra.mxu1 %v13991_v59  ;;  %9834 = vmatprep.subr.mxu0 %v14030_v15  ;;  %v6124_v59 = vld [vmem:[#allocation10 + $0x70] sm:$0xff] }
 0x511   :  { %9915 = vmatprep.subr.mxu1 %v13993_v54  ;;  %9835 = vmatpush3.msra.mxu0 %v14030_v15  ;;  %v12535_v11 = vsub.f32 %v6125_v29, %v12532_v17 }
 0x512   :  { %9916 = vmatpush3.msra.mxu1 %v13993_v54  ;;  %9837 = vmatmul.mubr.f32.vlgmr.msra.gmra.mxu0 %v12370_v35  ;;  %v12537_v54 = vand.u32 4294901760, %v6124_v59 }
 0x513   :  { %9874 = vmatprep.subr.mxu0 %v14031_v44  ;;  %9917 = vmatprep.subr.mxu1 %v13995_v13 }
 0x514   :  { %9875 = vmatpush3.msra.mxu0 %v14031_v44  ;;  %9906 = vmatprep.mubr.f32.mxu0 %v12284_v40  ;;  %v14035_v40 = vld [vmem:[#allocation106_spill] sm:$0xff]  ;;  %v12545_v31 = vsub.f32 %v6124_v59, %v12537_v54  ;;  %v12625_v44 = vsub.f32 %v6117_v27, %v12615_v24  ;;  %v6110_v27 = vld [vmem:[#allocation10] sm:$0xff] }
 0x515   :  { %9918 = vmatpush3.msra.mxu1 %v13995_v13  ;;  %9876 = vmatprep.subr.mxu0 %v14032_v21  ;;  %v12542_v13 = vand.u32 4294901760, %v12535_v11 }
 0x516   :  { %9919 = vmatprep.subr.mxu1 %v13997_v20  ;;  %9877 = vmatpush3.msra.mxu0 %v14032_v21  ;;  %v12554_v63 = vand.u32 4294901760, %v12545_v31  ;;  %v12627_v21 = vand.u32 4294901760, %v6116_v51 }
 0x517   :  { %9920 = vmatpush3.msra.mxu1 %v13997_v20  ;;  %9878 = vmatprep.subr.mxu0 %v14033_v3  ;;  %14047 = vst [vmem:[#allocation46_spill] sm:$0xff] %v12542_v13  ;;  %v12548_v20 = vand.u32 4294901760, %v6123_v49 }
 0x518   :  { %9921 = vmatprep.subr.mxu1 %v13999_v45  ;;  %9879 = vmatpush3.msra.mxu0 %v14033_v3  ;;  %14048 = vst [vmem:[#allocation51_spill] sm:$0xff] %v12554_v63  ;;  %v6238_v9 = vsub.f32 %v12545_v31, %v12554_v63  ;;  %v12631_v3 = vand.u32 4294901760, %v12619_v37 }
 0x519   :  { %9922 = vmatpush3.msra.mxu1 %v13999_v45  ;;  %9880 = vmatprep.subr.mxu0 %v14034_v26  ;;  %v6231_v45 = vsub.f32 %v12535_v11, %v12542_v13  ;;  %v12559_v18 = vsub.f32 %v6123_v49, %v12548_v20 }
 0x51a   :  { %9923 = vmatprep.subr.mxu1 %v14001_v55  ;;  %9881 = vmatpush3.msra.mxu0 %v14034_v26  ;;  %v6239_v60 = vand.u32 4294901760, %v6238_v9  ;;  %14054 = vst [vmem:[#allocation74_spill] sm:$0xff] %v12631_v3  ;;  %v6115_v26 = vld [vmem:[#allocation10 + $0x28] sm:$0xff] }
 0x51b   :  { %9924 = vmatpush3.msra.mxu1 %v14001_v55  ;;  %9882 = vmatprep.subr.mxu0 %v14035_v40  ;;  %v12556_v55 = vand.u32 4294901760, %v6122_v2  ;;  %v12571_v35 = vand.u32 4294901760, %v12559_v18 }
 0x51c   :  { %9925 = vmatprep.subr.mxu1 %v14003_v16  ;;  %9883 = vmatpush3.msra.mxu0 %v14035_v40 }
 0x51d   :  { %9926 = vmatpush3.msra.mxu1 %v14003_v16  ;;  %9884 = vmatprep.subr.mxu0 %v14036_v62  ;;  %v6232_v16 = vand.u32 4294901760, %v6231_v45  ;;  %14049 = vst [vmem:[#allocation55_spill] sm:$0xff] %v12571_v35 }
 0x51e   :  { %9927 = vmatprep.subr.mxu1 %v14005_v10  ;;  %9885 = vmatpush3.msra.mxu0 %v14036_v62  ;;  %v12635_v62 = vand.u32 4294901760, %v12625_v44 }
 0x51f   :  { %9928 = vmatpush3.msra.mxu1 %v14005_v10  ;;  %9886 = vmatprep.subr.mxu0 %v14037_v46  ;;  %v12565_v10 = vsub.f32 %v6122_v2, %v12556_v55 }
 0x520   :  { %9929 = vmatprep.subr.mxu1 %v14007_v19  ;;  %9887 = vmatpush3.msra.mxu0 %v14037_v46  ;;  %14055 = vst [vmem:[#allocation78_spill] sm:$0xff] %v12635_v62  ;;  %v12638_v46 = vsub.f32 %v6116_v51, %v12627_v21 }
 0x521   :  { %9930 = vmatpush3.msra.mxu1 %v14007_v19  ;;  %9888 = vmatprep.subr.mxu0 %v14038_v23  ;;  %v6120_v19 = vld [vmem:[#allocation10 + $0x50] sm:$0xff] }
 0x522   :  { %9931 = vmatprep.subr.mxu1 %v14009_v12  ;;  %9889 = vmatpush3.msra.mxu0 %v14038_v23  ;;  %v12580_v38 = vand.u32 4294901760, %v6120_v19  ;;  %v12640_v23 = vand.u32 4294901760, %v6115_v26 }
 0x523   :  { %9932 = vmatpush3.msra.mxu1 %v14009_v12  ;;  %9890 = vmatprep.subr.mxu0 %v14039_v33  ;;  %v12575_v12 = vand.u32 4294901760, %v12565_v10 }
 0x524   :  { %9933 = vmatprep.subr.mxu1 %v14011_v7  ;;  %9891 = vmatpush3.msra.mxu0 %v14039_v33  ;;  %v6280_v33 = vsub.f32 %v12619_v37, %v12631_v3 }
 0x525   :  { %9934 = vmatpush3.msra.mxu1 %v14011_v7  ;;  %9892 = vmatprep.subr.mxu0 %v14040_v50  ;;  %14050 = vst [vmem:[#allocation58_spill] sm:$0xff] %v12575_v12  ;;  %v6245_v7 = vsub.f32 %v12559_v18, %v12571_v35  ;;  %v6252_v43 = vsub.f32 %v12565_v10, %v12575_v12 }
 0x526   :  { %9935 = vmatprep.subr.mxu1 %v14012_v47  ;;  %9893 = vmatpush3.msra.mxu0 %v14040_v50  ;;  %v6114_v50 = vld [vmem:[#allocation10 + $0x20] sm:$0xff] }
 0x527   :  { %9936 = vmatpush3.msra.mxu1 %v14012_v47  ;;  %9894 = vmatprep.subr.mxu0 %v14041_v56  ;;  %v6119_v47 = vld [vmem:[#allocation10 + $0x48] sm:$0xff]  ;;  %v6246_v34 = vand.u32 4294901760, %v6245_v7  ;;  %v6253_v25 = vand.u32 4294901760, %v6252_v43 }
 0x528   :  { %9937 = vmatprep.subr.mxu1 %v14013_v28  ;;  %9895 = vmatpush3.msra.mxu0 %v14041_v56  ;;  %v12594_v57 = vand.u32 4294901760, %v6119_v47  ;;  %v6287_v56 = vsub.f32 %v12625_v44, %v12635_v62 }
 0x529   :  { %9938 = vmatpush3.msra.mxu1 %v14013_v28  ;;  %9896 = vmatprep.subr.mxu0 %v14042_v58 }
 0x52a   :  { %9939 = vmatprep.subr.mxu1 %v14014_v42  ;;  %9897 = vmatpush3.msra.mxu0 %v14042_v58  ;;  %v12604_v53 = vsub.f32 %v6119_v47, %v12594_v57  ;;  %v12649_v58 = vand.u32 4294901760, %v12638_v46  ;;  %v6288_v29 = vand.u32 4294901760, %v6287_v56  ;;  %v6111_v47 = vld [vmem:[#allocation10 + $0x8] sm:$0xff] }
 0x52b   :  { %9940 = vmatpush3.msra.mxu1 %v14014_v42  ;;  %9898 = vmatprep.subr.mxu0 %v14043_v8  ;;  %v12592_v42 = vsub.f32 %v6120_v19, %v12580_v38 }
 0x52c   :  { %9942 = vmatmul.mubr.f32.vlgmr.msra.gmra.mxu1 %v12358_v39  ;;  %9899 = vmatpush3.msra.mxu0 %v14043_v8  ;;  %v12613_v41 = vand.u32 4294901760, %v12604_v53  ;;  %14056 = vst [vmem:[#allocation27_spill] sm:$0xff] %v12649_v58  ;;  %v12652_v8 = vsub.f32 %v6115_v26, %v12640_v23  ;;  %v6294_v59 = vsub.f32 %v12638_v46, %v12649_v58 }
 0x52d   :  { %9900 = vmatprep.subr.mxu0 %v14044_v48  ;;  %9979 = vmatprep.subr.mxu1 %v6232_v16  ;;  %v12601_v61 = vand.u32 4294901760, %v12592_v42 }
 0x52e   :  { %9901 = vmatpush3.msra.mxu0 %v14044_v48  ;;  %9980 = vmatpush3.msra.mxu1 %v6232_v16  ;;  %14053 = vst [vmem:[#allocation69_spill] sm:$0xff] %v12613_v41  ;;  %v6273_v15 = vsub.f32 %v12604_v53, %v12613_v41  ;;  %v12654_v48 = vand.u32 4294901760, %v6114_v50  ;;  %v12661_v49 = vand.u32 4294901760, %v12652_v8  ;;  %v6295_v16 = vand.u32 4294901760, %v6294_v59 }
 0x52f   :  { %9902 = vmatprep.subr.mxu0 %v14045_v32  ;;  %9981 = vmatprep.subr.mxu1 %v6239_v60  ;;  %14052 = vst [vmem:[#allocation65_spill] sm:$0xff] %v12601_v61  ;;  %v6266_v36 = vsub.f32 %v12592_v42, %v12601_v61 }
 0x530   :  { %9903 = vmatpush3.msra.mxu0 %v14045_v32  ;;  %9982 = vmatpush3.msra.mxu1 %v6239_v60  ;;  %v6274_v40 = vand.u32 4294901760, %v6273_v15  ;;  %v6281_v32 = vand.u32 4294901760, %v6280_v33  ;;  %14057 = vst [vmem:[#allocation29_spill] sm:$0xff] %v12661_v49  ;;  %v12664_v2 = vsub.f32 %v6114_v50, %v12654_v48  ;;  %v6301_v9 = vsub.f32 %v12652_v8, %v12661_v49 }
 0x531   :  { %9904 = vmatprep.subr.mxu0 %v14046_v52  ;;  %9983 = vmatprep.subr.mxu1 %v6246_v34  ;;  %v6267_v1 = vand.u32 4294901760, %v6266_v36 }
 0x532   :  { %9905 = vmatpush3.msra.mxu0 %v14046_v52  ;;  %9984 = vmatpush3.msra.mxu1 %v6246_v34  ;;  %v6113_v52 = vld [vmem:[#allocation10 + $0x18] sm:$0xff]  ;;  %v12673_v19 = vand.u32 4294901760, %v12664_v2  ;;  %v6302_v43 = vand.u32 4294901760, %v6301_v9 }
 0x533   :  { %9907 = vmatmul.mubr.f32.vlgmr.msra.gmra.mxu0 %v12358_v39  ;;  %9944 = vmatprep.subr.mxu0 %v12532_v17  ;;  %v6121_v39 = vld [vmem:[#allocation10 + $0x58] sm:$0xff]  ;;  %v12667_v45 = vand.u32 4294901760, %v6113_v52 }
 0x534   :  { %9945 = vmatpush3.msra.mxu0 %v12532_v17  ;;  %v12567_v22 = vand.u32 4294901760, %v6121_v39  ;;  %9985 = vmatprep.subr.mxu1 %v6253_v25  ;;  %14058 = vst [vmem:[#allocation32_spill] sm:$0xff] %v12673_v19  ;;  %v6308_v34 = vsub.f32 %v12664_v2, %v12673_v19 }
 0x535   :  { %9946 = vmatprep.subr.mxu0 %v12537_v54  ;;  %9986 = vmatpush3.msra.mxu1 %v6253_v25  ;;  %v12679_v7 = vsub.f32 %v6113_v52, %v12667_v45  ;;  %v12687_v25 = vand.u32 4294901760, %v6111_v47 }
 0x536   :  { %9947 = vmatpush3.msra.mxu0 %v12537_v54  ;;  %v12578_v5 = vsub.f32 %v6121_v39, %v12567_v22  ;;  %v6112_v39 = vld [vmem:[#allocation10 + $0x10] sm:$0xff] }
 0x537   :  { %9948 = vmatprep.subr.mxu0 %v12548_v20  ;;  %v12675_v60 = vand.u32 4294901760, %v6112_v39  ;;  %14059 = vst [vmem:[#allocation35_spill] sm:$0xff] %v12679_v7  ;;  %v12698_v51 = vsub.f32 %v6111_v47, %v12687_v25 }
 0x538   :  { %9949 = vmatpush3.msra.mxu0 %v12548_v20  ;;  %v12589_v28 = vand.u32 4294901760, %v12578_v5 }
 0x539   :  { %9950 = vmatprep.subr.mxu0 %v12556_v55  ;;  %v12685_v14 = vsub.f32 %v6112_v39, %v12675_v60  ;;  %14063 = vst [vmem:[#allocation50_spill] sm:$0xff] %v12698_v51 }
 0x53a   :  { %9951 = vmatpush3.msra.mxu0 %v12556_v55  ;;  %14051 = vst [vmem:[#allocation63_spill] sm:$0xff] %v12589_v28  ;;  %v6259_v6 = vsub.f32 %v12578_v5, %v12589_v28 }
 0x53b   :  { %9952 = vmatprep.subr.mxu0 %v12567_v22  ;;  %14060 = vst [vmem:[#allocation38_spill] sm:$0xff] %v12685_v14  ;;  %v12695_v36 = vand.u32 4294901760, %v12685_v14 }
 0x53c   :  { %9953 = vmatpush3.msra.mxu0 %v12567_v22  ;;  %v6260_v30 = vand.u32 4294901760, %v6259_v6  ;;  %v12691_v6 = vand.u32 4294901760, %v12679_v7 }
 0x53d   :  { %9954 = vmatprep.subr.mxu0 %v12580_v38  ;;  %14062 = vst [vmem:[#allocation45_spill] sm:$0xff] %v12695_v36  ;;  %v6322_v26 = vsub.f32 %v12685_v14, %v12695_v36 }
 0x53e   :  { %9955 = vmatpush3.msra.mxu0 %v12580_v38  ;;  %9987 = vmatprep.subr.mxu1 %v6260_v30  ;;  %14061 = vst [vmem:[#allocation43_spill] sm:$0xff] %v12691_v6  ;;  %v6315_v15 = vsub.f32 %v12679_v7, %v12691_v6 }
 0x53f   :  { %9956 = vmatprep.subr.mxu0 %v12594_v57  ;;  %9988 = vmatpush3.msra.mxu1 %v6260_v30  ;;  %v6309_v30 = vand.u32 4294901760, %v6308_v34  ;;  %v6323_v56 = vand.u32 4294901760, %v6322_v26 }
 0x540   :  { %9957 = vmatpush3.msra.mxu0 %v12594_v57  ;;  %9989 = vmatprep.subr.mxu1 %v6267_v1  ;;  %v6316_v50 = vand.u32 4294901760, %v6315_v15 }
 0x541   :  { %9958 = vmatprep.subr.mxu0 %v12607_v0  ;;  %9990 = vmatpush3.msra.mxu1 %v6267_v1  ;;  %v12700_v1 = vand.u32 4294901760, %v6110_v27 }
 0x542   :  { %9959 = vmatpush3.msra.mxu0 %v12607_v0  ;;  %9991 = vmatprep.subr.mxu1 %v6274_v40 }
 0x543   :  { %9960 = vmatprep.subr.mxu0 %v12615_v24  ;;  %9992 = vmatpush3.msra.mxu1 %v6274_v40  ;;  %v12709_v40 = vand.u32 4294901760, %v12698_v51  ;;  %v12712_v33 = vsub.f32 %v6110_v27, %v12700_v1  ;;  %v9593_v9 = vpop.f32.mrf.mxu1 }
 0x544   :  { %9961 = vmatpush3.msra.mxu0 %v12615_v24  ;;  %9993 = vmatprep.subr.mxu1 %v6281_v32 }
 0x545   :  { %9962 = vmatprep.subr.mxu0 %v12627_v21  ;;  %9994 = vmatpush3.msra.mxu1 %v6281_v32  ;;  %14064 = vst [vmem:[#allocation53_spill] sm:$0xff] %v12709_v40  ;;  %14065 = vst [vmem:[#allocation59_spill] sm:$0xff] %v12712_v33  ;;  %v6329_v32 = vsub.f32 %v12698_v51, %v12709_v40  ;;  %v12719_v52 = vand.u32 4294901760, %v12712_v33  ;;  %v4968_v34 = vpop.f32.mrf.mxu1 }
 0x546   :  { %9963 = vmatpush3.msra.mxu0 %v12627_v21  ;;  %9995 = vmatprep.subr.mxu1 %v6288_v29 }
 0x547   :  { %9964 = vmatprep.subr.mxu0 %v12640_v23  ;;  %9996 = vmatpush3.msra.mxu1 %v6288_v29  ;;  %14066 = vst [vmem:[#allocation62_spill] sm:$0xff] %v12719_v52  ;;  %v6330_v29 = vand.u32 4294901760, %v6329_v32  ;;  %v6336_v59 = vsub.f32 %v12712_v33, %v12719_v52 }
 0x548   :  { %9965 = vmatpush3.msra.mxu0 %v12640_v23  ;;  %9997 = vmatprep.subr.mxu1 %v6295_v16 }
 0x549   :  { %9966 = vmatprep.subr.mxu0 %v12654_v48  ;;  %9998 = vmatpush3.msra.mxu1 %v6295_v16  ;;  %v6337_v39 = vand.u32 4294901760, %v6336_v59 }
 0x54a   :  { %9967 = vmatpush3.msra.mxu0 %v12654_v48  ;;  %9999 = vmatprep.subr.mxu1 %v6302_v43 }
 0x54b   :  { %9968 = vmatprep.subr.mxu0 %v12667_v45  ;;  %10000 = vmatpush3.msra.mxu1 %v6302_v43  ;;  %v9558_v16 = vpop.f32.mrf.mxu0 }
 0x54c   :  { %9969 = vmatpush3.msra.mxu0 %v12667_v45  ;;  %10001 = vmatprep.subr.mxu1 %v6309_v30 }
 0x54d   :  { %9970 = vmatprep.subr.mxu0 %v12675_v60  ;;  %10002 = vmatpush3.msra.mxu1 %v6309_v30  ;;  %v4807_v47 = vpop.f32.mrf.mxu0 }
 0x54e   :  { %9971 = vmatpush3.msra.mxu0 %v12675_v60  ;;  %10003 = vmatprep.subr.mxu1 %v6316_v50  ;;  %v4969_v6 = vadd.f32 %v4968_v34, %v4807_v47 }
 0x54f   :  { %9972 = vmatprep.subr.mxu0 %v12687_v25  ;;  %10004 = vmatpush3.msra.mxu1 %v6316_v50 }
 0x550   :  { %9973 = vmatpush3.msra.mxu0 %v12687_v25  ;;  %10005 = vmatprep.subr.mxu1 %v6323_v56 }
 0x551   :  { %9974 = vmatprep.subr.mxu0 %v12700_v1  ;;  %10006 = vmatpush3.msra.mxu1 %v6323_v56 }
 0x552   :  { %9975 = vmatpush3.msra.mxu0 %v12700_v1  ;;  %10007 = vmatprep.subr.mxu1 %v6330_v29 }
 0x553   :  { %10014 = vmatprep.subr.mxu0 %v12535_v11  ;;  %10008 = vmatpush3.msra.mxu1 %v6330_v29  ;;  %v4975_v29 = vadd.f32 %v9593_v9, %v9558_v16 }
 0x554   :  { %10009 = vmatprep.subr.mxu1 %v6337_v39 }
 0x555   :  { %10010 = vmatpush3.msra.mxu1 %v6337_v39 }
 0x556   :  { %10049 = vmatprep.subr.mxu1 %v12532_v17 }
 0x564   :  { %v9663_v27 = vpop.f32.mrf.mxu1 }
 0x566   :  { %v5174_v26 = vpop.f32.mrf.mxu1 }
 0x56c   :  { %v9628_v43 = vpop.f32.mrf.mxu0 }
 0x56d   :  { %v5086_v39 = vadd.f32 %v9628_v43, %v4975_v29 }
 0x56e   :  { %v5078_v30 = vpop.f32.mrf.mxu0 }
 0x56f   :  { %v5079_v58 = vadd.f32 %v5078_v30, %v4969_v6  ;;  %v5183_v41 = vadd.f32 %v9663_v27, %v5086_v39 }
 0x571   :  { %v5175_v63 = vadd.f32 %v5174_v26, %v5079_v58 }
 0x586   :  { %v9733_v50 = vpop.f32.mrf.mxu1 }
 0x588   :  { %v5394_v56 = vpop.f32.mrf.mxu1 }
 0x58e   :  { %v9698_v15 = vpop.f32.mrf.mxu0 }
 0x58f   :  { %v5308_v12 = vadd.f32 %v9698_v15, %v5183_v41 }
 0x590   :  { %v5301_v32 = vpop.f32.mrf.mxu0 }
 0x591   :  { %v5302_v51 = vadd.f32 %v5301_v32, %v5175_v63  ;;  %v5401_v16 = vadd.f32 %v9733_v50, %v5308_v12 }
 0x593   :  { %v5395_v6 = vadd.f32 %v5394_v56, %v5302_v51 }
 0x5a8   :  { %v9803_v59 = vpop.f32.mrf.mxu1 }
 0x5aa   :  { %v5652_v19 = vpop.f32.mrf.mxu1 }
 0x5b0   :  { %v9768_v52 = vpop.f32.mrf.mxu0 }
 0x5b1   :  { %v5659_v49 = vadd.f32 %v9803_v59, %v9768_v52  ;;  %v6089_v59 = vmul.f32 %v5401_v16, %v5401_v16 }
 0x5b2   :  { %v5491_v40 = vpop.f32.mrf.mxu0 }
 0x5b3   :  { %v5653_v61 = vadd.f32 %v5652_v19, %v5491_v40 }
 0x5ca   :  { %v9873_v62 = vpop.f32.mrf.mxu1 }
 0x5cc   :  { %v5858_v13 = vpop.f32.mrf.mxu1 }
 0x5d2   :  { %v9838_v36 = vpop.f32.mrf.mxu0 }
 0x5d3   :  { %v5770_v28 = vadd.f32 %v9838_v36, %v5659_v49 }
 0x5d4   :  { %v5762_v3 = vpop.f32.mrf.mxu0 }
 0x5d5   :  { %v5763_v35 = vadd.f32 %v5762_v3, %v5653_v61  ;;  %v5867_v33 = vadd.f32 %v9873_v62, %v5770_v28  ;;  %v6088_v61 = vmul.f32 %v5395_v6, %v5395_v6 }
 0x5d7   :  { %v5859_v43 = vadd.f32 %v5858_v13, %v5763_v35 }
 0x5ec   :  { %v9943_v14 = vpop.f32.mrf.mxu1 }
 0x5ee   :  { %v6078_v30 = vpop.f32.mrf.mxu1 }
 0x5f3   :  { %v9908_v7 = vpop.f32.mrf.mxu0 }
 0x5f4   :  { %v5992_v9 = vadd.f32 %v9908_v7, %v5867_v33  ;;  %v14067_v7 = vld [vmem:[#allocation42_spill] sm:$0xff] }
 0x5f5   :  { %v5985_v47 = vpop.f32.mrf.mxu0 }
 0x5f6   :  { %v6085_v34 = vadd.f32 %v9943_v14, %v5992_v9  ;;  %v5986_v52 = vadd.f32 %v5985_v47, %v5859_v43 }
 0x5f8   :  { %v6091_v27 = vmul.f32 %v6085_v34, %v6085_v34  ;;  %v6079_v19 = vadd.f32 %v6078_v30, %v5986_v52 }
 0x5fa   :  { %v6093_v49 = vadd.f32 %v6091_v27, %v6089_v59  ;;  %v6090_v41 = vmul.f32 %v6079_v19, %v6079_v19 }
 0x5fc   :  { %10381 = vrsqrt.f32 %v6093_v49  ;;  %v6092_v3 = vadd.f32 %v6090_v41, %v6088_v61  ;;  %vm6103_vm15 = vcmp.eq.f32.partialorder %v6093_v49, inf  ;;  %v6106_v12 = vand.u32 2147483648, %v6093_v49 }
 0x5fd   :  { %vm6105_vm0 = vcmp.eq.f32.partialorder %v6093_v49, 0.0 }
 0x5fe   :  { %10383 = vrsqrt.f32 %v6092_v3  ;;  %vm6096_vm1 = vcmp.eq.f32.partialorder %v6092_v3, inf  ;;  %v6099_v36 = vand.u32 2147483648, %v6092_v3  ;;  %vm6098_vm2 = vcmp.eq.f32.partialorder %v6092_v3, 0.0 }
 0x609   :  { %v10382_v63 = vpop.eup %10381 }
 0x60a   :  { %v6102_v28 = vmul.f32 %v10382_v63, %v6093_v49 }
 0x60b   :  { %v10384_v62 = vpop.eup %10383 }
 0x60c   :  { %v6104_v13 = vsel %vm6103_vm15, %v6093_v49, %v6102_v28  ;;  %v6095_v58 = vmul.f32 %v10384_v62, %v6092_v3 }
 0x60d   :  { %v6107_v35 = vsel %vm6105_vm0, %v6106_v12, %v6104_v13 }
 0x60e   :  { %v12727_v14 = vadd.f32 %v6107_v35, %v14067_v7  ;;  %v6097_v51 = vsel %vm6096_vm1, %v6092_v3, %v6095_v58  ;;  %v14081_v35 = vld [vmem:[#allocation74_spill] sm:$0xff]  ;;  %v6820_v7 = vld [vmem:[#allocation11 + $0x50] sm:$0xff] }
 0x60f   :  { %v6100_v40 = vsel %vm6098_vm2, %v6099_v36, %v6097_v51  ;;  %v6819_v36 = vld [vmem:[#allocation11 + $0x48] sm:$0xff]  ;;  %v14082_v51 = vld [vmem:[#allocation78_spill] sm:$0xff] }
 0x610   :  { %14068 = vst [vmem:[#allocation67_spill] sm:$0xff] %v12727_v14  ;;  %v12730_v33 = vand.u32 4294901760, %v12727_v14  ;;  %v7513_v15 = vrot.slane %v12727_v14, 7  ;;  %v12734_v26 = vadd.f32 %v6100_v40, %v12147_v4 }
 0x612   :  { %14069 = vst [vmem:[#allocation68_spill] sm:$0xff] %v12734_v26  ;;  %v12738_v50 = vsub.f32 %v12727_v14, %v12730_v33  ;;  %v12741_v32 = vand.u32 4294901760, %v12734_v26  ;;  %v7512_v56 = vrot.slane %v12734_v26, 7  ;;  %v7519_v29 = vsel %vm718_vm6, %v7513_v15, 0.0 }
 0x613   :  { %v7571_v34 = vrot.slane %v7519_v29, 2  ;;  %v6818_v29 = vld [vmem:[#allocation11 + $0x40] sm:$0xff] }
 0x614   :  { %v12746_v39 = vand.u32 4294901760, %v12738_v50  ;;  %10011 = vmatprep.mubr.f32.mxu1 %v12741_v32  ;;  %v12751_v4 = vsub.f32 %v12734_v26, %v12741_v32  ;;  %v7514_v16 = vsel %vm718_vm6, %v7512_v56, %v7513_v15  ;;  %v7518_v9 = vsel %vm718_vm6, 0.0, %v7512_v56 }
 0x615   :  { %10012 = vmatmul.mubr.f32.vlgmr.msra.gmra.mxu1 %v12730_v33  ;;  %v7568_v43 = vrot.slane %v7518_v9, 2  ;;  %v7569_v47 = vrot.slane %v7514_v16, 2  ;;  %v7577_v27 = vsub.f32 %v12734_v26, %v7518_v9  ;;  %v7578_v19 = vsub.f32 %v12727_v14, %v7514_v16 }
 0x616   :  { %10050 = vmatpush3.msra.mxu1 %v12532_v17  ;;  %v12758_v52 = vand.u32 4294901760, %v12751_v4  ;;  %v6220_v6 = vsub.f32 %v12738_v50, %v12746_v39  ;;  %v12916_v56 = vand.u32 4294901760, %v6820_v7 }
 0x617   :  { %10051 = vmatprep.subr.mxu1 %v12537_v54  ;;  %v7570_v30 = vsel %vm682_vm3, %v7568_v43, %v7569_v47  ;;  %v7572_v59 = vsel %vm682_vm3, %v7569_v47, %v7571_v34  ;;  %v12926_v43 = vand.u32 4294901760, %v6819_v36  ;;  %v14084_v47 = vld [vmem:[#allocation29_spill] sm:$0xff] }
 0x618   :  { %10052 = vmatpush3.msra.mxu1 %v12537_v54  ;;  %10081 = vmatprep.mubr.f32.mxu1 %v12758_v52  ;;  %v6210_v49 = vsub.f32 %v12751_v4, %v12758_v52  ;;  %v7575_v41 = vsub.f32 %v12734_v26, %v7570_v30  ;;  %v7576_v61 = vsub.f32 %v12727_v14, %v7572_v59  ;;  %v12778_v12 = vand.u32 4294901760, %v6220_v6  ;;  %v6817_v30 = vld [vmem:[#allocation11 + $0x38] sm:$0xff] }
 0x619   :  { %10053 = vmatprep.subr.mxu1 %v12548_v20  ;;  %v12937_v6 = vand.u32 4294901760, %v6818_v29 }
 0x61a   :  { %10054 = vmatpush3.msra.mxu1 %v12548_v20  ;;  %v12775_v3 = vand.u32 4294901760, %v6210_v49  ;;  %v7579_v63 = vmin.f32 %v7575_v41, %v7577_v27  ;;  %v7580_v28 = vmin.f32 %v7576_v61, %v7578_v19  ;;  %v12942_v27 = vsub.f32 %v6820_v7, %v12916_v56  ;;  %v6816_v61 = vld [vmem:[#allocation11 + $0x30] sm:$0xff] }
 0x61b   :  { %10055 = vmatprep.subr.mxu1 %v12556_v55  ;;  %v12952_v41 = vsub.f32 %v6819_v36, %v12926_v43 }
 0x61c   :  { %10056 = vmatpush3.msra.mxu1 %v12556_v55  ;;  %9976 = vmatprep.mubr.f32.mxu0 %v12775_v3  ;;  %7582 = vst [vmem:[#allocation13 + $0x20] sm:$0xff] %v7579_v63  ;;  %7583 = vst [vmem:[#allocation13 + $0x28] sm:$0xff] %v7580_v28  ;;  %v12956_v63 = vand.u32 4294901760, %v6817_v30 }
 0x61d   :  { %10057 = vmatprep.subr.mxu1 %v12567_v22  ;;  %9977 = vmatmul.mubr.f32.vlgmr.msra.gmra.mxu0 %v12778_v12 }
 0x61e   :  { %10015 = vmatpush3.msra.mxu0 %v12535_v11  ;;  %10058 = vmatpush3.msra.mxu1 %v12567_v22  ;;  %v14070_v11 = vld [vmem:[#allocation35_spill] sm:$0xff] }
 0x61f   :  { %10016 = vmatprep.subr.mxu0 %v12545_v31  ;;  %10046 = vmatprep.mubr.f32.mxu0 %v12751_v4 }
 0x620   :  { %10059 = vmatprep.subr.mxu1 %v12580_v38  ;;  %10017 = vmatpush3.msra.mxu0 %v12545_v31  ;;  %v14071_v31 = vld [vmem:[#allocation38_spill] sm:$0xff] }
 0x621   :  { %10060 = vmatpush3.msra.mxu1 %v12580_v38  ;;  %10018 = vmatprep.subr.mxu0 %v12559_v18 }
 0x622   :  { %10061 = vmatprep.subr.mxu1 %v12594_v57  ;;  %10019 = vmatpush3.msra.mxu0 %v12559_v18  ;;  %v14072_v18 = vld [vmem:[#allocation50_spill] sm:$0xff] }
 0x623   :  { %10062 = vmatpush3.msra.mxu1 %v12594_v57  ;;  %10020 = vmatprep.subr.mxu0 %v12565_v10 }
 0x624   :  { %10063 = vmatprep.subr.mxu1 %v12607_v0  ;;  %10021 = vmatpush3.msra.mxu0 %v12565_v10  ;;  %v14073_v10 = vld [vmem:[#allocation59_spill] sm:$0xff] }
 0x625   :  { %10064 = vmatpush3.msra.mxu1 %v12607_v0  ;;  %10022 = vmatprep.subr.mxu0 %v12578_v5 }
 0x626   :  { %10065 = vmatprep.subr.mxu1 %v12615_v24  ;;  %10023 = vmatpush3.msra.mxu0 %v12578_v5 }
 0x627   :  { %10066 = vmatpush3.msra.mxu1 %v12615_v24  ;;  %10024 = vmatprep.subr.mxu0 %v12592_v42 }
 0x628   :  { %10067 = vmatprep.subr.mxu1 %v12627_v21  ;;  %10025 = vmatpush3.msra.mxu0 %v12592_v42  ;;  %v6824_v42 = vld [vmem:[#allocation11 + $0x70] sm:$0xff] }
 0x629   :  { %10068 = vmatpush3.msra.mxu1 %v12627_v21  ;;  %10026 = vmatprep.subr.mxu0 %v12604_v53 }
 0x62a   :  { %10069 = vmatprep.subr.mxu1 %v12640_v23  ;;  %10027 = vmatpush3.msra.mxu0 %v12604_v53  ;;  %v6823_v53 = vld [vmem:[#allocation11 + $0x68] sm:$0xff] }
 0x62b   :  { %10070 = vmatpush3.msra.mxu1 %v12640_v23  ;;  %10028 = vmatprep.subr.mxu0 %v12619_v37 }
 0x62c   :  { %10071 = vmatprep.subr.mxu1 %v12654_v48  ;;  %10029 = vmatpush3.msra.mxu0 %v12619_v37  ;;  %v12870_v37 = vand.u32 4294901760, %v6824_v42 }
 0x62d   :  { %10072 = vmatpush3.msra.mxu1 %v12654_v48  ;;  %10030 = vmatprep.subr.mxu0 %v12625_v44 }
 0x62e   :  { %10073 = vmatprep.subr.mxu1 %v12667_v45  ;;  %10031 = vmatpush3.msra.mxu0 %v12625_v44  ;;  %v12886_v62 = vsub.f32 %v6824_v42, %v12870_v37  ;;  %v14087_v42 = vld [vmem:[#allocation45_spill] sm:$0xff] }
 0x62f   :  { %10074 = vmatpush3.msra.mxu1 %v12667_v45  ;;  %10032 = vmatprep.subr.mxu0 %v12638_v46 }
 0x630   :  { %10075 = vmatprep.subr.mxu1 %v12675_v60  ;;  %10033 = vmatpush3.msra.mxu0 %v12638_v46  ;;  %v14079_v46 = vld [vmem:[#allocation65_spill] sm:$0xff]  ;;  %v12907_v40 = vand.u32 4294901760, %v12886_v62 }
 0x631   :  { %10076 = vmatpush3.msra.mxu1 %v12675_v60  ;;  %10034 = vmatprep.subr.mxu0 %v12652_v8 }
 0x632   :  { %10077 = vmatprep.subr.mxu1 %v12687_v25  ;;  %10035 = vmatpush3.msra.mxu0 %v12652_v8  ;;  %v12879_v8 = vand.u32 4294901760, %v6823_v53 }
 0x633   :  { %10078 = vmatpush3.msra.mxu1 %v12687_v25  ;;  %10036 = vmatprep.subr.mxu0 %v12664_v2 }
 0x634   :  { %10079 = vmatprep.subr.mxu1 %v12700_v1  ;;  %10037 = vmatpush3.msra.mxu0 %v12664_v2  ;;  %v14080_v2 = vld [vmem:[#allocation69_spill] sm:$0xff] }
 0x635   :  { %10080 = vmatpush3.msra.mxu1 %v12700_v1  ;;  %10038 = vmatprep.subr.mxu0 %v14070_v11 }
 0x636   :  { %10082 = vmatmul.mubr.f32.vlgmr.msra.gmra.mxu1 %v12746_v39  ;;  %10119 = vmatprep.subr.mxu1 %v12532_v17 }
 0x637   :  { %10039 = vmatpush3.msra.mxu0 %v14070_v11  ;;  %10120 = vmatpush3.msra.mxu1 %v12532_v17  ;;  %v14074_v17 = vld [vmem:[#allocation46_spill] sm:$0xff] }
 0x638   :  { %10151 = vmatprep.mubr.f32.mxu1 %v12741_v32  ;;  %10040 = vmatprep.subr.mxu0 %v14071_v31 }
 0x639   :  { %10121 = vmatprep.subr.mxu1 %v12537_v54  ;;  %10041 = vmatpush3.msra.mxu0 %v14071_v31  ;;  %v12963_v31 = vsub.f32 %v6818_v29, %v12937_v6  ;;  %v14089_v29 = vld [vmem:[#allocation62_spill] sm:$0xff] }
 0x63a   :  { %10122 = vmatpush3.msra.mxu1 %v12537_v54  ;;  %10042 = vmatprep.subr.mxu0 %v14072_v18  ;;  %v14075_v54 = vld [vmem:[#allocation51_spill] sm:$0xff] }
 0x63b   :  { %10123 = vmatprep.subr.mxu1 %v12548_v20  ;;  %10043 = vmatpush3.msra.mxu0 %v14072_v18  ;;  %v6815_v18 = vld [vmem:[#allocation11 + $0x28] sm:$0xff] }
 0x63c   :  { %10124 = vmatpush3.msra.mxu1 %v12548_v20  ;;  %10044 = vmatprep.subr.mxu0 %v14073_v10  ;;  %v6825_v20 = vld [vmem:[#allocation11 + $0x78] sm:$0xff] }
 0x63d   :  { %10125 = vmatprep.subr.mxu1 %v12556_v55  ;;  %10045 = vmatpush3.msra.mxu0 %v14073_v10  ;;  %v12862_v5 = vand.u32 4294901760, %v6825_v20  ;;  %v12967_v10 = vand.u32 4294901760, %v12942_v27 }
 0x63e   :  { %10126 = vmatpush3.msra.mxu1 %v12556_v55  ;;  %10047 = vmatmul.mubr.f32.vlgmr.msra.gmra.mxu0 %v12738_v50  ;;  %v14076_v55 = vld [vmem:[#allocation55_spill] sm:$0xff] }
 0x63f   :  { %10084 = vmatprep.subr.mxu0 %v14074_v17  ;;  %10127 = vmatprep.subr.mxu1 %v12567_v22  ;;  %v12875_v44 = vsub.f32 %v6825_v20, %v12862_v5  ;;  %v12975_v20 = vand.u32 4294901760, %v12952_v41 }
 0x640   :  { %10085 = vmatpush3.msra.mxu0 %v14074_v17  ;;  %10116 = vmatprep.mubr.f32.mxu0 %v12741_v32  ;;  %v12969_v17 = vand.u32 4294901760, %v6816_v61 }
 0x641   :  { %10128 = vmatpush3.msra.mxu1 %v12567_v22  ;;  %10086 = vmatprep.subr.mxu0 %v14075_v54  ;;  %v14077_v22 = vld [vmem:[#allocation58_spill] sm:$0xff] }
 0x642   :  { %10129 = vmatprep.subr.mxu1 %v12580_v38  ;;  %10087 = vmatpush3.msra.mxu0 %v14075_v54 }
 0x643   :  { %10130 = vmatpush3.msra.mxu1 %v12580_v38  ;;  %10088 = vmatprep.subr.mxu0 %v14076_v55  ;;  %v14078_v38 = vld [vmem:[#allocation63_spill] sm:$0xff] }
 0x644   :  { %10131 = vmatprep.subr.mxu1 %v12594_v57  ;;  %10089 = vmatpush3.msra.mxu0 %v14076_v55  ;;  %v6814_v55 = vld [vmem:[#allocation11 + $0x20] sm:$0xff] }
 0x645   :  { %10132 = vmatpush3.msra.mxu1 %v12594_v57  ;;  %10090 = vmatprep.subr.mxu0 %v14077_v22  ;;  %v6822_v57 = vld [vmem:[#allocation11 + $0x60] sm:$0xff]  ;;  %v12994_v7 = vand.u32 4294901760, %v6814_v55 }
 0x646   :  { %10133 = vmatprep.subr.mxu1 %v12607_v0  ;;  %10091 = vmatpush3.msra.mxu0 %v14077_v22  ;;  %v12888_v13 = vand.u32 4294901760, %v6822_v57  ;;  %v12980_v22 = vsub.f32 %v6817_v30, %v12956_v63 }
 0x647   :  { %10134 = vmatpush3.msra.mxu1 %v12607_v0  ;;  %10092 = vmatprep.subr.mxu0 %v14078_v38  ;;  %v6821_v0 = vld [vmem:[#allocation11 + $0x58] sm:$0xff] }
 0x648   :  { %10135 = vmatprep.subr.mxu1 %v12615_v24  ;;  %10093 = vmatpush3.msra.mxu0 %v14078_v38  ;;  %v12900_v58 = vand.u32 4294901760, %v6821_v0 }
 0x649   :  { %10136 = vmatpush3.msra.mxu1 %v12615_v24  ;;  %10094 = vmatprep.subr.mxu0 %v14079_v46  ;;  %v12893_v24 = vand.u32 4294901760, %v12875_v44 }
 0x64a   :  { %10137 = vmatprep.subr.mxu1 %v12627_v21  ;;  %10095 = vmatpush3.msra.mxu0 %v14079_v46  ;;  %v12924_v9 = vsub.f32 %v6821_v0, %v12900_v58  ;;  %v6813_v46 = vld [vmem:[#allocation11 + $0x18] sm:$0xff]  ;;  %v14088_v0 = vld [vmem:[#allocation53_spill] sm:$0xff] }
 0x64b   :  { %10138 = vmatpush3.msra.mxu1 %v12627_v21  ;;  %10096 = vmatprep.subr.mxu0 %v14080_v2  ;;  %v12898_v21 = vsub.f32 %v6823_v53, %v12879_v8  ;;  %v6931_v15 = vsub.f32 %v12875_v44, %v12893_v24  ;;  %v12982_v53 = vand.u32 4294901760, %v6815_v18 }
 0x64c   :  { %10139 = vmatprep.subr.mxu1 %v12640_v23  ;;  %10097 = vmatpush3.msra.mxu0 %v14080_v2  ;;  %v12949_v49 = vand.u32 4294901760, %v12924_v9  ;;  %v6966_v2 = vsub.f32 %v12942_v27, %v12967_v10 }
 0x64d   :  { %10140 = vmatpush3.msra.mxu1 %v12640_v23  ;;  %10098 = vmatprep.subr.mxu0 %v14081_v35  ;;  %v12910_v23 = vsub.f32 %v6822_v57, %v12888_v13  ;;  %v12921_v16 = vand.u32 4294901760, %v12898_v21  ;;  %v6932_v59 = vand.u32 4294901760, %v6931_v15  ;;  %v12986_v57 = vand.u32 4294901760, %v12963_v31  ;;  %v6812_v15 = vld [vmem:[#allocation11 + $0x10] sm:$0xff] }
 0x64e   :  { %10141 = vmatprep.subr.mxu1 %v12654_v48  ;;  %10099 = vmatpush3.msra.mxu0 %v14081_v35  ;;  %v6959_v54 = vsub.f32 %v12924_v9, %v12949_v49  ;;  %v12992_v35 = vsub.f32 %v6816_v61, %v12969_v17  ;;  %v13016_v61 = vsub.f32 %v6814_v55, %v12994_v7 }
 0x64f   :  { %10142 = vmatpush3.msra.mxu1 %v12654_v48  ;;  %10100 = vmatprep.subr.mxu0 %v14082_v51  ;;  %v14083_v48 = vld [vmem:[#allocation27_spill] sm:$0xff]  ;;  %v12935_v34 = vand.u32 4294901760, %v12910_v23  ;;  %v6945_v19 = vsub.f32 %v12898_v21, %v12921_v16  ;;  %v6980_v30 = vsub.f32 %v12963_v31, %v12986_v57 }
 0x650   :  { %10143 = vmatprep.subr.mxu1 %v12667_v45  ;;  %10101 = vmatpush3.msra.mxu0 %v14082_v51  ;;  %v6960_v36 = vand.u32 4294901760, %v6959_v54  ;;  %v6973_v51 = vsub.f32 %v12952_v41, %v12975_v20 }
 0x651   :  { %10144 = vmatpush3.msra.mxu1 %v12667_v45  ;;  %10102 = vmatprep.subr.mxu0 %v14083_v48  ;;  %v6938_v45 = vsub.f32 %v12886_v62, %v12907_v40  ;;  %v6952_v11 = vsub.f32 %v12910_v23, %v12935_v34 }
 0x652   :  { %10145 = vmatprep.subr.mxu1 %v12675_v60  ;;  %10103 = vmatpush3.msra.mxu0 %v14083_v48  ;;  %v13001_v48 = vand.u32 4294901760, %v12980_v22 }
 0x653   :  { %10146 = vmatpush3.msra.mxu1 %v12675_v60  ;;  %10104 = vmatprep.subr.mxu0 %v14084_v47  ;;  %v14085_v60 = vld [vmem:[#allocation32_spill] sm:$0xff]  ;;  %v6939_v28 = vand.u32 4294901760, %v6938_v45  ;;  %v6953_v38 = vand.u32 4294901760, %v6952_v11  ;;  %v13006_v45 = vand.u32 4294901760, %v6813_v46  ;;  %v6810_v11 = vld [vmem:[#allocation11] sm:$0xff] }
 0x654   :  { %10147 = vmatprep.subr.mxu1 %v12687_v25  ;;  %10105 = vmatpush3.msra.mxu0 %v14084_v47  ;;  %v13004_v47 = vsub.f32 %v6815_v18, %v12982_v53  ;;  %v6987_v18 = vsub.f32 %v12980_v22, %v13001_v48 }
 0x655   :  { %10148 = vmatpush3.msra.mxu1 %v12687_v25  ;;  %10106 = vmatprep.subr.mxu0 %v14085_v60  ;;  %v14086_v25 = vld [vmem:[#allocation43_spill] sm:$0xff]  ;;  %v13029_v54 = vsub.f32 %v6813_v46, %v13006_v45  ;;  %v13043_v46 = vand.u32 4294901760, %v6810_v11 }
 0x656   :  { %10149 = vmatprep.subr.mxu1 %v12700_v1  ;;  %10107 = vmatpush3.msra.mxu0 %v14085_v60  ;;  %v6967_v60 = vand.u32 4294901760, %v6966_v2  ;;  %v6988_v2 = vand.u32 4294901760, %v6987_v18 }
 0x657   :  { %10150 = vmatpush3.msra.mxu1 %v12700_v1  ;;  %10108 = vmatprep.subr.mxu0 %v14086_v25  ;;  %v6946_v1 = vand.u32 4294901760, %v6945_v19  ;;  %v13013_v19 = vand.u32 4294901760, %v12992_v35  ;;  %v13063_v18 = vsub.f32 %v6810_v11, %v13043_v46 }
 0x658   :  { %10152 = vmatmul.mubr.f32.vlgmr.msra.gmra.mxu1 %v12730_v33  ;;  %10189 = vmatprep.subr.mxu1 %v6932_v59 }
 0x659   :  { %10109 = vmatpush3.msra.mxu0 %v14086_v25  ;;  %10190 = vmatpush3.msra.mxu1 %v6932_v59  ;;  %v6811_v59 = vld [vmem:[#allocation11 + $0x8] sm:$0xff]  ;;  %v13018_v25 = vand.u32 4294901760, %v6812_v15  ;;  %v13077_v26 = vand.u32 4294901760, %v13063_v18 }
 0x65a   :  { %10221 = vmatprep.mubr.f32.mxu1 %v12741_v32  ;;  %10110 = vmatprep.subr.mxu0 %v14087_v42  ;;  %v13031_v55 = vand.u32 4294901760, %v6811_v59 }
 0x65b   :  { %10191 = vmatprep.subr.mxu1 %v6939_v28  ;;  %10111 = vmatpush3.msra.mxu0 %v14087_v42  ;;  %v6981_v42 = vand.u32 4294901760, %v6980_v30  ;;  %v7036_v14 = vsub.f32 %v13063_v18, %v13077_v26 }
 0x65c   :  { %10192 = vmatpush3.msra.mxu1 %v6939_v28  ;;  %10112 = vmatprep.subr.mxu0 %v14088_v0  ;;  %v6974_v28 = vand.u32 4294901760, %v6973_v51  ;;  %v13050_v51 = vand.u32 4294901760, %v13029_v54 }
 0x65d   :  { %10193 = vmatprep.subr.mxu1 %v6946_v1  ;;  %10113 = vmatpush3.msra.mxu0 %v14088_v0  ;;  %v13041_v0 = vsub.f32 %v6812_v15, %v13018_v25 }
 0x65e   :  { %10194 = vmatpush3.msra.mxu1 %v6946_v1  ;;  %10114 = vmatprep.subr.mxu0 %v14089_v29  ;;  %v13026_v1 = vand.u32 4294901760, %v13004_v47 }
 0x65f   :  { %10195 = vmatprep.subr.mxu1 %v6953_v38  ;;  %10115 = vmatpush3.msra.mxu0 %v14089_v29  ;;  %v13053_v29 = vsub.f32 %v6811_v59, %v13031_v55 }
 0x660   :  { %10196 = vmatpush3.msra.mxu1 %v6953_v38  ;;  %10117 = vmatmul.mubr.f32.vlgmr.msra.gmra.mxu0 %v12730_v33  ;;  %v13038_v38 = vand.u32 4294901760, %v13016_v61 }
 0x661   :  { %10154 = vmatprep.subr.mxu0 %v12862_v5  ;;  %10197 = vmatprep.subr.mxu1 %v6960_v36 }
 0x662   :  { %10155 = vmatpush3.msra.mxu0 %v12862_v5  ;;  %10186 = vmatprep.mubr.f32.mxu0 %v12775_v3  ;;  %v6994_v3 = vsub.f32 %v12992_v35, %v13013_v19  ;;  %v7008_v30 = vsub.f32 %v13016_v61, %v13038_v38 }
 0x663   :  { %10198 = vmatpush3.msra.mxu1 %v6960_v36  ;;  %10156 = vmatprep.subr.mxu0 %v12870_v37  ;;  %v7001_v36 = vsub.f32 %v13004_v47, %v13026_v1 }
 0x664   :  { %10199 = vmatprep.subr.mxu1 %v6967_v60  ;;  %10157 = vmatpush3.msra.mxu0 %v12870_v37  ;;  %v6995_v15 = vand.u32 4294901760, %v6994_v3  ;;  %v13070_v3 = vand.u32 4294901760, %v13053_v29  ;;  %v7009_v11 = vand.u32 4294901760, %v7008_v30 }
 0x665   :  { %10200 = vmatpush3.msra.mxu1 %v6967_v60  ;;  %10158 = vmatprep.subr.mxu0 %v12879_v8  ;;  %v13060_v60 = vand.u32 4294901760, %v13041_v0  ;;  %v7002_v59 = vand.u32 4294901760, %v7001_v36 }
 0x666   :  { %10201 = vmatprep.subr.mxu1 %v6974_v28  ;;  %10159 = vmatpush3.msra.mxu0 %v12879_v8 }
 0x667   :  { %10202 = vmatpush3.msra.mxu1 %v6974_v28  ;;  %10160 = vmatprep.subr.mxu0 %v12888_v13  ;;  %v7015_v28 = vsub.f32 %v13029_v54, %v13050_v51 }
 0x668   :  { %10203 = vmatprep.subr.mxu1 %v6981_v42  ;;  %10161 = vmatpush3.msra.mxu0 %v12888_v13 }
 0x669   :  { %10204 = vmatpush3.msra.mxu1 %v6981_v42  ;;  %10162 = vmatprep.subr.mxu0 %v12900_v58  ;;  %v7022_v42 = vsub.f32 %v13041_v0, %v13060_v60  ;;  %v7016_v36 = vand.u32 4294901760, %v7015_v28 }
 0x66a   :  { %10205 = vmatprep.subr.mxu1 %v6988_v2  ;;  %10163 = vmatpush3.msra.mxu0 %v12900_v58 }
 0x66b   :  { %10206 = vmatpush3.msra.mxu1 %v6988_v2  ;;  %10164 = vmatprep.subr.mxu0 %v12916_v56  ;;  %v7029_v2 = vsub.f32 %v13053_v29, %v13070_v3  ;;  %v7023_v30 = vand.u32 4294901760, %v7022_v42  ;;  %v14091_v42 = vld [vmem:[#allocation68_spill] sm:$0xff] }
 0x66c   :  { %10207 = vmatprep.subr.mxu1 %v6995_v15  ;;  %10165 = vmatpush3.msra.mxu0 %v12916_v56 }
 0x66d   :  { %10208 = vmatpush3.msra.mxu1 %v6995_v15  ;;  %10166 = vmatprep.subr.mxu0 %v12926_v43  ;;  %v7030_v15 = vand.u32 4294901760, %v7029_v2 }
 0x66e   :  { %10209 = vmatprep.subr.mxu1 %v7002_v59  ;;  %10167 = vmatpush3.msra.mxu0 %v12926_v43 }
 0x66f   :  { %10210 = vmatpush3.msra.mxu1 %v7002_v59  ;;  %10168 = vmatprep.subr.mxu0 %v12937_v6  ;;  %v7037_v59 = vand.u32 4294901760, %v7036_v14 }
 0x670   :  { %10211 = vmatprep.subr.mxu1 %v7009_v11  ;;  %10169 = vmatpush3.msra.mxu0 %v12937_v6 }
 0x671   :  { %10212 = vmatpush3.msra.mxu1 %v7009_v11  ;;  %10170 = vmatprep.subr.mxu0 %v12956_v63 }
 0x672   :  { %10213 = vmatprep.subr.mxu1 %v7016_v36  ;;  %10171 = vmatpush3.msra.mxu0 %v12956_v63 }
 0x673   :  { %10214 = vmatpush3.msra.mxu1 %v7016_v36  ;;  %10172 = vmatprep.subr.mxu0 %v12969_v17 }
 0x674   :  { %10215 = vmatprep.subr.mxu1 %v7023_v30  ;;  %10173 = vmatpush3.msra.mxu0 %v12969_v17 }
 0x675   :  { %10216 = vmatpush3.msra.mxu1 %v7023_v30  ;;  %10174 = vmatprep.subr.mxu0 %v12982_v53 }
 0x676   :  { %10217 = vmatprep.subr.mxu1 %v7030_v15  ;;  %10175 = vmatpush3.msra.mxu0 %v12982_v53 }
 0x677   :  { %10218 = vmatpush3.msra.mxu1 %v7030_v15  ;;  %10176 = vmatprep.subr.mxu0 %v12994_v7 }
 0x678   :  { %10219 = vmatprep.subr.mxu1 %v7037_v59  ;;  %10177 = vmatpush3.msra.mxu0 %v12994_v7 }
 0x679   :  { %10220 = vmatpush3.msra.mxu1 %v7037_v59  ;;  %10178 = vmatprep.subr.mxu0 %v13006_v45 }
 0x67a   :  { %10222 = vmatmul.mubr.f32.vlgmr.msra.gmra.mxu1 %v12730_v33  ;;  %10259 = vmatprep.subr.mxu1 %v12862_v5 }
 0x67b   :  { %10179 = vmatpush3.msra.mxu0 %v13006_v45  ;;  %10260 = vmatpush3.msra.mxu1 %v12862_v5 }
 0x67c   :  { %10291 = vmatprep.mubr.f32.mxu1 %v12758_v52  ;;  %10180 = vmatprep.subr.mxu0 %v13018_v25 }
 0x67d   :  { %10261 = vmatprep.subr.mxu1 %v12870_v37  ;;  %10181 = vmatpush3.msra.mxu0 %v13018_v25 }
 0x67e   :  { %10262 = vmatpush3.msra.mxu1 %v12870_v37  ;;  %10182 = vmatprep.subr.mxu0 %v13031_v55 }
 0x67f   :  { %10263 = vmatprep.subr.mxu1 %v12879_v8  ;;  %10183 = vmatpush3.msra.mxu0 %v13031_v55 }
 0x680   :  { %10264 = vmatpush3.msra.mxu1 %v12879_v8  ;;  %10184 = vmatprep.subr.mxu0 %v13043_v46 }
 0x681   :  { %10265 = vmatprep.subr.mxu1 %v12888_v13  ;;  %10185 = vmatpush3.msra.mxu0 %v13043_v46 }
 0x682   :  { %10266 = vmatpush3.msra.mxu1 %v12888_v13  ;;  %10187 = vmatmul.mubr.f32.vlgmr.msra.gmra.mxu0 %v12778_v12 }
 0x683   :  { %10224 = vmatprep.subr.mxu0 %v12875_v44  ;;  %10267 = vmatprep.subr.mxu1 %v12900_v58 }
 0x684   :  { %10225 = vmatpush3.msra.mxu0 %v12875_v44  ;;  %10256 = vmatprep.mubr.f32.mxu0 %v12751_v4 }
 0x685   :  { %10268 = vmatpush3.msra.mxu1 %v12900_v58  ;;  %10226 = vmatprep.subr.mxu0 %v12886_v62 }
 0x686   :  { %10269 = vmatprep.subr.mxu1 %v12916_v56  ;;  %10227 = vmatpush3.msra.mxu0 %v12886_v62 }
 0x687   :  { %10270 = vmatpush3.msra.mxu1 %v12916_v56  ;;  %10228 = vmatprep.subr.mxu0 %v12898_v21 }
 0x688   :  { %10271 = vmatprep.subr.mxu1 %v12926_v43  ;;  %10229 = vmatpush3.msra.mxu0 %v12898_v21 }
 0x689   :  { %10272 = vmatpush3.msra.mxu1 %v12926_v43  ;;  %10230 = vmatprep.subr.mxu0 %v12910_v23 }
 0x68a   :  { %10273 = vmatprep.subr.mxu1 %v12937_v6  ;;  %10231 = vmatpush3.msra.mxu0 %v12910_v23 }
 0x68b   :  { %10274 = vmatpush3.msra.mxu1 %v12937_v6  ;;  %10232 = vmatprep.subr.mxu0 %v12924_v9 }
 0x68c   :  { %10275 = vmatprep.subr.mxu1 %v12956_v63  ;;  %10233 = vmatpush3.msra.mxu0 %v12924_v9 }
 0x68d   :  { %10276 = vmatpush3.msra.mxu1 %v12956_v63  ;;  %10234 = vmatprep.subr.mxu0 %v12942_v27 }
 0x68e   :  { %10277 = vmatprep.subr.mxu1 %v12969_v17  ;;  %10235 = vmatpush3.msra.mxu0 %v12942_v27 }
 0x68f   :  { %10278 = vmatpush3.msra.mxu1 %v12969_v17  ;;  %10236 = vmatprep.subr.mxu0 %v12952_v41 }
 0x690   :  { %10279 = vmatprep.subr.mxu1 %v12982_v53  ;;  %10237 = vmatpush3.msra.mxu0 %v12952_v41 }
 0x691   :  { %10280 = vmatpush3.msra.mxu1 %v12982_v53  ;;  %10238 = vmatprep.subr.mxu0 %v12963_v31 }
 0x692   :  { %10281 = vmatprep.subr.mxu1 %v12994_v7  ;;  %10239 = vmatpush3.msra.mxu0 %v12963_v31 }
 0x693   :  { %10282 = vmatpush3.msra.mxu1 %v12994_v7  ;;  %10240 = vmatprep.subr.mxu0 %v12980_v22 }
 0x694   :  { %10283 = vmatprep.subr.mxu1 %v13006_v45  ;;  %10241 = vmatpush3.msra.mxu0 %v12980_v22 }
 0x695   :  { %10284 = vmatpush3.msra.mxu1 %v13006_v45  ;;  %10242 = vmatprep.subr.mxu0 %v12992_v35 }
 0x696   :  { %10285 = vmatprep.subr.mxu1 %v13018_v25  ;;  %10243 = vmatpush3.msra.mxu0 %v12992_v35 }
 0x697   :  { %10286 = vmatpush3.msra.mxu1 %v13018_v25  ;;  %10244 = vmatprep.subr.mxu0 %v13004_v47 }
 0x698   :  { %10287 = vmatprep.subr.mxu1 %v13031_v55  ;;  %10245 = vmatpush3.msra.mxu0 %v13004_v47 }
 0x699   :  { %10288 = vmatpush3.msra.mxu1 %v13031_v55  ;;  %10246 = vmatprep.subr.mxu0 %v13016_v61 }
 0x69a   :  { %10289 = vmatprep.subr.mxu1 %v13043_v46  ;;  %10247 = vmatpush3.msra.mxu0 %v13016_v61 }
 0x69b   :  { %10290 = vmatpush3.msra.mxu1 %v13043_v46  ;;  %10248 = vmatprep.subr.mxu0 %v13029_v54 }
 0x69c   :  { %10292 = vmatmul.mubr.f32.vlgmr.msra.gmra.mxu1 %v12746_v39  ;;  %10329 = vmatprep.subr.mxu1 %v12862_v5 }
 0x69d   :  { %10249 = vmatpush3.msra.mxu0 %v13029_v54  ;;  %10330 = vmatpush3.msra.mxu1 %v12862_v5 }
 0x69e   :  { %10361 = vmatprep.mubr.f32.mxu1 %v12741_v32  ;;  %10250 = vmatprep.subr.mxu0 %v13041_v0 }
 0x69f   :  { %10331 = vmatprep.subr.mxu1 %v12870_v37  ;;  %10251 = vmatpush3.msra.mxu0 %v13041_v0 }
 0x6a0   :  { %10332 = vmatpush3.msra.mxu1 %v12870_v37  ;;  %10252 = vmatprep.subr.mxu0 %v13053_v29 }
 0x6a1   :  { %10333 = vmatprep.subr.mxu1 %v12879_v8  ;;  %10253 = vmatpush3.msra.mxu0 %v13053_v29 }
 0x6a2   :  { %10334 = vmatpush3.msra.mxu1 %v12879_v8  ;;  %10254 = vmatprep.subr.mxu0 %v13063_v18 }
 0x6a3   :  { %10335 = vmatprep.subr.mxu1 %v12888_v13  ;;  %10255 = vmatpush3.msra.mxu0 %v13063_v18 }
 0x6a4   :  { %10336 = vmatpush3.msra.mxu1 %v12888_v13  ;;  %10257 = vmatmul.mubr.f32.vlgmr.msra.gmra.mxu0 %v12738_v50 }
 0x6a5   :  { %10294 = vmatprep.subr.mxu0 %v12893_v24  ;;  %10337 = vmatprep.subr.mxu1 %v12900_v58 }
 0x6a6   :  { %10295 = vmatpush3.msra.mxu0 %v12893_v24  ;;  %10326 = vmatprep.mubr.f32.mxu0 %v12741_v32 }
 0x6a7   :  { %10338 = vmatpush3.msra.mxu1 %v12900_v58  ;;  %10296 = vmatprep.subr.mxu0 %v12907_v40 }
 0x6a8   :  { %10339 = vmatprep.subr.mxu1 %v12916_v56  ;;  %10297 = vmatpush3.msra.mxu0 %v12907_v40 }
 0x6a9   :  { %10340 = vmatpush3.msra.mxu1 %v12916_v56  ;;  %10298 = vmatprep.subr.mxu0 %v12921_v16 }
 0x6aa   :  { %10341 = vmatprep.subr.mxu1 %v12926_v43  ;;  %10299 = vmatpush3.msra.mxu0 %v12921_v16 }
 0x6ab   :  { %10342 = vmatpush3.msra.mxu1 %v12926_v43  ;;  %10300 = vmatprep.subr.mxu0 %v12935_v34 }
 0x6ac   :  { %10343 = vmatprep.subr.mxu1 %v12937_v6  ;;  %10301 = vmatpush3.msra.mxu0 %v12935_v34 }
 0x6ad   :  { %10344 = vmatpush3.msra.mxu1 %v12937_v6  ;;  %10302 = vmatprep.subr.mxu0 %v12949_v49 }
 0x6ae   :  { %10345 = vmatprep.subr.mxu1 %v12956_v63  ;;  %10303 = vmatpush3.msra.mxu0 %v12949_v49 }
 0x6af   :  { %10346 = vmatpush3.msra.mxu1 %v12956_v63  ;;  %10304 = vmatprep.subr.mxu0 %v12967_v10 }
 0x6b0   :  { %10347 = vmatprep.subr.mxu1 %v12969_v17  ;;  %10305 = vmatpush3.msra.mxu0 %v12967_v10 }
 0x6b1   :  { %10348 = vmatpush3.msra.mxu1 %v12969_v17  ;;  %10306 = vmatprep.subr.mxu0 %v12975_v20 }
 0x6b2   :  { %10349 = vmatprep.subr.mxu1 %v12982_v53  ;;  %10307 = vmatpush3.msra.mxu0 %v12975_v20 }
 0x6b3   :  { %10350 = vmatpush3.msra.mxu1 %v12982_v53  ;;  %10308 = vmatprep.subr.mxu0 %v12986_v57 }
 0x6b4   :  { %10351 = vmatprep.subr.mxu1 %v12994_v7  ;;  %10309 = vmatpush3.msra.mxu0 %v12986_v57 }
 0x6b5   :  { %10352 = vmatpush3.msra.mxu1 %v12994_v7  ;;  %10310 = vmatprep.subr.mxu0 %v13001_v48 }
 0x6b6   :  { %10353 = vmatprep.subr.mxu1 %v13006_v45  ;;  %10311 = vmatpush3.msra.mxu0 %v13001_v48 }
 0x6b7   :  { %10354 = vmatpush3.msra.mxu1 %v13006_v45  ;;  %10312 = vmatprep.subr.mxu0 %v13013_v19 }
 0x6b8   :  { %10355 = vmatprep.subr.mxu1 %v13018_v25  ;;  %10313 = vmatpush3.msra.mxu0 %v13013_v19 }
 0x6b9   :  { %10356 = vmatpush3.msra.mxu1 %v13018_v25  ;;  %10314 = vmatprep.subr.mxu0 %v13026_v1 }
 0x6ba   :  { %10357 = vmatprep.subr.mxu1 %v13031_v55  ;;  %10315 = vmatpush3.msra.mxu0 %v13026_v1 }
 0x6bb   :  { %10358 = vmatpush3.msra.mxu1 %v13031_v55  ;;  %10316 = vmatprep.subr.mxu0 %v13038_v38 }
 0x6bc   :  { %10359 = vmatprep.subr.mxu1 %v13043_v46  ;;  %10317 = vmatpush3.msra.mxu0 %v13038_v38 }
 0x6bd   :  { %10360 = vmatpush3.msra.mxu1 %v13043_v46  ;;  %10318 = vmatprep.subr.mxu0 %v13050_v51  ;;  %v14090_v46 = vld [vmem:[#allocation67_spill] sm:$0xff] }
 0x6be   :  { %10362 = vmatmul.mubr.f32.vlgmr.msra.gmra.mxu1 %v12730_v33  ;;  %10319 = vmatpush3.msra.mxu0 %v13050_v51 }
 0x6bf   :  { %10320 = vmatprep.subr.mxu0 %v13060_v60 }
 0x6c0   :  { %10321 = vmatpush3.msra.mxu0 %v13060_v60 }
 0x6c1   :  { %10322 = vmatprep.subr.mxu0 %v13070_v3 }
 0x6c2   :  { %10323 = vmatpush3.msra.mxu0 %v13070_v3 }
 0x6c3   :  { %10324 = vmatprep.subr.mxu0 %v13077_v26 }
 0x6c4   :  { %10325 = vmatpush3.msra.mxu0 %v13077_v26 }
 0x6c5   :  { %10327 = vmatmul.mubr.f32.vlgmr.msra.gmra.mxu0 %v12730_v33 }
 0x6d5   :  { %v10013_v50 = vpop.f32.mrf.mxu1 }
 0x6d7   :  { %v6374_v4 = vpop.f32.mrf.mxu1 }
 0x6dd   :  { %v9978_v14 = vpop.f32.mrf.mxu0 }
 0x6de   :  { %v6381_v44 = vadd.f32 %v10013_v50, %v9978_v14 }
 0x6df   :  { %v6213_v32 = vpop.f32.mrf.mxu0 }
 0x6e0   :  { %v6375_v5 = vadd.f32 %v6374_v4, %v6213_v32 }
 0x6f6   :  { %v10083_v52 = vpop.f32.mrf.mxu1 }
 0x6f8   :  { %v6580_v62 = vpop.f32.mrf.mxu1 }
 0x6fe   :  { %v10048_v39 = vpop.f32.mrf.mxu0 }
 0x6ff   :  { %v6492_v13 = vadd.f32 %v10048_v39, %v6381_v44 }
 0x700   :  { %v6484_v12 = vpop.f32.mrf.mxu0 }
 0x701   :  { %v6485_v8 = vadd.f32 %v6484_v12, %v6375_v5  ;;  %v6589_v26 = vadd.f32 %v10083_v52, %v6492_v13 }
 0x703   :  { %v6581_v58 = vadd.f32 %v6580_v62, %v6485_v8 }
 0x718   :  { %v10153_v24 = vpop.f32.mrf.mxu1 }
 0x71a   :  { %v6800_v33 = vpop.f32.mrf.mxu1 }
 0x720   :  { %v10118_v37 = vpop.f32.mrf.mxu0 }
 0x721   :  { %v6714_v56 = vadd.f32 %v10118_v37, %v6589_v26 }
 0x722   :  { %v6707_v21 = vpop.f32.mrf.mxu0 }
 0x723   :  { %v6708_v23 = vadd.f32 %v6707_v21, %v6581_v58  ;;  %v6807_v6 = vadd.f32 %v10153_v24, %v6714_v56 }
 0x725   :  { %v6801_v43 = vadd.f32 %v6800_v33, %v6708_v23  ;;  %v7523_v10 = vrot.slane %v6807_v6, 7  ;;  %v7541_v51 = vsub.f32 %v14090_v46, %v6807_v6 }
 0x727   :  { %v7522_v49 = vrot.slane %v6801_v43, 7  ;;  %v7529_v48 = vsel %vm718_vm6, %v7523_v10, 0.0  ;;  %v7540_v36 = vsub.f32 %v14091_v42, %v6801_v43 }
 0x728   :  { %v7553_v55 = vrot.slane %v7529_v48, 2 }
 0x729   :  { %v7524_v22 = vsel %vm718_vm6, %v7522_v49, %v7523_v10  ;;  %v7528_v53 = vsel %vm718_vm6, 0.0, %v7522_v49 }
 0x72a   :  { %v7550_v47 = vrot.slane %v7528_v53, 2  ;;  %v7551_v45 = vrot.slane %v7524_v22, 2  ;;  %v7595_v21 = vsub.f32 %v14091_v42, %v7528_v53  ;;  %v7596_v58 = vsub.f32 %v14090_v46, %v7524_v22 }
 0x72c   :  { %v7552_v29 = vsel %vm682_vm3, %v7550_v47, %v7551_v45  ;;  %v7554_v18 = vsel %vm682_vm3, %v7551_v45, %v7553_v55 }
 0x72d   :  { %v7557_v14 = vsub.f32 %v14091_v42, %v7552_v29  ;;  %v7558_v50 = vsub.f32 %v14090_v46, %v7554_v18 }
 0x73a   :  { %v10223_v16 = vpop.f32.mrf.mxu1 }
 0x73c   :  { %v7074_v27 = vpop.f32.mrf.mxu1 }
 0x742   :  { %v10188_v40 = vpop.f32.mrf.mxu0 }
 0x743   :  { %v7081_v41 = vadd.f32 %v10223_v16, %v10188_v40 }
 0x744   :  { %v6913_v9 = vpop.f32.mrf.mxu0 }
 0x745   :  { %v7075_v17 = vadd.f32 %v7074_v27, %v6913_v9 }
 0x75c   :  { %v10293_v63 = vpop.f32.mrf.mxu1 }
 0x75e   :  { %v7280_v35 = vpop.f32.mrf.mxu1 }
 0x764   :  { %v10258_v34 = vpop.f32.mrf.mxu0 }
 0x765   :  { %v7192_v20 = vadd.f32 %v10258_v34, %v7081_v41 }
 0x766   :  { %v7184_v31 = vpop.f32.mrf.mxu0 }
 0x767   :  { %v7185_v57 = vadd.f32 %v7184_v31, %v7075_v17  ;;  %v7289_v7 = vadd.f32 %v10293_v63, %v7192_v20 }
 0x769   :  { %v7281_v1 = vadd.f32 %v7280_v35, %v7185_v57 }
 0x77e   :  { %v10363_v19 = vpop.f32.mrf.mxu1 }
 0x780   :  { %v7500_v60 = vpop.f32.mrf.mxu1 }
 0x785   :  { %v10328_v61 = vpop.f32.mrf.mxu0 }
 0x786   :  { %v7414_v25 = vadd.f32 %v10328_v61, %v7289_v7 }
 0x787   :  { %v7407_v54 = vpop.f32.mrf.mxu0 }
 0x788   :  { %v7507_v38 = vadd.f32 %v10363_v19, %v7414_v25  ;;  %v7408_v0 = vadd.f32 %v7407_v54, %v7281_v1 }
 0x78a   :  { %v7533_v28 = vrot.slane %v7507_v38, 7  ;;  %v7543_v3 = vsub.f32 %v14090_v46, %v7507_v38  ;;  %v7501_v11 = vadd.f32 %v7500_v60, %v7408_v0 }
 0x78c   :  { %v7539_v2 = vsel %vm718_vm6, %v7533_v28, 0.0  ;;  %v7545_v30 = vmin.f32 %v7541_v51, %v7543_v3  ;;  %v7532_v15 = vrot.slane %v7501_v11, 7  ;;  %v7542_v59 = vsub.f32 %v14091_v42, %v7501_v11 }
 0x78d   :  { %v7589_v32 = vrot.slane %v7539_v2, 2 }
 0x78e   :  { %7547 = vst [vmem:[#allocation13 + $0x8] sm:$0xff] %v7545_v30  ;;  %v7534_v39 = vsel %vm718_vm6, %v7532_v15, %v7533_v28  ;;  %v7538_v4 = vsel %vm718_vm6, 0.0, %v7532_v15  ;;  %v7544_v52 = vmin.f32 %v7540_v36, %v7542_v59 }
 0x78f   :  { %v7559_v12 = vsub.f32 %v14091_v42, %v7538_v4  ;;  %v7560_v5 = vsub.f32 %v14090_v46, %v7534_v39  ;;  %v7586_v37 = vrot.slane %v7538_v4, 2  ;;  %v7587_v44 = vrot.slane %v7534_v39, 2 }
 0x790   :  { %7546 = vst [vmem:[#allocation13] sm:$0xff] %v7544_v52 }
 0x791   :  { %v7561_v8 = vmin.f32 %v7557_v14, %v7559_v12  ;;  %v7562_v62 = vmin.f32 %v7558_v50, %v7560_v5  ;;  %v7588_v13 = vsel %vm682_vm3, %v7586_v37, %v7587_v44  ;;  %v7590_v24 = vsel %vm682_vm3, %v7587_v44, %v7589_v32 }
 0x792   :  { %v7593_v40 = vsub.f32 %v14091_v42, %v7588_v13  ;;  %v7594_v26 = vsub.f32 %v14090_v46, %v7590_v24 }
 0x793   :  { %7564 = vst [vmem:[#allocation13 + $0x10] sm:$0xff] %v7561_v8  ;;  %7565 = vst [vmem:[#allocation13 + $0x18] sm:$0xff] %v7562_v62 }
 0x794   :  { %v7597_v23 = vmin.f32 %v7593_v40, %v7595_v21  ;;  %v7598_v33 = vmin.f32 %v7594_v26, %v7596_v58 }
 0x796   :  { %7600 = vst [vmem:[#allocation13 + $0x30] sm:$0xff] %v7597_v23  ;;  %7601 = vst [vmem:[#allocation13 + $0x38] sm:$0xff] %v7598_v33 }
 0x797   :  { %10516 = shalt.err (!%p10513_p6)
}
 0x798   :  { %7613 = dma.vmem_to_hbm [thread:$0]  %s7608_s5, 1024, %s13275_s6, [#allocation4], %s10537_s26, %s10537_s26, %s10538_s27  }
 0x799   :  { %10533 = dma.done.wait [#allocation4], 1024  }
 0x79a   :  { %10534 = vsyncadd [#allocation4], 4294966272 }
 0x79b   :  { %7617 = vsyncpa [#allocation3], 1 }
 0x79c   :  { %7618 = vsyncpa [#allocation6], 1 }
 0x79d   :  { %7619 = vsyncpa [#allocation9], 1 }
 0x79e   :  { %7620 = vsyncpa [#allocation12], 1 }
 0x79f   :  { %7621 = vsyncpa [#allocation4], 1 }

</bundles_post_ra>
